<compile_context>
chip_gen: v7x
topology: tpu7x:2x2x1
jax: 0.10.0
libtpu: 0.0.40
codegen_flags: <defaults>
</compile_context>

<pallas_src>
import math

import jax
import jax.numpy as jnp
from jax.experimental import pallas as pl
from jax.experimental.pallas import tpu as pltpu

# ----------------------------- model dims -----------------------------------
B, S, D = 2, 8, 32          # batch, seq, hidden_dim
NUM_HEADS = 4
HEAD_DIM = D // NUM_HEADS
FFN_DIM = 4 * D
NUM_CLASSES = 3
NUM_LAYERS = 2
MAX_DISTANCE = 5
VOCAB = 50
LANE = 128                  # lane-dense classifier output width

WEIGHT_KEYS = ("wqkv", "bqkv", "wo", "bo",
               "g1", "beta1", "w1", "b1", "w2", "b2", "g2", "beta2",
               "wc", "bc")


def _num_core_splits(batch):
    """2-way grid split only on 2-TensorCore chips (v7x); else fold the batch."""
    kind = jax.devices()[0].device_kind.lower()
    return 2 if (("v7" in kind or "7x" in kind) and batch % 2 == 0) else 1


# -------------------- fused whole-forward kernel -----------------------------
def _make_kernel(blk_b):
    """Kernel processing `blk_b` batch elements (all layers + classifier)."""
    scale = 1.0 / math.sqrt(HEAD_DIM)

    def kernel(ids_ref, dtab_ref,                         # scalar prefetch (SMEM)
               mask_ref, dist_ref, tok_emb_ref, pos_emb_ref,
               wqkv_ref, bqkv_ref, wo_ref, bo_ref,
               g1_ref, beta1_ref, w1_ref, b1_ref, w2_ref, b2_ref,
               g2_ref, beta2_ref, wc_ref, bc_ref,
               logits_ref):
        b0 = pl.program_id(0) * blk_b

        # ---- fused token + position embedding (row gather from VMEM tables,
        #      indices read as scalars from SMEM) -> x (blk_b*S, D) ----------
        rows = []
        for b in range(blk_b):
            for s in range(S):
                tok = ids_ref[b0 + b, s]
                rows.append(tok_emb_ref[pl.ds(tok, 1), :] +
                            pos_emb_ref[pl.ds(s, 1), :])
        x = jnp.concatenate(rows, axis=0)                  # (R, D) f32

        # ---- fused additive attention bias: distance embedding + mask ------
        tbl = [[dtab_ref[h, kk] for kk in range(MAX_DISTANCE + 1)]
               for h in range(NUM_HEADS)]                  # SMEM scalar reads
        dclip = jnp.clip(dist_ref[...], 0, MAX_DISTANCE)   # (blk_b, S, S) int32
        maskf = mask_ref[...].astype(jnp.float32)          # (blk_b, 1, S)
        bias_list = []
        for b in range(blk_b):
            madd = (1.0 - maskf[b]) * (-1e9)               # (1, S)
            for h in range(NUM_HEADS):
                acc = jnp.zeros((S, S), jnp.float32)
                for kk in range(MAX_DISTANCE + 1):
                    acc = jnp.where(dclip[b] == kk, tbl[h][kk], acc)
                bias_list.append(acc + madd)
        bias = jnp.stack(bias_list, axis=0)                # (blk_b*H, S, S)
        # NOTE: a fully-masked query row would attend uniformly to masked keys;
        # cannot happen with the masks used here (latent robustness caveat).

        # ---- transformer layers (all weights resident in VMEM, static unroll)
        for l in range(NUM_LAYERS):
            # fused dense QKV: one (R, D) @ (D, 3D) MXU pass
            qkv = jnp.dot(x, wqkv_ref[l],
                          preferred_element_type=jnp.float32) + bqkv_ref[l]
            q_l, k_l, v_l = [], [], []
            for b in range(blk_b):
                qkv_b = qkv[b * S:(b + 1) * S, :]          # (S, 3D)
                for h in range(NUM_HEADS):
                    o = h * HEAD_DIM
                    q_l.append(qkv_b[:, o:o + HEAD_DIM])
                    k_l.append(qkv_b[:, D + o:D + o + HEAD_DIM])
                    v_l.append(qkv_b[:, 2 * D + o:2 * D + o + HEAD_DIM])
            q = jnp.stack(q_l, axis=0)                     # (G, S, Hd)
            k = jnp.stack(k_l, axis=0)
            v = jnp.stack(v_l, axis=0)

            scores = jnp.einsum('gqc,gkc->gqk', q, k,
                                preferred_element_type=jnp.float32) * scale + bias
            m = jnp.max(scores, axis=-1, keepdims=True)
            p = jnp.exp(scores - m)
            p = p / jnp.sum(p, axis=-1, keepdims=True)     # exact softmax
            ctx = jnp.einsum('gqk,gkc->gqc', p, v,
                             preferred_element_type=jnp.float32)  # (G, S, Hd)

            # concat heads -> one (R, D) @ (D, D) output projection
            ctx2d = jnp.concatenate(
                [jnp.concatenate([ctx[b * NUM_HEADS + h]
                                  for h in range(NUM_HEADS)], axis=-1)
                 for b in range(blk_b)], axis=0)           # (R, D)
            attn_out = jnp.dot(ctx2d, wo_ref[l],
                               preferred_element_type=jnp.float32) + bo_ref[l]

            # residual + layernorm 1
            x1 = x + attn_out
            mu = jnp.mean(x1, axis=-1, keepdims=True)
            var = jnp.mean(jnp.square(x1 - mu), axis=-1, keepdims=True)
            x1 = (x1 - mu) * jax.lax.rsqrt(var + 1e-5) * g1_ref[l] + beta1_ref[l]

            # feed-forward (ReLU)
            hdn = jnp.maximum(
                jnp.dot(x1, w1_ref[l], preferred_element_type=jnp.float32)
                + b1_ref[l], 0.0)
            ffn = jnp.dot(hdn, w2_ref[l],
                          preferred_element_type=jnp.float32) + b2_ref[l]

            # residual + layernorm 2
            x2 = x1 + ffn
            mu2 = jnp.mean(x2, axis=-1, keepdims=True)
            var2 = jnp.mean(jnp.square(x2 - mu2), axis=-1, keepdims=True)
            x = (x2 - mu2) * jax.lax.rsqrt(var2 + 1e-5) * g2_ref[l] + beta2_ref[l]

        # ---- classifier on CLS tokens; lane-dense 128-wide padded output ----
        cls = jnp.concatenate([x[b * S:b * S + 1, :] for b in range(blk_b)],
                              axis=0)                      # (blk_b, D)
        logits = jnp.dot(cls, wc_ref[...],
                         preferred_element_type=jnp.float32) + bc_ref[...]
        logits_ref[...] = logits.reshape(blk_b, 1, LANE)

    return kernel


def transformer_forward(input_ids, attention_mask, distance_matrix, params):
    batch = input_ids.shape[0]
    splits = _num_core_splits(batch)
    blk_b = batch // splits
    weights = [params[k] for k in WEIGHT_KEYS]

    def _const(shape):
        # full-array, grid-invariant block: weights stay resident in VMEM
        n = len(shape)
        return pl.BlockSpec(shape, lambda c, ids, dtab, _n=n: (0,) * _n)

    in_specs = [
        pl.BlockSpec((blk_b, 1, S), lambda c, ids, dtab: (c, 0, 0)),   # mask
        pl.BlockSpec((blk_b, S, S), lambda c, ids, dtab: (c, 0, 0)),   # distance
        _const(params["tok_emb"].shape),
        _const(params["pos_emb"].shape),
    ] + [_const(w.shape) for w in weights]
    out_spec = pl.BlockSpec((blk_b, 1, LANE), lambda c, ids, dtab: (c, 0, 0))

    out = pl.pallas_call(
        _make_kernel(blk_b),
        out_shape=jax.ShapeDtypeStruct((batch, 1, LANE), jnp.float32),
        grid_spec=pltpu.PrefetchScalarGridSpec(
            num_scalar_prefetch=2,                # input_ids, dist_table -> SMEM
            grid=(splits,),
            in_specs=in_specs,
            out_specs=out_spec,
        ),
        compiler_params=pltpu.CompilerParams(
            dimension_semantics=("parallel",)),   # 2-way only on v7x
    )(input_ids.astype(jnp.int32), params["dist_table"],
      attention_mask.reshape(batch, 1, S).astype(jnp.int32),
      distance_matrix.astype(jnp.int32),
      params["tok_emb"], params["pos_emb"], *weights)
    return out[:, 0, :NUM_CLASSES]                # (B, C)


# ------------------------------ parameters ----------------------------------
def init_params(key):
    keys = iter(jax.random.split(key, 64))

    def w(shape, scale=0.02):
        return (scale * jax.random.normal(next(keys), shape)).astype(jnp.float32)

    acc = {k: [] for k in WEIGHT_KEYS if k not in ("wc", "bc")}
    for _ in range(NUM_LAYERS):
        Wq, Wk, Wv, Wo = w((D, D)), w((D, D)), w((D, D)), w((D, D))
        bq, bk, bv, bo_ = w((1, D)), w((1, D)), w((1, D)), w((1, D))
        acc["wqkv"].append(jnp.concatenate([Wq, Wk, Wv], axis=1))   # (D, 3D)
        acc["bqkv"].append(jnp.concatenate([bq, bk, bv], axis=1))   # (1, 3D)
        acc["wo"].append(Wo)                                        # (D, D)
        acc["bo"].append(bo_)
        acc["g1"].append(jnp.ones((1, D), jnp.float32))
        acc["beta1"].append(jnp.zeros((1, D), jnp.float32))
        acc["w1"].append(w((D, FFN_DIM)))
        acc["b1"].append(w((1, FFN_DIM)))
        acc["w2"].append(w((FFN_DIM, D)))
        acc["b2"].append(w((1, D)))
        acc["g2"].append(jnp.ones((1, D), jnp.float32))
        acc["beta2"].append(jnp.zeros((1, D), jnp.float32))

    params = {k: jnp.stack(v, axis=0) for k, v in acc.items()}

    wc = w((D, NUM_CLASSES))
    bc = w((1, NUM_CLASSES))
    params.update({
        # TODO(synk): BertModel.from_pretrained('bert-base-uncased') replaced by a
        # deterministic token+position embedding table (no checkpoint loading).
        "tok_emb": w((VOCAB, D), scale=0.1),
        "pos_emb": w((S, D), scale=0.1),
        "dist_table": w((NUM_HEADS, MAX_DISTANCE + 1), scale=0.1),
        # zero-padded to 128 lanes so the classifier matmul/store are lane-dense
        "wc": jnp.pad(wc, ((0, 0), (0, LANE - NUM_CLASSES))),
        "bc": jnp.pad(bc, ((0, 0), (0, LANE - NUM_CLASSES))),
    })
    return params


# ------------------------------- forward ------------------------------------
def forward(params, input_ids, attention_mask, distance_matrix):
    # everything (embedding gather, graph-distance bias, layers, classifier)
    # runs inside one Pallas kernel
    return transformer_forward(input_ids, attention_mask, distance_matrix, params)


# --------------------------------- main --------------------------------------
if __name__ == "__main__":
    key = jax.random.PRNGKey(0)
    k_p, k_ids, k_mask, k_dist = jax.random.split(key, 4)

    params = init_params(k_p)
    input_ids = jax.random.randint(k_ids, (B, S), 0, VOCAB, dtype=jnp.int32)
    attention_mask = jnp.concatenate(
        [jnp.ones((B, S - 2), jnp.int32), jnp.zeros((B, 2), jnp.int32)], axis=1)
    distance_matrix = jax.random.randint(k_dist, (B, S, S), 0, 10, dtype=jnp.int32)

    fwd = jax.jit(forward)
    logits = fwd(params, input_ids, attention_mask, distance_matrix)
    jax.block_until_ready(logits)
    assert logits.shape == (B, NUM_CLASSES)
    print("KERNEL_OK")
</pallas_src>

<mosaic_0001>
module attributes {stable_mosaic.version = 11 : i64} {
  func.func @kernel(%arg0: i32, %arg1: memref<2x8xi32, #tpu.memory_space<smem>>, %arg2: memref<4x6xf32, #tpu.memory_space<smem>>, %arg3: memref<2x1x8xi32, #tpu.memory_space<vmem>>, %arg4: memref<2x8x8xi32, #tpu.memory_space<vmem>>, %arg5: memref<50x32xf32, #tpu.memory_space<vmem>>, %arg6: memref<8x32xf32, #tpu.memory_space<vmem>>, %arg7: memref<2x32x96xf32, #tpu.memory_space<vmem>>, %arg8: memref<2x1x96xf32, #tpu.memory_space<vmem>>, %arg9: memref<2x32x32xf32, #tpu.memory_space<vmem>>, %arg10: memref<2x1x32xf32, #tpu.memory_space<vmem>>, %arg11: memref<2x1x32xf32, #tpu.memory_space<vmem>>, %arg12: memref<2x1x32xf32, #tpu.memory_space<vmem>>, %arg13: memref<2x32x128xf32, #tpu.memory_space<vmem>>, %arg14: memref<2x1x128xf32, #tpu.memory_space<vmem>>, %arg15: memref<2x128x32xf32, #tpu.memory_space<vmem>>, %arg16: memref<2x1x32xf32, #tpu.memory_space<vmem>>, %arg17: memref<2x1x32xf32, #tpu.memory_space<vmem>>, %arg18: memref<2x1x32xf32, #tpu.memory_space<vmem>>, %arg19: memref<32x128xf32, #tpu.memory_space<vmem>>, %arg20: memref<1x128xf32, #tpu.memory_space<vmem>>, %arg21: memref<2x1x128xf32, #tpu.memory_space<vmem>>) attributes {dimension_semantics = [#tpu.dimension_semantics<parallel>], iteration_bounds = array<i64: 1>, scalar_prefetch = 2 : i64, scratch_operands = 0 : i64, tpu.core_type = #tpu.core_type<tc>, window_params = [{transform_indices = @transform_0, window_bounds = array<i64: 2, 1, 8>}, {transform_indices = @transform_1, window_bounds = array<i64: 2, 8, 8>}, {pipeline_mode = #tpu.pipeline_mode<synchronous>, transform_indices = @transform_2, window_bounds = array<i64: 50, 32>}, {pipeline_mode = #tpu.pipeline_mode<synchronous>, transform_indices = @transform_3, window_bounds = array<i64: 8, 32>}, {pipeline_mode = #tpu.pipeline_mode<synchronous>, transform_indices = @transform_4, window_bounds = array<i64: 2, 32, 96>}, {pipeline_mode = #tpu.pipeline_mode<synchronous>, transform_indices = @transform_5, window_bounds = array<i64: 2, 1, 96>}, {pipeline_mode = #tpu.pipeline_mode<synchronous>, transform_indices = @transform_6, window_bounds = array<i64: 2, 32, 32>}, {pipeline_mode = #tpu.pipeline_mode<synchronous>, transform_indices = @transform_7, window_bounds = array<i64: 2, 1, 32>}, {pipeline_mode = #tpu.pipeline_mode<synchronous>, transform_indices = @transform_8, window_bounds = array<i64: 2, 1, 32>}, {pipeline_mode = #tpu.pipeline_mode<synchronous>, transform_indices = @transform_9, window_bounds = array<i64: 2, 1, 32>}, {pipeline_mode = #tpu.pipeline_mode<synchronous>, transform_indices = @transform_10, window_bounds = array<i64: 2, 32, 128>}, {pipeline_mode = #tpu.pipeline_mode<synchronous>, transform_indices = @transform_11, window_bounds = array<i64: 2, 1, 128>}, {pipeline_mode = #tpu.pipeline_mode<synchronous>, transform_indices = @transform_12, window_bounds = array<i64: 2, 128, 32>}, {pipeline_mode = #tpu.pipeline_mode<synchronous>, transform_indices = @transform_13, window_bounds = array<i64: 2, 1, 32>}, {pipeline_mode = #tpu.pipeline_mode<synchronous>, transform_indices = @transform_14, window_bounds = array<i64: 2, 1, 32>}, {pipeline_mode = #tpu.pipeline_mode<synchronous>, transform_indices = @transform_15, window_bounds = array<i64: 2, 1, 32>}, {pipeline_mode = #tpu.pipeline_mode<synchronous>, transform_indices = @transform_16, window_bounds = array<i64: 32, 128>}, {pipeline_mode = #tpu.pipeline_mode<synchronous>, transform_indices = @transform_17, window_bounds = array<i64: 1, 128>}, {transform_indices = @transform_18, window_bounds = array<i64: 2, 1, 128>}]} {
    %c2_i32 = arith.constant 2 : i32
    %0 = arith.muli %arg0, %c2_i32 : i32
    %c0_i32 = arith.constant 0 : i32
    %1 = arith.addi %0, %c0_i32 : i32
    %2 = arith.index_cast %1 : i32 to index
    %c0 = arith.constant 0 : index
    %3 = memref.load %arg1[%2, %c0] : memref<2x8xi32, #tpu.memory_space<smem>>
    %4 = arith.index_cast %3 : i32 to index
    %c0_0 = arith.constant 0 : index
    %5 = vector.load %arg5[%4, %c0_0] : memref<50x32xf32, #tpu.memory_space<vmem>>, vector<1x32xf32>
    %c0_1 = arith.constant 0 : index
    %c0_2 = arith.constant 0 : index
    %6 = vector.load %arg6[%c0_1, %c0_2] : memref<8x32xf32, #tpu.memory_space<vmem>>, vector<1x32xf32>
    %7 = arith.addf %5, %6 : vector<1x32xf32>
    %c0_i32_3 = arith.constant 0 : i32
    %8 = arith.addi %0, %c0_i32_3 : i32
    %9 = arith.index_cast %8 : i32 to index
    %c1 = arith.constant 1 : index
    %10 = memref.load %arg1[%9, %c1] : memref<2x8xi32, #tpu.memory_space<smem>>
    %11 = arith.index_cast %10 : i32 to index
    %c0_4 = arith.constant 0 : index
    %12 = vector.load %arg5[%11, %c0_4] : memref<50x32xf32, #tpu.memory_space<vmem>>, vector<1x32xf32>
    %c1_5 = arith.constant 1 : index
    %c0_6 = arith.constant 0 : index
    %13 = vector.load %arg6[%c1_5, %c0_6] : memref<8x32xf32, #tpu.memory_space<vmem>>, vector<1x32xf32>
    %14 = arith.addf %12, %13 : vector<1x32xf32>
    %c0_i32_7 = arith.constant 0 : i32
    %15 = arith.addi %0, %c0_i32_7 : i32
    %16 = arith.index_cast %15 : i32 to index
    %c2 = arith.constant 2 : index
    %17 = memref.load %arg1[%16, %c2] : memref<2x8xi32, #tpu.memory_space<smem>>
    %18 = arith.index_cast %17 : i32 to index
    %c0_8 = arith.constant 0 : index
    %19 = vector.load %arg5[%18, %c0_8] : memref<50x32xf32, #tpu.memory_space<vmem>>, vector<1x32xf32>
    %c2_9 = arith.constant 2 : index
    %c0_10 = arith.constant 0 : index
    %20 = vector.load %arg6[%c2_9, %c0_10] : memref<8x32xf32, #tpu.memory_space<vmem>>, vector<1x32xf32>
    %21 = arith.addf %19, %20 : vector<1x32xf32>
    %c0_i32_11 = arith.constant 0 : i32
    %22 = arith.addi %0, %c0_i32_11 : i32
    %23 = arith.index_cast %22 : i32 to index
    %c3 = arith.constant 3 : index
    %24 = memref.load %arg1[%23, %c3] : memref<2x8xi32, #tpu.memory_space<smem>>
    %25 = arith.index_cast %24 : i32 to index
    %c0_12 = arith.constant 0 : index
    %26 = vector.load %arg5[%25, %c0_12] : memref<50x32xf32, #tpu.memory_space<vmem>>, vector<1x32xf32>
    %c3_13 = arith.constant 3 : index
    %c0_14 = arith.constant 0 : index
    %27 = vector.load %arg6[%c3_13, %c0_14] : memref<8x32xf32, #tpu.memory_space<vmem>>, vector<1x32xf32>
    %28 = arith.addf %26, %27 : vector<1x32xf32>
    %c0_i32_15 = arith.constant 0 : i32
    %29 = arith.addi %0, %c0_i32_15 : i32
    %30 = arith.index_cast %29 : i32 to index
    %c4 = arith.constant 4 : index
    %31 = memref.load %arg1[%30, %c4] : memref<2x8xi32, #tpu.memory_space<smem>>
    %32 = arith.index_cast %31 : i32 to index
    %c0_16 = arith.constant 0 : index
    %33 = vector.load %arg5[%32, %c0_16] : memref<50x32xf32, #tpu.memory_space<vmem>>, vector<1x32xf32>
    %c4_17 = arith.constant 4 : index
    %c0_18 = arith.constant 0 : index
    %34 = vector.load %arg6[%c4_17, %c0_18] : memref<8x32xf32, #tpu.memory_space<vmem>>, vector<1x32xf32>
    %35 = arith.addf %33, %34 : vector<1x32xf32>
    %c0_i32_19 = arith.constant 0 : i32
    %36 = arith.addi %0, %c0_i32_19 : i32
    %37 = arith.index_cast %36 : i32 to index
    %c5 = arith.constant 5 : index
    %38 = memref.load %arg1[%37, %c5] : memref<2x8xi32, #tpu.memory_space<smem>>
    %39 = arith.index_cast %38 : i32 to index
    %c0_20 = arith.constant 0 : index
    %40 = vector.load %arg5[%39, %c0_20] : memref<50x32xf32, #tpu.memory_space<vmem>>, vector<1x32xf32>
    %c5_21 = arith.constant 5 : index
    %c0_22 = arith.constant 0 : index
    %41 = vector.load %arg6[%c5_21, %c0_22] : memref<8x32xf32, #tpu.memory_space<vmem>>, vector<1x32xf32>
    %42 = arith.addf %40, %41 : vector<1x32xf32>
    %c0_i32_23 = arith.constant 0 : i32
    %43 = arith.addi %0, %c0_i32_23 : i32
    %44 = arith.index_cast %43 : i32 to index
    %c6 = arith.constant 6 : index
    %45 = memref.load %arg1[%44, %c6] : memref<2x8xi32, #tpu.memory_space<smem>>
    %46 = arith.index_cast %45 : i32 to index
    %c0_24 = arith.constant 0 : index
    %47 = vector.load %arg5[%46, %c0_24] : memref<50x32xf32, #tpu.memory_space<vmem>>, vector<1x32xf32>
    %c6_25 = arith.constant 6 : index
    %c0_26 = arith.constant 0 : index
    %48 = vector.load %arg6[%c6_25, %c0_26] : memref<8x32xf32, #tpu.memory_space<vmem>>, vector<1x32xf32>
    %49 = arith.addf %47, %48 : vector<1x32xf32>
    %c0_i32_27 = arith.constant 0 : i32
    %50 = arith.addi %0, %c0_i32_27 : i32
    %51 = arith.index_cast %50 : i32 to index
    %c7 = arith.constant 7 : index
    %52 = memref.load %arg1[%51, %c7] : memref<2x8xi32, #tpu.memory_space<smem>>
    %53 = arith.index_cast %52 : i32 to index
    %c0_28 = arith.constant 0 : index
    %54 = vector.load %arg5[%53, %c0_28] : memref<50x32xf32, #tpu.memory_space<vmem>>, vector<1x32xf32>
    %c7_29 = arith.constant 7 : index
    %c0_30 = arith.constant 0 : index
    %55 = vector.load %arg6[%c7_29, %c0_30] : memref<8x32xf32, #tpu.memory_space<vmem>>, vector<1x32xf32>
    %56 = arith.addf %54, %55 : vector<1x32xf32>
    %c1_i32 = arith.constant 1 : i32
    %57 = arith.addi %0, %c1_i32 : i32
    %58 = arith.index_cast %57 : i32 to index
    %c0_31 = arith.constant 0 : index
    %59 = memref.load %arg1[%58, %c0_31] : memref<2x8xi32, #tpu.memory_space<smem>>
    %60 = arith.index_cast %59 : i32 to index
    %c0_32 = arith.constant 0 : index
    %61 = vector.load %arg5[%60, %c0_32] : memref<50x32xf32, #tpu.memory_space<vmem>>, vector<1x32xf32>
    %c0_33 = arith.constant 0 : index
    %c0_34 = arith.constant 0 : index
    %62 = vector.load %arg6[%c0_33, %c0_34] : memref<8x32xf32, #tpu.memory_space<vmem>>, vector<1x32xf32>
    %63 = arith.addf %61, %62 : vector<1x32xf32>
    %c1_i32_35 = arith.constant 1 : i32
    %64 = arith.addi %0, %c1_i32_35 : i32
    %65 = arith.index_cast %64 : i32 to index
    %c1_36 = arith.constant 1 : index
    %66 = memref.load %arg1[%65, %c1_36] : memref<2x8xi32, #tpu.memory_space<smem>>
    %67 = arith.index_cast %66 : i32 to index
    %c0_37 = arith.constant 0 : index
    %68 = vector.load %arg5[%67, %c0_37] : memref<50x32xf32, #tpu.memory_space<vmem>>, vector<1x32xf32>
    %c1_38 = arith.constant 1 : index
    %c0_39 = arith.constant 0 : index
    %69 = vector.load %arg6[%c1_38, %c0_39] : memref<8x32xf32, #tpu.memory_space<vmem>>, vector<1x32xf32>
    %70 = arith.addf %68, %69 : vector<1x32xf32>
    %c1_i32_40 = arith.constant 1 : i32
    %71 = arith.addi %0, %c1_i32_40 : i32
    %72 = arith.index_cast %71 : i32 to index
    %c2_41 = arith.constant 2 : index
    %73 = memref.load %arg1[%72, %c2_41] : memref<2x8xi32, #tpu.memory_space<smem>>
    %74 = arith.index_cast %73 : i32 to index
    %c0_42 = arith.constant 0 : index
    %75 = vector.load %arg5[%74, %c0_42] : memref<50x32xf32, #tpu.memory_space<vmem>>, vector<1x32xf32>
    %c2_43 = arith.constant 2 : index
    %c0_44 = arith.constant 0 : index
    %76 = vector.load %arg6[%c2_43, %c0_44] : memref<8x32xf32, #tpu.memory_space<vmem>>, vector<1x32xf32>
    %77 = arith.addf %75, %76 : vector<1x32xf32>
    %c1_i32_45 = arith.constant 1 : i32
    %78 = arith.addi %0, %c1_i32_45 : i32
    %79 = arith.index_cast %78 : i32 to index
    %c3_46 = arith.constant 3 : index
    %80 = memref.load %arg1[%79, %c3_46] : memref<2x8xi32, #tpu.memory_space<smem>>
    %81 = arith.index_cast %80 : i32 to index
    %c0_47 = arith.constant 0 : index
    %82 = vector.load %arg5[%81, %c0_47] : memref<50x32xf32, #tpu.memory_space<vmem>>, vector<1x32xf32>
    %c3_48 = arith.constant 3 : index
    %c0_49 = arith.constant 0 : index
    %83 = vector.load %arg6[%c3_48, %c0_49] : memref<8x32xf32, #tpu.memory_space<vmem>>, vector<1x32xf32>
    %84 = arith.addf %82, %83 : vector<1x32xf32>
    %c1_i32_50 = arith.constant 1 : i32
    %85 = arith.addi %0, %c1_i32_50 : i32
    %86 = arith.index_cast %85 : i32 to index
    %c4_51 = arith.constant 4 : index
    %87 = memref.load %arg1[%86, %c4_51] : memref<2x8xi32, #tpu.memory_space<smem>>
    %88 = arith.index_cast %87 : i32 to index
    %c0_52 = arith.constant 0 : index
    %89 = vector.load %arg5[%88, %c0_52] : memref<50x32xf32, #tpu.memory_space<vmem>>, vector<1x32xf32>
    %c4_53 = arith.constant 4 : index
    %c0_54 = arith.constant 0 : index
    %90 = vector.load %arg6[%c4_53, %c0_54] : memref<8x32xf32, #tpu.memory_space<vmem>>, vector<1x32xf32>
    %91 = arith.addf %89, %90 : vector<1x32xf32>
    %c1_i32_55 = arith.constant 1 : i32
    %92 = arith.addi %0, %c1_i32_55 : i32
    %93 = arith.index_cast %92 : i32 to index
    %c5_56 = arith.constant 5 : index
    %94 = memref.load %arg1[%93, %c5_56] : memref<2x8xi32, #tpu.memory_space<smem>>
    %95 = arith.index_cast %94 : i32 to index
    %c0_57 = arith.constant 0 : index
    %96 = vector.load %arg5[%95, %c0_57] : memref<50x32xf32, #tpu.memory_space<vmem>>, vector<1x32xf32>
    %c5_58 = arith.constant 5 : index
    %c0_59 = arith.constant 0 : index
    %97 = vector.load %arg6[%c5_58, %c0_59] : memref<8x32xf32, #tpu.memory_space<vmem>>, vector<1x32xf32>
    %98 = arith.addf %96, %97 : vector<1x32xf32>
    %c1_i32_60 = arith.constant 1 : i32
    %99 = arith.addi %0, %c1_i32_60 : i32
    %100 = arith.index_cast %99 : i32 to index
    %c6_61 = arith.constant 6 : index
    %101 = memref.load %arg1[%100, %c6_61] : memref<2x8xi32, #tpu.memory_space<smem>>
    %102 = arith.index_cast %101 : i32 to index
    %c0_62 = arith.constant 0 : index
    %103 = vector.load %arg5[%102, %c0_62] : memref<50x32xf32, #tpu.memory_space<vmem>>, vector<1x32xf32>
    %c6_63 = arith.constant 6 : index
    %c0_64 = arith.constant 0 : index
    %104 = vector.load %arg6[%c6_63, %c0_64] : memref<8x32xf32, #tpu.memory_space<vmem>>, vector<1x32xf32>
    %105 = arith.addf %103, %104 : vector<1x32xf32>
    %c1_i32_65 = arith.constant 1 : i32
    %106 = arith.addi %0, %c1_i32_65 : i32
    %107 = arith.index_cast %106 : i32 to index
    %c7_66 = arith.constant 7 : index
    %108 = memref.load %arg1[%107, %c7_66] : memref<2x8xi32, #tpu.memory_space<smem>>
    %109 = arith.index_cast %108 : i32 to index
    %c0_67 = arith.constant 0 : index
    %110 = vector.load %arg5[%109, %c0_67] : memref<50x32xf32, #tpu.memory_space<vmem>>, vector<1x32xf32>
    %c7_68 = arith.constant 7 : index
    %c0_69 = arith.constant 0 : index
    %111 = vector.load %arg6[%c7_68, %c0_69] : memref<8x32xf32, #tpu.memory_space<vmem>>, vector<1x32xf32>
    %112 = arith.addf %110, %111 : vector<1x32xf32>
    %113 = tpu.concatenate %7, %14, %21, %28, %35, %42, %49, %56, %63, %70, %77, %84, %91, %98, %105, %112 in 0 : vector<1x32xf32>, vector<1x32xf32>, vector<1x32xf32>, vector<1x32xf32>, vector<1x32xf32>, vector<1x32xf32>, vector<1x32xf32>, vector<1x32xf32>, vector<1x32xf32>, vector<1x32xf32>, vector<1x32xf32>, vector<1x32xf32>, vector<1x32xf32>, vector<1x32xf32>, vector<1x32xf32>, vector<1x32xf32> -> vector<16x32xf32>
    %c0_70 = arith.constant 0 : index
    %c0_71 = arith.constant 0 : index
    %114 = memref.load %arg2[%c0_70, %c0_71] : memref<4x6xf32, #tpu.memory_space<smem>>
    %c0_72 = arith.constant 0 : index
    %c1_73 = arith.constant 1 : index
    %115 = memref.load %arg2[%c0_72, %c1_73] : memref<4x6xf32, #tpu.memory_space<smem>>
    %c0_74 = arith.constant 0 : index
    %c2_75 = arith.constant 2 : index
    %116 = memref.load %arg2[%c0_74, %c2_75] : memref<4x6xf32, #tpu.memory_space<smem>>
    %c0_76 = arith.constant 0 : index
    %c3_77 = arith.constant 3 : index
    %117 = memref.load %arg2[%c0_76, %c3_77] : memref<4x6xf32, #tpu.memory_space<smem>>
    %c0_78 = arith.constant 0 : index
    %c4_79 = arith.constant 4 : index
    %118 = memref.load %arg2[%c0_78, %c4_79] : memref<4x6xf32, #tpu.memory_space<smem>>
    %c0_80 = arith.constant 0 : index
    %c5_81 = arith.constant 5 : index
    %119 = memref.load %arg2[%c0_80, %c5_81] : memref<4x6xf32, #tpu.memory_space<smem>>
    %c1_82 = arith.constant 1 : index
    %c0_83 = arith.constant 0 : index
    %120 = memref.load %arg2[%c1_82, %c0_83] : memref<4x6xf32, #tpu.memory_space<smem>>
    %c1_84 = arith.constant 1 : index
    %c1_85 = arith.constant 1 : index
    %121 = memref.load %arg2[%c1_84, %c1_85] : memref<4x6xf32, #tpu.memory_space<smem>>
    %c1_86 = arith.constant 1 : index
    %c2_87 = arith.constant 2 : index
    %122 = memref.load %arg2[%c1_86, %c2_87] : memref<4x6xf32, #tpu.memory_space<smem>>
    %c1_88 = arith.constant 1 : index
    %c3_89 = arith.constant 3 : index
    %123 = memref.load %arg2[%c1_88, %c3_89] : memref<4x6xf32, #tpu.memory_space<smem>>
    %c1_90 = arith.constant 1 : index
    %c4_91 = arith.constant 4 : index
    %124 = memref.load %arg2[%c1_90, %c4_91] : memref<4x6xf32, #tpu.memory_space<smem>>
    %c1_92 = arith.constant 1 : index
    %c5_93 = arith.constant 5 : index
    %125 = memref.load %arg2[%c1_92, %c5_93] : memref<4x6xf32, #tpu.memory_space<smem>>
    %c2_94 = arith.constant 2 : index
    %c0_95 = arith.constant 0 : index
    %126 = memref.load %arg2[%c2_94, %c0_95] : memref<4x6xf32, #tpu.memory_space<smem>>
    %c2_96 = arith.constant 2 : index
    %c1_97 = arith.constant 1 : index
    %127 = memref.load %arg2[%c2_96, %c1_97] : memref<4x6xf32, #tpu.memory_space<smem>>
    %c2_98 = arith.constant 2 : index
    %c2_99 = arith.constant 2 : index
    %128 = memref.load %arg2[%c2_98, %c2_99] : memref<4x6xf32, #tpu.memory_space<smem>>
    %c2_100 = arith.constant 2 : index
    %c3_101 = arith.constant 3 : index
    %129 = memref.load %arg2[%c2_100, %c3_101] : memref<4x6xf32, #tpu.memory_space<smem>>
    %c2_102 = arith.constant 2 : index
    %c4_103 = arith.constant 4 : index
    %130 = memref.load %arg2[%c2_102, %c4_103] : memref<4x6xf32, #tpu.memory_space<smem>>
    %c2_104 = arith.constant 2 : index
    %c5_105 = arith.constant 5 : index
    %131 = memref.load %arg2[%c2_104, %c5_105] : memref<4x6xf32, #tpu.memory_space<smem>>
    %c3_106 = arith.constant 3 : index
    %c0_107 = arith.constant 0 : index
    %132 = memref.load %arg2[%c3_106, %c0_107] : memref<4x6xf32, #tpu.memory_space<smem>>
    %c3_108 = arith.constant 3 : index
    %c1_109 = arith.constant 1 : index
    %133 = memref.load %arg2[%c3_108, %c1_109] : memref<4x6xf32, #tpu.memory_space<smem>>
    %c3_110 = arith.constant 3 : index
    %c2_111 = arith.constant 2 : index
    %134 = memref.load %arg2[%c3_110, %c2_111] : memref<4x6xf32, #tpu.memory_space<smem>>
    %c3_112 = arith.constant 3 : index
    %c3_113 = arith.constant 3 : index
    %135 = memref.load %arg2[%c3_112, %c3_113] : memref<4x6xf32, #tpu.memory_space<smem>>
    %c3_114 = arith.constant 3 : index
    %c4_115 = arith.constant 4 : index
    %136 = memref.load %arg2[%c3_114, %c4_115] : memref<4x6xf32, #tpu.memory_space<smem>>
    %c3_116 = arith.constant 3 : index
    %c5_117 = arith.constant 5 : index
    %137 = memref.load %arg2[%c3_116, %c5_117] : memref<4x6xf32, #tpu.memory_space<smem>>
    %c0_118 = arith.constant 0 : index
    %c0_119 = arith.constant 0 : index
    %c0_120 = arith.constant 0 : index
    %138 = vector.load %arg4[%c0_118, %c0_119, %c0_120] : memref<2x8x8xi32, #tpu.memory_space<vmem>>, vector<2x8x8xi32>
    %c0_i32_121 = arith.constant 0 : i32
    %c5_i32 = arith.constant 5 : i32
    %139 = vector.broadcast %c0_i32_121 : i32 to vector<2x8x8xi32>
    %140 = arith.maxsi %139, %138 : vector<2x8x8xi32>
    %141 = vector.broadcast %c5_i32 : i32 to vector<2x8x8xi32>
    %142 = arith.minsi %141, %140 : vector<2x8x8xi32>
    %c0_122 = arith.constant 0 : index
    %c0_123 = arith.constant 0 : index
    %c0_124 = arith.constant 0 : index
    %143 = vector.load %arg3[%c0_122, %c0_123, %c0_124] : memref<2x1x8xi32, #tpu.memory_space<vmem>>, vector<2x1x8xi32>
    %144 = arith.sitofp %143 : vector<2x1x8xi32> to vector<2x1x8xf32>
    %145 = vector.extract_strided_slice %144 {offsets = [0, 0, 0], sizes = [1, 1, 8], strides = [1, 1, 1]} : vector<2x1x8xf32> to vector<1x1x8xf32>
    %146 = vector.shape_cast %145 : vector<1x1x8xf32> to vector<1x8xf32>
    %cst = arith.constant 1.000000e+00 : f32
    %147 = vector.broadcast %cst : f32 to vector<1x8xf32>
    %148 = arith.subf %147, %146 : vector<1x8xf32>
    %cst_125 = arith.constant -1.000000e+09 : f32
    %149 = vector.broadcast %cst_125 : f32 to vector<1x8xf32>
    %150 = arith.mulf %148, %149 : vector<1x8xf32>
    %cst_126 = arith.constant 0.000000e+00 : f32
    %151 = vector.broadcast %cst_126 : f32 to vector<8x8xf32>
    %152 = vector.extract_strided_slice %142 {offsets = [0, 0, 0], sizes = [1, 8, 8], strides = [1, 1, 1]} : vector<2x8x8xi32> to vector<1x8x8xi32>
    %153 = vector.shape_cast %152 : vector<1x8x8xi32> to vector<8x8xi32>
    %c0_i32_127 = arith.constant 0 : i32
    %154 = vector.broadcast %c0_i32_127 : i32 to vector<8x8xi32>
    %155 = arith.cmpi eq, %153, %154 : vector<8x8xi32>
    %156 = vector.broadcast %114 : f32 to vector<8x8xf32>
    %157 = arith.select %155, %156, %151 : vector<8x8xi1>, vector<8x8xf32>
    %158 = vector.extract_strided_slice %142 {offsets = [0, 0, 0], sizes = [1, 8, 8], strides = [1, 1, 1]} : vector<2x8x8xi32> to vector<1x8x8xi32>
    %159 = vector.shape_cast %158 : vector<1x8x8xi32> to vector<8x8xi32>
    %c1_i32_128 = arith.constant 1 : i32
    %160 = vector.broadcast %c1_i32_128 : i32 to vector<8x8xi32>
    %161 = arith.cmpi eq, %159, %160 : vector<8x8xi32>
    %162 = vector.broadcast %115 : f32 to vector<8x8xf32>
    %163 = arith.select %161, %162, %157 : vector<8x8xi1>, vector<8x8xf32>
    %164 = vector.extract_strided_slice %142 {offsets = [0, 0, 0], sizes = [1, 8, 8], strides = [1, 1, 1]} : vector<2x8x8xi32> to vector<1x8x8xi32>
    %165 = vector.shape_cast %164 : vector<1x8x8xi32> to vector<8x8xi32>
    %c2_i32_129 = arith.constant 2 : i32
    %166 = vector.broadcast %c2_i32_129 : i32 to vector<8x8xi32>
    %167 = arith.cmpi eq, %165, %166 : vector<8x8xi32>
    %168 = vector.broadcast %116 : f32 to vector<8x8xf32>
    %169 = arith.select %167, %168, %163 : vector<8x8xi1>, vector<8x8xf32>
    %170 = vector.extract_strided_slice %142 {offsets = [0, 0, 0], sizes = [1, 8, 8], strides = [1, 1, 1]} : vector<2x8x8xi32> to vector<1x8x8xi32>
    %171 = vector.shape_cast %170 : vector<1x8x8xi32> to vector<8x8xi32>
    %c3_i32 = arith.constant 3 : i32
    %172 = vector.broadcast %c3_i32 : i32 to vector<8x8xi32>
    %173 = arith.cmpi eq, %171, %172 : vector<8x8xi32>
    %174 = vector.broadcast %117 : f32 to vector<8x8xf32>
    %175 = arith.select %173, %174, %169 : vector<8x8xi1>, vector<8x8xf32>
    %176 = vector.extract_strided_slice %142 {offsets = [0, 0, 0], sizes = [1, 8, 8], strides = [1, 1, 1]} : vector<2x8x8xi32> to vector<1x8x8xi32>
    %177 = vector.shape_cast %176 : vector<1x8x8xi32> to vector<8x8xi32>
    %c4_i32 = arith.constant 4 : i32
    %178 = vector.broadcast %c4_i32 : i32 to vector<8x8xi32>
    %179 = arith.cmpi eq, %177, %178 : vector<8x8xi32>
    %180 = vector.broadcast %118 : f32 to vector<8x8xf32>
    %181 = arith.select %179, %180, %175 : vector<8x8xi1>, vector<8x8xf32>
    %182 = vector.extract_strided_slice %142 {offsets = [0, 0, 0], sizes = [1, 8, 8], strides = [1, 1, 1]} : vector<2x8x8xi32> to vector<1x8x8xi32>
    %183 = vector.shape_cast %182 : vector<1x8x8xi32> to vector<8x8xi32>
    %c5_i32_130 = arith.constant 5 : i32
    %184 = vector.broadcast %c5_i32_130 : i32 to vector<8x8xi32>
    %185 = arith.cmpi eq, %183, %184 : vector<8x8xi32>
    %186 = vector.broadcast %119 : f32 to vector<8x8xf32>
    %187 = arith.select %185, %186, %181 : vector<8x8xi1>, vector<8x8xf32>
    %188 = vector.broadcast %150 : vector<1x8xf32> to vector<8x8xf32>
    %189 = arith.addf %187, %188 : vector<8x8xf32>
    %cst_131 = arith.constant 0.000000e+00 : f32
    %190 = vector.broadcast %cst_131 : f32 to vector<8x8xf32>
    %191 = vector.extract_strided_slice %142 {offsets = [0, 0, 0], sizes = [1, 8, 8], strides = [1, 1, 1]} : vector<2x8x8xi32> to vector<1x8x8xi32>
    %192 = vector.shape_cast %191 : vector<1x8x8xi32> to vector<8x8xi32>
    %c0_i32_132 = arith.constant 0 : i32
    %193 = vector.broadcast %c0_i32_132 : i32 to vector<8x8xi32>
    %194 = arith.cmpi eq, %192, %193 : vector<8x8xi32>
    %195 = vector.broadcast %120 : f32 to vector<8x8xf32>
    %196 = arith.select %194, %195, %190 : vector<8x8xi1>, vector<8x8xf32>
    %197 = vector.extract_strided_slice %142 {offsets = [0, 0, 0], sizes = [1, 8, 8], strides = [1, 1, 1]} : vector<2x8x8xi32> to vector<1x8x8xi32>
    %198 = vector.shape_cast %197 : vector<1x8x8xi32> to vector<8x8xi32>
    %c1_i32_133 = arith.constant 1 : i32
    %199 = vector.broadcast %c1_i32_133 : i32 to vector<8x8xi32>
    %200 = arith.cmpi eq, %198, %199 : vector<8x8xi32>
    %201 = vector.broadcast %121 : f32 to vector<8x8xf32>
    %202 = arith.select %200, %201, %196 : vector<8x8xi1>, vector<8x8xf32>
    %203 = vector.extract_strided_slice %142 {offsets = [0, 0, 0], sizes = [1, 8, 8], strides = [1, 1, 1]} : vector<2x8x8xi32> to vector<1x8x8xi32>
    %204 = vector.shape_cast %203 : vector<1x8x8xi32> to vector<8x8xi32>
    %c2_i32_134 = arith.constant 2 : i32
    %205 = vector.broadcast %c2_i32_134 : i32 to vector<8x8xi32>
    %206 = arith.cmpi eq, %204, %205 : vector<8x8xi32>
    %207 = vector.broadcast %122 : f32 to vector<8x8xf32>
    %208 = arith.select %206, %207, %202 : vector<8x8xi1>, vector<8x8xf32>
    %209 = vector.extract_strided_slice %142 {offsets = [0, 0, 0], sizes = [1, 8, 8], strides = [1, 1, 1]} : vector<2x8x8xi32> to vector<1x8x8xi32>
    %210 = vector.shape_cast %209 : vector<1x8x8xi32> to vector<8x8xi32>
    %c3_i32_135 = arith.constant 3 : i32
    %211 = vector.broadcast %c3_i32_135 : i32 to vector<8x8xi32>
    %212 = arith.cmpi eq, %210, %211 : vector<8x8xi32>
    %213 = vector.broadcast %123 : f32 to vector<8x8xf32>
    %214 = arith.select %212, %213, %208 : vector<8x8xi1>, vector<8x8xf32>
    %215 = vector.extract_strided_slice %142 {offsets = [0, 0, 0], sizes = [1, 8, 8], strides = [1, 1, 1]} : vector<2x8x8xi32> to vector<1x8x8xi32>
    %216 = vector.shape_cast %215 : vector<1x8x8xi32> to vector<8x8xi32>
    %c4_i32_136 = arith.constant 4 : i32
    %217 = vector.broadcast %c4_i32_136 : i32 to vector<8x8xi32>
    %218 = arith.cmpi eq, %216, %217 : vector<8x8xi32>
    %219 = vector.broadcast %124 : f32 to vector<8x8xf32>
    %220 = arith.select %218, %219, %214 : vector<8x8xi1>, vector<8x8xf32>
    %221 = vector.extract_strided_slice %142 {offsets = [0, 0, 0], sizes = [1, 8, 8], strides = [1, 1, 1]} : vector<2x8x8xi32> to vector<1x8x8xi32>
    %222 = vector.shape_cast %221 : vector<1x8x8xi32> to vector<8x8xi32>
    %c5_i32_137 = arith.constant 5 : i32
    %223 = vector.broadcast %c5_i32_137 : i32 to vector<8x8xi32>
    %224 = arith.cmpi eq, %222, %223 : vector<8x8xi32>
    %225 = vector.broadcast %125 : f32 to vector<8x8xf32>
    %226 = arith.select %224, %225, %220 : vector<8x8xi1>, vector<8x8xf32>
    %227 = vector.broadcast %150 : vector<1x8xf32> to vector<8x8xf32>
    %228 = arith.addf %226, %227 : vector<8x8xf32>
    %cst_138 = arith.constant 0.000000e+00 : f32
    %229 = vector.broadcast %cst_138 : f32 to vector<8x8xf32>
    %230 = vector.extract_strided_slice %142 {offsets = [0, 0, 0], sizes = [1, 8, 8], strides = [1, 1, 1]} : vector<2x8x8xi32> to vector<1x8x8xi32>
    %231 = vector.shape_cast %230 : vector<1x8x8xi32> to vector<8x8xi32>
    %c0_i32_139 = arith.constant 0 : i32
    %232 = vector.broadcast %c0_i32_139 : i32 to vector<8x8xi32>
    %233 = arith.cmpi eq, %231, %232 : vector<8x8xi32>
    %234 = vector.broadcast %126 : f32 to vector<8x8xf32>
    %235 = arith.select %233, %234, %229 : vector<8x8xi1>, vector<8x8xf32>
    %236 = vector.extract_strided_slice %142 {offsets = [0, 0, 0], sizes = [1, 8, 8], strides = [1, 1, 1]} : vector<2x8x8xi32> to vector<1x8x8xi32>
    %237 = vector.shape_cast %236 : vector<1x8x8xi32> to vector<8x8xi32>
    %c1_i32_140 = arith.constant 1 : i32
    %238 = vector.broadcast %c1_i32_140 : i32 to vector<8x8xi32>
    %239 = arith.cmpi eq, %237, %238 : vector<8x8xi32>
    %240 = vector.broadcast %127 : f32 to vector<8x8xf32>
    %241 = arith.select %239, %240, %235 : vector<8x8xi1>, vector<8x8xf32>
    %242 = vector.extract_strided_slice %142 {offsets = [0, 0, 0], sizes = [1, 8, 8], strides = [1, 1, 1]} : vector<2x8x8xi32> to vector<1x8x8xi32>
    %243 = vector.shape_cast %242 : vector<1x8x8xi32> to vector<8x8xi32>
    %c2_i32_141 = arith.constant 2 : i32
    %244 = vector.broadcast %c2_i32_141 : i32 to vector<8x8xi32>
    %245 = arith.cmpi eq, %243, %244 : vector<8x8xi32>
    %246 = vector.broadcast %128 : f32 to vector<8x8xf32>
    %247 = arith.select %245, %246, %241 : vector<8x8xi1>, vector<8x8xf32>
    %248 = vector.extract_strided_slice %142 {offsets = [0, 0, 0], sizes = [1, 8, 8], strides = [1, 1, 1]} : vector<2x8x8xi32> to vector<1x8x8xi32>
    %249 = vector.shape_cast %248 : vector<1x8x8xi32> to vector<8x8xi32>
    %c3_i32_142 = arith.constant 3 : i32
    %250 = vector.broadcast %c3_i32_142 : i32 to vector<8x8xi32>
    %251 = arith.cmpi eq, %249, %250 : vector<8x8xi32>
    %252 = vector.broadcast %129 : f32 to vector<8x8xf32>
    %253 = arith.select %251, %252, %247 : vector<8x8xi1>, vector<8x8xf32>
    %254 = vector.extract_strided_slice %142 {offsets = [0, 0, 0], sizes = [1, 8, 8], strides = [1, 1, 1]} : vector<2x8x8xi32> to vector<1x8x8xi32>
    %255 = vector.shape_cast %254 : vector<1x8x8xi32> to vector<8x8xi32>
    %c4_i32_143 = arith.constant 4 : i32
    %256 = vector.broadcast %c4_i32_143 : i32 to vector<8x8xi32>
    %257 = arith.cmpi eq, %255, %256 : vector<8x8xi32>
    %258 = vector.broadcast %130 : f32 to vector<8x8xf32>
    %259 = arith.select %257, %258, %253 : vector<8x8xi1>, vector<8x8xf32>
    %260 = vector.extract_strided_slice %142 {offsets = [0, 0, 0], sizes = [1, 8, 8], strides = [1, 1, 1]} : vector<2x8x8xi32> to vector<1x8x8xi32>
    %261 = vector.shape_cast %260 : vector<1x8x8xi32> to vector<8x8xi32>
    %c5_i32_144 = arith.constant 5 : i32
    %262 = vector.broadcast %c5_i32_144 : i32 to vector<8x8xi32>
    %263 = arith.cmpi eq, %261, %262 : vector<8x8xi32>
    %264 = vector.broadcast %131 : f32 to vector<8x8xf32>
    %265 = arith.select %263, %264, %259 : vector<8x8xi1>, vector<8x8xf32>
    %266 = vector.broadcast %150 : vector<1x8xf32> to vector<8x8xf32>
    %267 = arith.addf %265, %266 : vector<8x8xf32>
    %cst_145 = arith.constant 0.000000e+00 : f32
    %268 = vector.broadcast %cst_145 : f32 to vector<8x8xf32>
    %269 = vector.extract_strided_slice %142 {offsets = [0, 0, 0], sizes = [1, 8, 8], strides = [1, 1, 1]} : vector<2x8x8xi32> to vector<1x8x8xi32>
    %270 = vector.shape_cast %269 : vector<1x8x8xi32> to vector<8x8xi32>
    %c0_i32_146 = arith.constant 0 : i32
    %271 = vector.broadcast %c0_i32_146 : i32 to vector<8x8xi32>
    %272 = arith.cmpi eq, %270, %271 : vector<8x8xi32>
    %273 = vector.broadcast %132 : f32 to vector<8x8xf32>
    %274 = arith.select %272, %273, %268 : vector<8x8xi1>, vector<8x8xf32>
    %275 = vector.extract_strided_slice %142 {offsets = [0, 0, 0], sizes = [1, 8, 8], strides = [1, 1, 1]} : vector<2x8x8xi32> to vector<1x8x8xi32>
    %276 = vector.shape_cast %275 : vector<1x8x8xi32> to vector<8x8xi32>
    %c1_i32_147 = arith.constant 1 : i32
    %277 = vector.broadcast %c1_i32_147 : i32 to vector<8x8xi32>
    %278 = arith.cmpi eq, %276, %277 : vector<8x8xi32>
    %279 = vector.broadcast %133 : f32 to vector<8x8xf32>
    %280 = arith.select %278, %279, %274 : vector<8x8xi1>, vector<8x8xf32>
    %281 = vector.extract_strided_slice %142 {offsets = [0, 0, 0], sizes = [1, 8, 8], strides = [1, 1, 1]} : vector<2x8x8xi32> to vector<1x8x8xi32>
    %282 = vector.shape_cast %281 : vector<1x8x8xi32> to vector<8x8xi32>
    %c2_i32_148 = arith.constant 2 : i32
    %283 = vector.broadcast %c2_i32_148 : i32 to vector<8x8xi32>
    %284 = arith.cmpi eq, %282, %283 : vector<8x8xi32>
    %285 = vector.broadcast %134 : f32 to vector<8x8xf32>
    %286 = arith.select %284, %285, %280 : vector<8x8xi1>, vector<8x8xf32>
    %287 = vector.extract_strided_slice %142 {offsets = [0, 0, 0], sizes = [1, 8, 8], strides = [1, 1, 1]} : vector<2x8x8xi32> to vector<1x8x8xi32>
    %288 = vector.shape_cast %287 : vector<1x8x8xi32> to vector<8x8xi32>
    %c3_i32_149 = arith.constant 3 : i32
    %289 = vector.broadcast %c3_i32_149 : i32 to vector<8x8xi32>
    %290 = arith.cmpi eq, %288, %289 : vector<8x8xi32>
    %291 = vector.broadcast %135 : f32 to vector<8x8xf32>
    %292 = arith.select %290, %291, %286 : vector<8x8xi1>, vector<8x8xf32>
    %293 = vector.extract_strided_slice %142 {offsets = [0, 0, 0], sizes = [1, 8, 8], strides = [1, 1, 1]} : vector<2x8x8xi32> to vector<1x8x8xi32>
    %294 = vector.shape_cast %293 : vector<1x8x8xi32> to vector<8x8xi32>
    %c4_i32_150 = arith.constant 4 : i32
    %295 = vector.broadcast %c4_i32_150 : i32 to vector<8x8xi32>
    %296 = arith.cmpi eq, %294, %295 : vector<8x8xi32>
    %297 = vector.broadcast %136 : f32 to vector<8x8xf32>
    %298 = arith.select %296, %297, %292 : vector<8x8xi1>, vector<8x8xf32>
    %299 = vector.extract_strided_slice %142 {offsets = [0, 0, 0], sizes = [1, 8, 8], strides = [1, 1, 1]} : vector<2x8x8xi32> to vector<1x8x8xi32>
    %300 = vector.shape_cast %299 : vector<1x8x8xi32> to vector<8x8xi32>
    %c5_i32_151 = arith.constant 5 : i32
    %301 = vector.broadcast %c5_i32_151 : i32 to vector<8x8xi32>
    %302 = arith.cmpi eq, %300, %301 : vector<8x8xi32>
    %303 = vector.broadcast %137 : f32 to vector<8x8xf32>
    %304 = arith.select %302, %303, %298 : vector<8x8xi1>, vector<8x8xf32>
    %305 = vector.broadcast %150 : vector<1x8xf32> to vector<8x8xf32>
    %306 = arith.addf %304, %305 : vector<8x8xf32>
    %307 = vector.extract_strided_slice %144 {offsets = [1, 0, 0], sizes = [1, 1, 8], strides = [1, 1, 1]} : vector<2x1x8xf32> to vector<1x1x8xf32>
    %308 = vector.shape_cast %307 : vector<1x1x8xf32> to vector<1x8xf32>
    %cst_152 = arith.constant 1.000000e+00 : f32
    %309 = vector.broadcast %cst_152 : f32 to vector<1x8xf32>
    %310 = arith.subf %309, %308 : vector<1x8xf32>
    %cst_153 = arith.constant -1.000000e+09 : f32
    %311 = vector.broadcast %cst_153 : f32 to vector<1x8xf32>
    %312 = arith.mulf %310, %311 : vector<1x8xf32>
    %cst_154 = arith.constant 0.000000e+00 : f32
    %313 = vector.broadcast %cst_154 : f32 to vector<8x8xf32>
    %314 = vector.extract_strided_slice %142 {offsets = [1, 0, 0], sizes = [1, 8, 8], strides = [1, 1, 1]} : vector<2x8x8xi32> to vector<1x8x8xi32>
    %315 = vector.shape_cast %314 : vector<1x8x8xi32> to vector<8x8xi32>
    %c0_i32_155 = arith.constant 0 : i32
    %316 = vector.broadcast %c0_i32_155 : i32 to vector<8x8xi32>
    %317 = arith.cmpi eq, %315, %316 : vector<8x8xi32>
    %318 = vector.broadcast %114 : f32 to vector<8x8xf32>
    %319 = arith.select %317, %318, %313 : vector<8x8xi1>, vector<8x8xf32>
    %320 = vector.extract_strided_slice %142 {offsets = [1, 0, 0], sizes = [1, 8, 8], strides = [1, 1, 1]} : vector<2x8x8xi32> to vector<1x8x8xi32>
    %321 = vector.shape_cast %320 : vector<1x8x8xi32> to vector<8x8xi32>
    %c1_i32_156 = arith.constant 1 : i32
    %322 = vector.broadcast %c1_i32_156 : i32 to vector<8x8xi32>
    %323 = arith.cmpi eq, %321, %322 : vector<8x8xi32>
    %324 = vector.broadcast %115 : f32 to vector<8x8xf32>
    %325 = arith.select %323, %324, %319 : vector<8x8xi1>, vector<8x8xf32>
    %326 = vector.extract_strided_slice %142 {offsets = [1, 0, 0], sizes = [1, 8, 8], strides = [1, 1, 1]} : vector<2x8x8xi32> to vector<1x8x8xi32>
    %327 = vector.shape_cast %326 : vector<1x8x8xi32> to vector<8x8xi32>
    %c2_i32_157 = arith.constant 2 : i32
    %328 = vector.broadcast %c2_i32_157 : i32 to vector<8x8xi32>
    %329 = arith.cmpi eq, %327, %328 : vector<8x8xi32>
    %330 = vector.broadcast %116 : f32 to vector<8x8xf32>
    %331 = arith.select %329, %330, %325 : vector<8x8xi1>, vector<8x8xf32>
    %332 = vector.extract_strided_slice %142 {offsets = [1, 0, 0], sizes = [1, 8, 8], strides = [1, 1, 1]} : vector<2x8x8xi32> to vector<1x8x8xi32>
    %333 = vector.shape_cast %332 : vector<1x8x8xi32> to vector<8x8xi32>
    %c3_i32_158 = arith.constant 3 : i32
    %334 = vector.broadcast %c3_i32_158 : i32 to vector<8x8xi32>
    %335 = arith.cmpi eq, %333, %334 : vector<8x8xi32>
    %336 = vector.broadcast %117 : f32 to vector<8x8xf32>
    %337 = arith.select %335, %336, %331 : vector<8x8xi1>, vector<8x8xf32>
    %338 = vector.extract_strided_slice %142 {offsets = [1, 0, 0], sizes = [1, 8, 8], strides = [1, 1, 1]} : vector<2x8x8xi32> to vector<1x8x8xi32>
    %339 = vector.shape_cast %338 : vector<1x8x8xi32> to vector<8x8xi32>
    %c4_i32_159 = arith.constant 4 : i32
    %340 = vector.broadcast %c4_i32_159 : i32 to vector<8x8xi32>
    %341 = arith.cmpi eq, %339, %340 : vector<8x8xi32>
    %342 = vector.broadcast %118 : f32 to vector<8x8xf32>
    %343 = arith.select %341, %342, %337 : vector<8x8xi1>, vector<8x8xf32>
    %344 = vector.extract_strided_slice %142 {offsets = [1, 0, 0], sizes = [1, 8, 8], strides = [1, 1, 1]} : vector<2x8x8xi32> to vector<1x8x8xi32>
    %345 = vector.shape_cast %344 : vector<1x8x8xi32> to vector<8x8xi32>
    %c5_i32_160 = arith.constant 5 : i32
    %346 = vector.broadcast %c5_i32_160 : i32 to vector<8x8xi32>
    %347 = arith.cmpi eq, %345, %346 : vector<8x8xi32>
    %348 = vector.broadcast %119 : f32 to vector<8x8xf32>
    %349 = arith.select %347, %348, %343 : vector<8x8xi1>, vector<8x8xf32>
    %350 = vector.broadcast %312 : vector<1x8xf32> to vector<8x8xf32>
    %351 = arith.addf %349, %350 : vector<8x8xf32>
    %cst_161 = arith.constant 0.000000e+00 : f32
    %352 = vector.broadcast %cst_161 : f32 to vector<8x8xf32>
    %353 = vector.extract_strided_slice %142 {offsets = [1, 0, 0], sizes = [1, 8, 8], strides = [1, 1, 1]} : vector<2x8x8xi32> to vector<1x8x8xi32>
    %354 = vector.shape_cast %353 : vector<1x8x8xi32> to vector<8x8xi32>
    %c0_i32_162 = arith.constant 0 : i32
    %355 = vector.broadcast %c0_i32_162 : i32 to vector<8x8xi32>
    %356 = arith.cmpi eq, %354, %355 : vector<8x8xi32>
    %357 = vector.broadcast %120 : f32 to vector<8x8xf32>
    %358 = arith.select %356, %357, %352 : vector<8x8xi1>, vector<8x8xf32>
    %359 = vector.extract_strided_slice %142 {offsets = [1, 0, 0], sizes = [1, 8, 8], strides = [1, 1, 1]} : vector<2x8x8xi32> to vector<1x8x8xi32>
    %360 = vector.shape_cast %359 : vector<1x8x8xi32> to vector<8x8xi32>
    %c1_i32_163 = arith.constant 1 : i32
    %361 = vector.broadcast %c1_i32_163 : i32 to vector<8x8xi32>
    %362 = arith.cmpi eq, %360, %361 : vector<8x8xi32>
    %363 = vector.broadcast %121 : f32 to vector<8x8xf32>
    %364 = arith.select %362, %363, %358 : vector<8x8xi1>, vector<8x8xf32>
    %365 = vector.extract_strided_slice %142 {offsets = [1, 0, 0], sizes = [1, 8, 8], strides = [1, 1, 1]} : vector<2x8x8xi32> to vector<1x8x8xi32>
    %366 = vector.shape_cast %365 : vector<1x8x8xi32> to vector<8x8xi32>
    %c2_i32_164 = arith.constant 2 : i32
    %367 = vector.broadcast %c2_i32_164 : i32 to vector<8x8xi32>
    %368 = arith.cmpi eq, %366, %367 : vector<8x8xi32>
    %369 = vector.broadcast %122 : f32 to vector<8x8xf32>
    %370 = arith.select %368, %369, %364 : vector<8x8xi1>, vector<8x8xf32>
    %371 = vector.extract_strided_slice %142 {offsets = [1, 0, 0], sizes = [1, 8, 8], strides = [1, 1, 1]} : vector<2x8x8xi32> to vector<1x8x8xi32>
    %372 = vector.shape_cast %371 : vector<1x8x8xi32> to vector<8x8xi32>
    %c3_i32_165 = arith.constant 3 : i32
    %373 = vector.broadcast %c3_i32_165 : i32 to vector<8x8xi32>
    %374 = arith.cmpi eq, %372, %373 : vector<8x8xi32>
    %375 = vector.broadcast %123 : f32 to vector<8x8xf32>
    %376 = arith.select %374, %375, %370 : vector<8x8xi1>, vector<8x8xf32>
    %377 = vector.extract_strided_slice %142 {offsets = [1, 0, 0], sizes = [1, 8, 8], strides = [1, 1, 1]} : vector<2x8x8xi32> to vector<1x8x8xi32>
    %378 = vector.shape_cast %377 : vector<1x8x8xi32> to vector<8x8xi32>
    %c4_i32_166 = arith.constant 4 : i32
    %379 = vector.broadcast %c4_i32_166 : i32 to vector<8x8xi32>
    %380 = arith.cmpi eq, %378, %379 : vector<8x8xi32>
    %381 = vector.broadcast %124 : f32 to vector<8x8xf32>
    %382 = arith.select %380, %381, %376 : vector<8x8xi1>, vector<8x8xf32>
    %383 = vector.extract_strided_slice %142 {offsets = [1, 0, 0], sizes = [1, 8, 8], strides = [1, 1, 1]} : vector<2x8x8xi32> to vector<1x8x8xi32>
    %384 = vector.shape_cast %383 : vector<1x8x8xi32> to vector<8x8xi32>
    %c5_i32_167 = arith.constant 5 : i32
    %385 = vector.broadcast %c5_i32_167 : i32 to vector<8x8xi32>
    %386 = arith.cmpi eq, %384, %385 : vector<8x8xi32>
    %387 = vector.broadcast %125 : f32 to vector<8x8xf32>
    %388 = arith.select %386, %387, %382 : vector<8x8xi1>, vector<8x8xf32>
    %389 = vector.broadcast %312 : vector<1x8xf32> to vector<8x8xf32>
    %390 = arith.addf %388, %389 : vector<8x8xf32>
    %cst_168 = arith.constant 0.000000e+00 : f32
    %391 = vector.broadcast %cst_168 : f32 to vector<8x8xf32>
    %392 = vector.extract_strided_slice %142 {offsets = [1, 0, 0], sizes = [1, 8, 8], strides = [1, 1, 1]} : vector<2x8x8xi32> to vector<1x8x8xi32>
    %393 = vector.shape_cast %392 : vector<1x8x8xi32> to vector<8x8xi32>
    %c0_i32_169 = arith.constant 0 : i32
    %394 = vector.broadcast %c0_i32_169 : i32 to vector<8x8xi32>
    %395 = arith.cmpi eq, %393, %394 : vector<8x8xi32>
    %396 = vector.broadcast %126 : f32 to vector<8x8xf32>
    %397 = arith.select %395, %396, %391 : vector<8x8xi1>, vector<8x8xf32>
    %398 = vector.extract_strided_slice %142 {offsets = [1, 0, 0], sizes = [1, 8, 8], strides = [1, 1, 1]} : vector<2x8x8xi32> to vector<1x8x8xi32>
    %399 = vector.shape_cast %398 : vector<1x8x8xi32> to vector<8x8xi32>
    %c1_i32_170 = arith.constant 1 : i32
    %400 = vector.broadcast %c1_i32_170 : i32 to vector<8x8xi32>
    %401 = arith.cmpi eq, %399, %400 : vector<8x8xi32>
    %402 = vector.broadcast %127 : f32 to vector<8x8xf32>
    %403 = arith.select %401, %402, %397 : vector<8x8xi1>, vector<8x8xf32>
    %404 = vector.extract_strided_slice %142 {offsets = [1, 0, 0], sizes = [1, 8, 8], strides = [1, 1, 1]} : vector<2x8x8xi32> to vector<1x8x8xi32>
    %405 = vector.shape_cast %404 : vector<1x8x8xi32> to vector<8x8xi32>
    %c2_i32_171 = arith.constant 2 : i32
    %406 = vector.broadcast %c2_i32_171 : i32 to vector<8x8xi32>
    %407 = arith.cmpi eq, %405, %406 : vector<8x8xi32>
    %408 = vector.broadcast %128 : f32 to vector<8x8xf32>
    %409 = arith.select %407, %408, %403 : vector<8x8xi1>, vector<8x8xf32>
    %410 = vector.extract_strided_slice %142 {offsets = [1, 0, 0], sizes = [1, 8, 8], strides = [1, 1, 1]} : vector<2x8x8xi32> to vector<1x8x8xi32>
    %411 = vector.shape_cast %410 : vector<1x8x8xi32> to vector<8x8xi32>
    %c3_i32_172 = arith.constant 3 : i32
    %412 = vector.broadcast %c3_i32_172 : i32 to vector<8x8xi32>
    %413 = arith.cmpi eq, %411, %412 : vector<8x8xi32>
    %414 = vector.broadcast %129 : f32 to vector<8x8xf32>
    %415 = arith.select %413, %414, %409 : vector<8x8xi1>, vector<8x8xf32>
    %416 = vector.extract_strided_slice %142 {offsets = [1, 0, 0], sizes = [1, 8, 8], strides = [1, 1, 1]} : vector<2x8x8xi32> to vector<1x8x8xi32>
    %417 = vector.shape_cast %416 : vector<1x8x8xi32> to vector<8x8xi32>
    %c4_i32_173 = arith.constant 4 : i32
    %418 = vector.broadcast %c4_i32_173 : i32 to vector<8x8xi32>
    %419 = arith.cmpi eq, %417, %418 : vector<8x8xi32>
    %420 = vector.broadcast %130 : f32 to vector<8x8xf32>
    %421 = arith.select %419, %420, %415 : vector<8x8xi1>, vector<8x8xf32>
    %422 = vector.extract_strided_slice %142 {offsets = [1, 0, 0], sizes = [1, 8, 8], strides = [1, 1, 1]} : vector<2x8x8xi32> to vector<1x8x8xi32>
    %423 = vector.shape_cast %422 : vector<1x8x8xi32> to vector<8x8xi32>
    %c5_i32_174 = arith.constant 5 : i32
    %424 = vector.broadcast %c5_i32_174 : i32 to vector<8x8xi32>
    %425 = arith.cmpi eq, %423, %424 : vector<8x8xi32>
    %426 = vector.broadcast %131 : f32 to vector<8x8xf32>
    %427 = arith.select %425, %426, %421 : vector<8x8xi1>, vector<8x8xf32>
    %428 = vector.broadcast %312 : vector<1x8xf32> to vector<8x8xf32>
    %429 = arith.addf %427, %428 : vector<8x8xf32>
    %cst_175 = arith.constant 0.000000e+00 : f32
    %430 = vector.broadcast %cst_175 : f32 to vector<8x8xf32>
    %431 = vector.extract_strided_slice %142 {offsets = [1, 0, 0], sizes = [1, 8, 8], strides = [1, 1, 1]} : vector<2x8x8xi32> to vector<1x8x8xi32>
    %432 = vector.shape_cast %431 : vector<1x8x8xi32> to vector<8x8xi32>
    %c0_i32_176 = arith.constant 0 : i32
    %433 = vector.broadcast %c0_i32_176 : i32 to vector<8x8xi32>
    %434 = arith.cmpi eq, %432, %433 : vector<8x8xi32>
    %435 = vector.broadcast %132 : f32 to vector<8x8xf32>
    %436 = arith.select %434, %435, %430 : vector<8x8xi1>, vector<8x8xf32>
    %437 = vector.extract_strided_slice %142 {offsets = [1, 0, 0], sizes = [1, 8, 8], strides = [1, 1, 1]} : vector<2x8x8xi32> to vector<1x8x8xi32>
    %438 = vector.shape_cast %437 : vector<1x8x8xi32> to vector<8x8xi32>
    %c1_i32_177 = arith.constant 1 : i32
    %439 = vector.broadcast %c1_i32_177 : i32 to vector<8x8xi32>
    %440 = arith.cmpi eq, %438, %439 : vector<8x8xi32>
    %441 = vector.broadcast %133 : f32 to vector<8x8xf32>
    %442 = arith.select %440, %441, %436 : vector<8x8xi1>, vector<8x8xf32>
    %443 = vector.extract_strided_slice %142 {offsets = [1, 0, 0], sizes = [1, 8, 8], strides = [1, 1, 1]} : vector<2x8x8xi32> to vector<1x8x8xi32>
    %444 = vector.shape_cast %443 : vector<1x8x8xi32> to vector<8x8xi32>
    %c2_i32_178 = arith.constant 2 : i32
    %445 = vector.broadcast %c2_i32_178 : i32 to vector<8x8xi32>
    %446 = arith.cmpi eq, %444, %445 : vector<8x8xi32>
    %447 = vector.broadcast %134 : f32 to vector<8x8xf32>
    %448 = arith.select %446, %447, %442 : vector<8x8xi1>, vector<8x8xf32>
    %449 = vector.extract_strided_slice %142 {offsets = [1, 0, 0], sizes = [1, 8, 8], strides = [1, 1, 1]} : vector<2x8x8xi32> to vector<1x8x8xi32>
    %450 = vector.shape_cast %449 : vector<1x8x8xi32> to vector<8x8xi32>
    %c3_i32_179 = arith.constant 3 : i32
    %451 = vector.broadcast %c3_i32_179 : i32 to vector<8x8xi32>
    %452 = arith.cmpi eq, %450, %451 : vector<8x8xi32>
    %453 = vector.broadcast %135 : f32 to vector<8x8xf32>
    %454 = arith.select %452, %453, %448 : vector<8x8xi1>, vector<8x8xf32>
    %455 = vector.extract_strided_slice %142 {offsets = [1, 0, 0], sizes = [1, 8, 8], strides = [1, 1, 1]} : vector<2x8x8xi32> to vector<1x8x8xi32>
    %456 = vector.shape_cast %455 : vector<1x8x8xi32> to vector<8x8xi32>
    %c4_i32_180 = arith.constant 4 : i32
    %457 = vector.broadcast %c4_i32_180 : i32 to vector<8x8xi32>
    %458 = arith.cmpi eq, %456, %457 : vector<8x8xi32>
    %459 = vector.broadcast %136 : f32 to vector<8x8xf32>
    %460 = arith.select %458, %459, %454 : vector<8x8xi1>, vector<8x8xf32>
    %461 = vector.extract_strided_slice %142 {offsets = [1, 0, 0], sizes = [1, 8, 8], strides = [1, 1, 1]} : vector<2x8x8xi32> to vector<1x8x8xi32>
    %462 = vector.shape_cast %461 : vector<1x8x8xi32> to vector<8x8xi32>
    %c5_i32_181 = arith.constant 5 : i32
    %463 = vector.broadcast %c5_i32_181 : i32 to vector<8x8xi32>
    %464 = arith.cmpi eq, %462, %463 : vector<8x8xi32>
    %465 = vector.broadcast %137 : f32 to vector<8x8xf32>
    %466 = arith.select %464, %465, %460 : vector<8x8xi1>, vector<8x8xf32>
    %467 = vector.broadcast %312 : vector<1x8xf32> to vector<8x8xf32>
    %468 = arith.addf %466, %467 : vector<8x8xf32>
    %469 = vector.shape_cast %189 : vector<8x8xf32> to vector<1x8x8xf32>
    %470 = vector.shape_cast %228 : vector<8x8xf32> to vector<1x8x8xf32>
    %471 = vector.shape_cast %267 : vector<8x8xf32> to vector<1x8x8xf32>
    %472 = vector.shape_cast %306 : vector<8x8xf32> to vector<1x8x8xf32>
    %473 = vector.shape_cast %351 : vector<8x8xf32> to vector<1x8x8xf32>
    %474 = vector.shape_cast %390 : vector<8x8xf32> to vector<1x8x8xf32>
    %475 = vector.shape_cast %429 : vector<8x8xf32> to vector<1x8x8xf32>
    %476 = vector.shape_cast %468 : vector<8x8xf32> to vector<1x8x8xf32>
    %477 = tpu.concatenate %469, %470, %471, %472, %473, %474, %475, %476 in 0 : vector<1x8x8xf32>, vector<1x8x8xf32>, vector<1x8x8xf32>, vector<1x8x8xf32>, vector<1x8x8xf32>, vector<1x8x8xf32>, vector<1x8x8xf32>, vector<1x8x8xf32> -> vector<8x8x8xf32>
    %c0_182 = arith.constant 0 : index
    %c0_183 = arith.constant 0 : index
    %c0_184 = arith.constant 0 : index
    %478 = vector.load %arg7[%c0_182, %c0_183, %c0_184] : memref<2x32x96xf32, #tpu.memory_space<vmem>>, vector<1x32x96xf32>
    %479 = vector.shape_cast %478 : vector<1x32x96xf32> to vector<32x96xf32>
    %cst_185 = arith.constant dense<0.000000e+00> : vector<16x96xf32>
    %480 = tpu.matmul %113, %479, %cst_185 {dimension_numbers = #tpu.dot_dimension_numbers<[1], [0], [0], [1], [0, 0, 1, 1], [], []>} : vector<16x32xf32>, vector<32x96xf32>, vector<16x96xf32> -> vector<16x96xf32>
    %c0_186 = arith.constant 0 : index
    %c0_187 = arith.constant 0 : index
    %c0_188 = arith.constant 0 : index
    %481 = vector.load %arg8[%c0_186, %c0_187, %c0_188] : memref<2x1x96xf32, #tpu.memory_space<vmem>>, vector<1x1x96xf32>
    %482 = vector.shape_cast %481 : vector<1x1x96xf32> to vector<1x96xf32>
    %483 = vector.broadcast %482 : vector<1x96xf32> to vector<16x96xf32>
    %484 = arith.addf %480, %483 : vector<16x96xf32>
    %485 = vector.extract_strided_slice %484 {offsets = [0, 0], sizes = [8, 96], strides = [1, 1]} : vector<16x96xf32> to vector<8x96xf32>
    %486 = vector.extract_strided_slice %485 {offsets = [0, 0], sizes = [8, 8], strides = [1, 1]} : vector<8x96xf32> to vector<8x8xf32>
    %487 = vector.extract_strided_slice %485 {offsets = [0, 32], sizes = [8, 8], strides = [1, 1]} : vector<8x96xf32> to vector<8x8xf32>
    %488 = vector.extract_strided_slice %485 {offsets = [0, 64], sizes = [8, 8], strides = [1, 1]} : vector<8x96xf32> to vector<8x8xf32>
    %489 = vector.extract_strided_slice %485 {offsets = [0, 8], sizes = [8, 8], strides = [1, 1]} : vector<8x96xf32> to vector<8x8xf32>
    %490 = vector.extract_strided_slice %485 {offsets = [0, 40], sizes = [8, 8], strides = [1, 1]} : vector<8x96xf32> to vector<8x8xf32>
    %491 = vector.extract_strided_slice %485 {offsets = [0, 72], sizes = [8, 8], strides = [1, 1]} : vector<8x96xf32> to vector<8x8xf32>
    %492 = vector.extract_strided_slice %485 {offsets = [0, 16], sizes = [8, 8], strides = [1, 1]} : vector<8x96xf32> to vector<8x8xf32>
    %493 = vector.extract_strided_slice %485 {offsets = [0, 48], sizes = [8, 8], strides = [1, 1]} : vector<8x96xf32> to vector<8x8xf32>
    %494 = vector.extract_strided_slice %485 {offsets = [0, 80], sizes = [8, 8], strides = [1, 1]} : vector<8x96xf32> to vector<8x8xf32>
    %495 = vector.extract_strided_slice %485 {offsets = [0, 24], sizes = [8, 8], strides = [1, 1]} : vector<8x96xf32> to vector<8x8xf32>
    %496 = vector.extract_strided_slice %485 {offsets = [0, 56], sizes = [8, 8], strides = [1, 1]} : vector<8x96xf32> to vector<8x8xf32>
    %497 = vector.extract_strided_slice %485 {offsets = [0, 88], sizes = [8, 8], strides = [1, 1]} : vector<8x96xf32> to vector<8x8xf32>
    %498 = vector.extract_strided_slice %484 {offsets = [8, 0], sizes = [8, 96], strides = [1, 1]} : vector<16x96xf32> to vector<8x96xf32>
    %499 = vector.extract_strided_slice %498 {offsets = [0, 0], sizes = [8, 8], strides = [1, 1]} : vector<8x96xf32> to vector<8x8xf32>
    %500 = vector.extract_strided_slice %498 {offsets = [0, 32], sizes = [8, 8], strides = [1, 1]} : vector<8x96xf32> to vector<8x8xf32>
    %501 = vector.extract_strided_slice %498 {offsets = [0, 64], sizes = [8, 8], strides = [1, 1]} : vector<8x96xf32> to vector<8x8xf32>
    %502 = vector.extract_strided_slice %498 {offsets = [0, 8], sizes = [8, 8], strides = [1, 1]} : vector<8x96xf32> to vector<8x8xf32>
    %503 = vector.extract_strided_slice %498 {offsets = [0, 40], sizes = [8, 8], strides = [1, 1]} : vector<8x96xf32> to vector<8x8xf32>
    %504 = vector.extract_strided_slice %498 {offsets = [0, 72], sizes = [8, 8], strides = [1, 1]} : vector<8x96xf32> to vector<8x8xf32>
    %505 = vector.extract_strided_slice %498 {offsets = [0, 16], sizes = [8, 8], strides = [1, 1]} : vector<8x96xf32> to vector<8x8xf32>
    %506 = vector.extract_strided_slice %498 {offsets = [0, 48], sizes = [8, 8], strides = [1, 1]} : vector<8x96xf32> to vector<8x8xf32>
    %507 = vector.extract_strided_slice %498 {offsets = [0, 80], sizes = [8, 8], strides = [1, 1]} : vector<8x96xf32> to vector<8x8xf32>
    %508 = vector.extract_strided_slice %498 {offsets = [0, 24], sizes = [8, 8], strides = [1, 1]} : vector<8x96xf32> to vector<8x8xf32>
    %509 = vector.extract_strided_slice %498 {offsets = [0, 56], sizes = [8, 8], strides = [1, 1]} : vector<8x96xf32> to vector<8x8xf32>
    %510 = vector.extract_strided_slice %498 {offsets = [0, 88], sizes = [8, 8], strides = [1, 1]} : vector<8x96xf32> to vector<8x8xf32>
    %511 = vector.shape_cast %486 : vector<8x8xf32> to vector<1x8x8xf32>
    %512 = vector.shape_cast %489 : vector<8x8xf32> to vector<1x8x8xf32>
    %513 = vector.shape_cast %492 : vector<8x8xf32> to vector<1x8x8xf32>
    %514 = vector.shape_cast %495 : vector<8x8xf32> to vector<1x8x8xf32>
    %515 = vector.shape_cast %499 : vector<8x8xf32> to vector<1x8x8xf32>
    %516 = vector.shape_cast %502 : vector<8x8xf32> to vector<1x8x8xf32>
    %517 = vector.shape_cast %505 : vector<8x8xf32> to vector<1x8x8xf32>
    %518 = vector.shape_cast %508 : vector<8x8xf32> to vector<1x8x8xf32>
    %519 = tpu.concatenate %511, %512, %513, %514, %515, %516, %517, %518 in 0 : vector<1x8x8xf32>, vector<1x8x8xf32>, vector<1x8x8xf32>, vector<1x8x8xf32>, vector<1x8x8xf32>, vector<1x8x8xf32>, vector<1x8x8xf32>, vector<1x8x8xf32> -> vector<8x8x8xf32>
    %520 = vector.shape_cast %487 : vector<8x8xf32> to vector<1x8x8xf32>
    %521 = vector.shape_cast %490 : vector<8x8xf32> to vector<1x8x8xf32>
    %522 = vector.shape_cast %493 : vector<8x8xf32> to vector<1x8x8xf32>
    %523 = vector.shape_cast %496 : vector<8x8xf32> to vector<1x8x8xf32>
    %524 = vector.shape_cast %500 : vector<8x8xf32> to vector<1x8x8xf32>
    %525 = vector.shape_cast %503 : vector<8x8xf32> to vector<1x8x8xf32>
    %526 = vector.shape_cast %506 : vector<8x8xf32> to vector<1x8x8xf32>
    %527 = vector.shape_cast %509 : vector<8x8xf32> to vector<1x8x8xf32>
    %528 = tpu.concatenate %520, %521, %522, %523, %524, %525, %526, %527 in 0 : vector<1x8x8xf32>, vector<1x8x8xf32>, vector<1x8x8xf32>, vector<1x8x8xf32>, vector<1x8x8xf32>, vector<1x8x8xf32>, vector<1x8x8xf32>, vector<1x8x8xf32> -> vector<8x8x8xf32>
    %529 = vector.shape_cast %488 : vector<8x8xf32> to vector<1x8x8xf32>
    %530 = vector.shape_cast %491 : vector<8x8xf32> to vector<1x8x8xf32>
    %531 = vector.shape_cast %494 : vector<8x8xf32> to vector<1x8x8xf32>
    %532 = vector.shape_cast %497 : vector<8x8xf32> to vector<1x8x8xf32>
    %533 = vector.shape_cast %501 : vector<8x8xf32> to vector<1x8x8xf32>
    %534 = vector.shape_cast %504 : vector<8x8xf32> to vector<1x8x8xf32>
    %535 = vector.shape_cast %507 : vector<8x8xf32> to vector<1x8x8xf32>
    %536 = vector.shape_cast %510 : vector<8x8xf32> to vector<1x8x8xf32>
    %537 = tpu.concatenate %529, %530, %531, %532, %533, %534, %535, %536 in 0 : vector<1x8x8xf32>, vector<1x8x8xf32>, vector<1x8x8xf32>, vector<1x8x8xf32>, vector<1x8x8xf32>, vector<1x8x8xf32>, vector<1x8x8xf32>, vector<1x8x8xf32> -> vector<8x8x8xf32>
    "tpu.trace_start"() <{level = 10 : i32, message = "gqc,gkc->gqk"}> : () -> ()
    %cst_189 = arith.constant dense<0.000000e+00> : vector<8x8x8xf32>
    %538 = tpu.matmul %519, %528, %cst_189 {dimension_numbers = #tpu.dot_dimension_numbers<[2], [2], [1], [1], [0, 0, 0, 1, 1, 1], [0], [0]>} : vector<8x8x8xf32>, vector<8x8x8xf32>, vector<8x8x8xf32> -> vector<8x8x8xf32>
    "tpu.trace_stop"() : () -> ()
    %cst_190 = arith.constant 0.353553385 : f32
    %539 = vector.broadcast %cst_190 : f32 to vector<8x8x8xf32>
    %540 = arith.mulf %538, %539 : vector<8x8x8xf32>
    %541 = arith.addf %540, %477 : vector<8x8x8xf32>
    %cst_191 = arith.constant dense<0xFF800000> : vector<8x8xf32>
    %542 = vector.multi_reduction <maximumf>, %541, %cst_191 [2] : vector<8x8x8xf32> to vector<8x8xf32>
    %543 = vector.shape_cast %542 : vector<8x8xf32> to vector<8x8x1xf32>
    %544 = vector.broadcast %543 : vector<8x8x1xf32> to vector<8x8x8xf32>
    %545 = arith.subf %541, %544 : vector<8x8x8xf32>
    %546 = math.exp %545 : vector<8x8x8xf32>
    %cst_192 = arith.constant dense<0.000000e+00> : vector<8x8xf32>
    %547 = vector.multi_reduction <add>, %546, %cst_192 [2] : vector<8x8x8xf32> to vector<8x8xf32>
    %548 = vector.shape_cast %547 : vector<8x8xf32> to vector<8x8x1xf32>
    %549 = vector.broadcast %548 : vector<8x8x1xf32> to vector<8x8x8xf32>
    %550 = arith.divf %546, %549 : vector<8x8x8xf32>
    "tpu.trace_start"() <{level = 10 : i32, message = "gqk,gkc->gqc"}> : () -> ()
    %cst_193 = arith.constant dense<0.000000e+00> : vector<8x8x8xf32>
    %551 = tpu.matmul %550, %537, %cst_193 {dimension_numbers = #tpu.dot_dimension_numbers<[2], [1], [1], [2], [0, 0, 0, 1, 1, 2], [0], [0]>} : vector<8x8x8xf32>, vector<8x8x8xf32>, vector<8x8x8xf32> -> vector<8x8x8xf32>
    "tpu.trace_stop"() : () -> ()
    %552 = vector.extract_strided_slice %551 {offsets = [0, 0, 0], sizes = [1, 8, 8], strides = [1, 1, 1]} : vector<8x8x8xf32> to vector<1x8x8xf32>
    %553 = vector.shape_cast %552 : vector<1x8x8xf32> to vector<8x8xf32>
    %554 = vector.extract_strided_slice %551 {offsets = [1, 0, 0], sizes = [1, 8, 8], strides = [1, 1, 1]} : vector<8x8x8xf32> to vector<1x8x8xf32>
    %555 = vector.shape_cast %554 : vector<1x8x8xf32> to vector<8x8xf32>
    %556 = vector.extract_strided_slice %551 {offsets = [2, 0, 0], sizes = [1, 8, 8], strides = [1, 1, 1]} : vector<8x8x8xf32> to vector<1x8x8xf32>
    %557 = vector.shape_cast %556 : vector<1x8x8xf32> to vector<8x8xf32>
    %558 = vector.extract_strided_slice %551 {offsets = [3, 0, 0], sizes = [1, 8, 8], strides = [1, 1, 1]} : vector<8x8x8xf32> to vector<1x8x8xf32>
    %559 = vector.shape_cast %558 : vector<1x8x8xf32> to vector<8x8xf32>
    %560 = tpu.concatenate %553, %555, %557, %559 in 1 : vector<8x8xf32>, vector<8x8xf32>, vector<8x8xf32>, vector<8x8xf32> -> vector<8x32xf32>
    %561 = vector.extract_strided_slice %551 {offsets = [4, 0, 0], sizes = [1, 8, 8], strides = [1, 1, 1]} : vector<8x8x8xf32> to vector<1x8x8xf32>
    %562 = vector.shape_cast %561 : vector<1x8x8xf32> to vector<8x8xf32>
    %563 = vector.extract_strided_slice %551 {offsets = [5, 0, 0], sizes = [1, 8, 8], strides = [1, 1, 1]} : vector<8x8x8xf32> to vector<1x8x8xf32>
    %564 = vector.shape_cast %563 : vector<1x8x8xf32> to vector<8x8xf32>
    %565 = vector.extract_strided_slice %551 {offsets = [6, 0, 0], sizes = [1, 8, 8], strides = [1, 1, 1]} : vector<8x8x8xf32> to vector<1x8x8xf32>
    %566 = vector.shape_cast %565 : vector<1x8x8xf32> to vector<8x8xf32>
    %567 = vector.extract_strided_slice %551 {offsets = [7, 0, 0], sizes = [1, 8, 8], strides = [1, 1, 1]} : vector<8x8x8xf32> to vector<1x8x8xf32>
    %568 = vector.shape_cast %567 : vector<1x8x8xf32> to vector<8x8xf32>
    %569 = tpu.concatenate %562, %564, %566, %568 in 1 : vector<8x8xf32>, vector<8x8xf32>, vector<8x8xf32>, vector<8x8xf32> -> vector<8x32xf32>
    %570 = tpu.concatenate %560, %569 in 0 : vector<8x32xf32>, vector<8x32xf32> -> vector<16x32xf32>
    %c0_194 = arith.constant 0 : index
    %c0_195 = arith.constant 0 : index
    %c0_196 = arith.constant 0 : index
    %571 = vector.load %arg9[%c0_194, %c0_195, %c0_196] : memref<2x32x32xf32, #tpu.memory_space<vmem>>, vector<1x32x32xf32>
    %572 = vector.shape_cast %571 : vector<1x32x32xf32> to vector<32x32xf32>
    %cst_197 = arith.constant dense<0.000000e+00> : vector<16x32xf32>
    %573 = tpu.matmul %570, %572, %cst_197 {dimension_numbers = #tpu.dot_dimension_numbers<[1], [0], [0], [1], [0, 0, 1, 1], [], []>} : vector<16x32xf32>, vector<32x32xf32>, vector<16x32xf32> -> vector<16x32xf32>
    %c0_198 = arith.constant 0 : index
    %c0_199 = arith.constant 0 : index
    %c0_200 = arith.constant 0 : index
    %574 = vector.load %arg10[%c0_198, %c0_199, %c0_200] : memref<2x1x32xf32, #tpu.memory_space<vmem>>, vector<1x1x32xf32>
    %575 = vector.shape_cast %574 : vector<1x1x32xf32> to vector<1x32xf32>
    %576 = vector.broadcast %575 : vector<1x32xf32> to vector<16x32xf32>
    %577 = arith.addf %573, %576 : vector<16x32xf32>
    %578 = arith.addf %113, %577 : vector<16x32xf32>
    %cst_201 = arith.constant dense<0.000000e+00> : vector<16xf32>
    %579 = vector.multi_reduction <add>, %578, %cst_201 [1] : vector<16x32xf32> to vector<16xf32>
    %580 = vector.shape_cast %579 : vector<16xf32> to vector<16x1xf32>
    %cst_202 = arith.constant 3.200000e+01 : f32
    %581 = vector.broadcast %cst_202 : f32 to vector<16x1xf32>
    %582 = arith.divf %580, %581 : vector<16x1xf32>
    %583 = vector.broadcast %582 : vector<16x1xf32> to vector<16x32xf32>
    %584 = arith.subf %578, %583 : vector<16x32xf32>
    %585 = arith.mulf %584, %584 : vector<16x32xf32>
    %cst_203 = arith.constant dense<0.000000e+00> : vector<16xf32>
    %586 = vector.multi_reduction <add>, %585, %cst_203 [1] : vector<16x32xf32> to vector<16xf32>
    %587 = vector.shape_cast %586 : vector<16xf32> to vector<16x1xf32>
    %cst_204 = arith.constant 3.200000e+01 : f32
    %588 = vector.broadcast %cst_204 : f32 to vector<16x1xf32>
    %589 = arith.divf %587, %588 : vector<16x1xf32>
    %590 = vector.broadcast %582 : vector<16x1xf32> to vector<16x32xf32>
    %591 = arith.subf %578, %590 : vector<16x32xf32>
    %cst_205 = arith.constant 9.99999974E-6 : f32
    %592 = vector.broadcast %cst_205 : f32 to vector<16x1xf32>
    %593 = arith.addf %589, %592 : vector<16x1xf32>
    %594 = math.rsqrt %593 : vector<16x1xf32>
    %595 = vector.broadcast %594 : vector<16x1xf32> to vector<16x32xf32>
    %596 = arith.mulf %591, %595 : vector<16x32xf32>
    %c0_206 = arith.constant 0 : index
    %c0_207 = arith.constant 0 : index
    %c0_208 = arith.constant 0 : index
    %597 = vector.load %arg11[%c0_206, %c0_207, %c0_208] : memref<2x1x32xf32, #tpu.memory_space<vmem>>, vector<1x1x32xf32>
    %598 = vector.shape_cast %597 : vector<1x1x32xf32> to vector<1x32xf32>
    %599 = vector.broadcast %598 : vector<1x32xf32> to vector<16x32xf32>
    %600 = arith.mulf %596, %599 : vector<16x32xf32>
    %c0_209 = arith.constant 0 : index
    %c0_210 = arith.constant 0 : index
    %c0_211 = arith.constant 0 : index
    %601 = vector.load %arg12[%c0_209, %c0_210, %c0_211] : memref<2x1x32xf32, #tpu.memory_space<vmem>>, vector<1x1x32xf32>
    %602 = vector.shape_cast %601 : vector<1x1x32xf32> to vector<1x32xf32>
    %603 = vector.broadcast %602 : vector<1x32xf32> to vector<16x32xf32>
    %604 = arith.addf %600, %603 : vector<16x32xf32>
    %c0_212 = arith.constant 0 : index
    %c0_213 = arith.constant 0 : index
    %c0_214 = arith.constant 0 : index
    %605 = vector.load %arg13[%c0_212, %c0_213, %c0_214] : memref<2x32x128xf32, #tpu.memory_space<vmem>>, vector<1x32x128xf32>
    %606 = vector.shape_cast %605 : vector<1x32x128xf32> to vector<32x128xf32>
    %cst_215 = arith.constant dense<0.000000e+00> : vector<16x128xf32>
    %607 = tpu.matmul %604, %606, %cst_215 {dimension_numbers = #tpu.dot_dimension_numbers<[1], [0], [0], [1], [0, 0, 1, 1], [], []>} : vector<16x32xf32>, vector<32x128xf32>, vector<16x128xf32> -> vector<16x128xf32>
    %c0_216 = arith.constant 0 : index
    %c0_217 = arith.constant 0 : index
    %c0_218 = arith.constant 0 : index
    %608 = vector.load %arg14[%c0_216, %c0_217, %c0_218] : memref<2x1x128xf32, #tpu.memory_space<vmem>>, vector<1x1x128xf32>
    %609 = vector.shape_cast %608 : vector<1x1x128xf32> to vector<1x128xf32>
    %610 = vector.broadcast %609 : vector<1x128xf32> to vector<16x128xf32>
    %611 = arith.addf %607, %610 : vector<16x128xf32>
    %cst_219 = arith.constant 0.000000e+00 : f32
    %612 = vector.broadcast %cst_219 : f32 to vector<16x128xf32>
    %613 = arith.maximumf %611, %612 : vector<16x128xf32>
    %c0_220 = arith.constant 0 : index
    %c0_221 = arith.constant 0 : index
    %c0_222 = arith.constant 0 : index
    %614 = vector.load %arg15[%c0_220, %c0_221, %c0_222] : memref<2x128x32xf32, #tpu.memory_space<vmem>>, vector<1x128x32xf32>
    %615 = vector.shape_cast %614 : vector<1x128x32xf32> to vector<128x32xf32>
    %cst_223 = arith.constant dense<0.000000e+00> : vector<16x32xf32>
    %616 = tpu.matmul %613, %615, %cst_223 {dimension_numbers = #tpu.dot_dimension_numbers<[1], [0], [0], [1], [0, 0, 1, 1], [], []>} : vector<16x128xf32>, vector<128x32xf32>, vector<16x32xf32> -> vector<16x32xf32>
    %c0_224 = arith.constant 0 : index
    %c0_225 = arith.constant 0 : index
    %c0_226 = arith.constant 0 : index
    %617 = vector.load %arg16[%c0_224, %c0_225, %c0_226] : memref<2x1x32xf32, #tpu.memory_space<vmem>>, vector<1x1x32xf32>
    %618 = vector.shape_cast %617 : vector<1x1x32xf32> to vector<1x32xf32>
    %619 = vector.broadcast %618 : vector<1x32xf32> to vector<16x32xf32>
    %620 = arith.addf %616, %619 : vector<16x32xf32>
    %621 = arith.addf %604, %620 : vector<16x32xf32>
    %cst_227 = arith.constant dense<0.000000e+00> : vector<16xf32>
    %622 = vector.multi_reduction <add>, %621, %cst_227 [1] : vector<16x32xf32> to vector<16xf32>
    %623 = vector.shape_cast %622 : vector<16xf32> to vector<16x1xf32>
    %cst_228 = arith.constant 3.200000e+01 : f32
    %624 = vector.broadcast %cst_228 : f32 to vector<16x1xf32>
    %625 = arith.divf %623, %624 : vector<16x1xf32>
    %626 = vector.broadcast %625 : vector<16x1xf32> to vector<16x32xf32>
    %627 = arith.subf %621, %626 : vector<16x32xf32>
    %628 = arith.mulf %627, %627 : vector<16x32xf32>
    %cst_229 = arith.constant dense<0.000000e+00> : vector<16xf32>
    %629 = vector.multi_reduction <add>, %628, %cst_229 [1] : vector<16x32xf32> to vector<16xf32>
    %630 = vector.shape_cast %629 : vector<16xf32> to vector<16x1xf32>
    %cst_230 = arith.constant 3.200000e+01 : f32
    %631 = vector.broadcast %cst_230 : f32 to vector<16x1xf32>
    %632 = arith.divf %630, %631 : vector<16x1xf32>
    %633 = vector.broadcast %625 : vector<16x1xf32> to vector<16x32xf32>
    %634 = arith.subf %621, %633 : vector<16x32xf32>
    %cst_231 = arith.constant 9.99999974E-6 : f32
    %635 = vector.broadcast %cst_231 : f32 to vector<16x1xf32>
    %636 = arith.addf %632, %635 : vector<16x1xf32>
    %637 = math.rsqrt %636 : vector<16x1xf32>
    %638 = vector.broadcast %637 : vector<16x1xf32> to vector<16x32xf32>
    %639 = arith.mulf %634, %638 : vector<16x32xf32>
    %c0_232 = arith.constant 0 : index
    %c0_233 = arith.constant 0 : index
    %c0_234 = arith.constant 0 : index
    %640 = vector.load %arg17[%c0_232, %c0_233, %c0_234] : memref<2x1x32xf32, #tpu.memory_space<vmem>>, vector<1x1x32xf32>
    %641 = vector.shape_cast %640 : vector<1x1x32xf32> to vector<1x32xf32>
    %642 = vector.broadcast %641 : vector<1x32xf32> to vector<16x32xf32>
    %643 = arith.mulf %639, %642 : vector<16x32xf32>
    %c0_235 = arith.constant 0 : index
    %c0_236 = arith.constant 0 : index
    %c0_237 = arith.constant 0 : index
    %644 = vector.load %arg18[%c0_235, %c0_236, %c0_237] : memref<2x1x32xf32, #tpu.memory_space<vmem>>, vector<1x1x32xf32>
    %645 = vector.shape_cast %644 : vector<1x1x32xf32> to vector<1x32xf32>
    %646 = vector.broadcast %645 : vector<1x32xf32> to vector<16x32xf32>
    %647 = arith.addf %643, %646 : vector<16x32xf32>
    %c1_238 = arith.constant 1 : index
    %c0_239 = arith.constant 0 : index
    %c0_240 = arith.constant 0 : index
    %648 = vector.load %arg7[%c1_238, %c0_239, %c0_240] : memref<2x32x96xf32, #tpu.memory_space<vmem>>, vector<1x32x96xf32>
    %649 = vector.shape_cast %648 : vector<1x32x96xf32> to vector<32x96xf32>
    %cst_241 = arith.constant dense<0.000000e+00> : vector<16x96xf32>
    %650 = tpu.matmul %647, %649, %cst_241 {dimension_numbers = #tpu.dot_dimension_numbers<[1], [0], [0], [1], [0, 0, 1, 1], [], []>} : vector<16x32xf32>, vector<32x96xf32>, vector<16x96xf32> -> vector<16x96xf32>
    %c1_242 = arith.constant 1 : index
    %c0_243 = arith.constant 0 : index
    %c0_244 = arith.constant 0 : index
    %651 = vector.load %arg8[%c1_242, %c0_243, %c0_244] : memref<2x1x96xf32, #tpu.memory_space<vmem>>, vector<1x1x96xf32>
    %652 = vector.shape_cast %651 : vector<1x1x96xf32> to vector<1x96xf32>
    %653 = vector.broadcast %652 : vector<1x96xf32> to vector<16x96xf32>
    %654 = arith.addf %650, %653 : vector<16x96xf32>
    %655 = vector.extract_strided_slice %654 {offsets = [0, 0], sizes = [8, 96], strides = [1, 1]} : vector<16x96xf32> to vector<8x96xf32>
    %656 = vector.extract_strided_slice %655 {offsets = [0, 0], sizes = [8, 8], strides = [1, 1]} : vector<8x96xf32> to vector<8x8xf32>
    %657 = vector.extract_strided_slice %655 {offsets = [0, 32], sizes = [8, 8], strides = [1, 1]} : vector<8x96xf32> to vector<8x8xf32>
    %658 = vector.extract_strided_slice %655 {offsets = [0, 64], sizes = [8, 8], strides = [1, 1]} : vector<8x96xf32> to vector<8x8xf32>
    %659 = vector.extract_strided_slice %655 {offsets = [0, 8], sizes = [8, 8], strides = [1, 1]} : vector<8x96xf32> to vector<8x8xf32>
    %660 = vector.extract_strided_slice %655 {offsets = [0, 40], sizes = [8, 8], strides = [1, 1]} : vector<8x96xf32> to vector<8x8xf32>
    %661 = vector.extract_strided_slice %655 {offsets = [0, 72], sizes = [8, 8], strides = [1, 1]} : vector<8x96xf32> to vector<8x8xf32>
    %662 = vector.extract_strided_slice %655 {offsets = [0, 16], sizes = [8, 8], strides = [1, 1]} : vector<8x96xf32> to vector<8x8xf32>
    %663 = vector.extract_strided_slice %655 {offsets = [0, 48], sizes = [8, 8], strides = [1, 1]} : vector<8x96xf32> to vector<8x8xf32>
    %664 = vector.extract_strided_slice %655 {offsets = [0, 80], sizes = [8, 8], strides = [1, 1]} : vector<8x96xf32> to vector<8x8xf32>
    %665 = vector.extract_strided_slice %655 {offsets = [0, 24], sizes = [8, 8], strides = [1, 1]} : vector<8x96xf32> to vector<8x8xf32>
    %666 = vector.extract_strided_slice %655 {offsets = [0, 56], sizes = [8, 8], strides = [1, 1]} : vector<8x96xf32> to vector<8x8xf32>
    %667 = vector.extract_strided_slice %655 {offsets = [0, 88], sizes = [8, 8], strides = [1, 1]} : vector<8x96xf32> to vector<8x8xf32>
    %668 = vector.extract_strided_slice %654 {offsets = [8, 0], sizes = [8, 96], strides = [1, 1]} : vector<16x96xf32> to vector<8x96xf32>
    %669 = vector.extract_strided_slice %668 {offsets = [0, 0], sizes = [8, 8], strides = [1, 1]} : vector<8x96xf32> to vector<8x8xf32>
    %670 = vector.extract_strided_slice %668 {offsets = [0, 32], sizes = [8, 8], strides = [1, 1]} : vector<8x96xf32> to vector<8x8xf32>
    %671 = vector.extract_strided_slice %668 {offsets = [0, 64], sizes = [8, 8], strides = [1, 1]} : vector<8x96xf32> to vector<8x8xf32>
    %672 = vector.extract_strided_slice %668 {offsets = [0, 8], sizes = [8, 8], strides = [1, 1]} : vector<8x96xf32> to vector<8x8xf32>
    %673 = vector.extract_strided_slice %668 {offsets = [0, 40], sizes = [8, 8], strides = [1, 1]} : vector<8x96xf32> to vector<8x8xf32>
    %674 = vector.extract_strided_slice %668 {offsets = [0, 72], sizes = [8, 8], strides = [1, 1]} : vector<8x96xf32> to vector<8x8xf32>
    %675 = vector.extract_strided_slice %668 {offsets = [0, 16], sizes = [8, 8], strides = [1, 1]} : vector<8x96xf32> to vector<8x8xf32>
    %676 = vector.extract_strided_slice %668 {offsets = [0, 48], sizes = [8, 8], strides = [1, 1]} : vector<8x96xf32> to vector<8x8xf32>
    %677 = vector.extract_strided_slice %668 {offsets = [0, 80], sizes = [8, 8], strides = [1, 1]} : vector<8x96xf32> to vector<8x8xf32>
    %678 = vector.extract_strided_slice %668 {offsets = [0, 24], sizes = [8, 8], strides = [1, 1]} : vector<8x96xf32> to vector<8x8xf32>
    %679 = vector.extract_strided_slice %668 {offsets = [0, 56], sizes = [8, 8], strides = [1, 1]} : vector<8x96xf32> to vector<8x8xf32>
    %680 = vector.extract_strided_slice %668 {offsets = [0, 88], sizes = [8, 8], strides = [1, 1]} : vector<8x96xf32> to vector<8x8xf32>
    %681 = vector.shape_cast %656 : vector<8x8xf32> to vector<1x8x8xf32>
    %682 = vector.shape_cast %659 : vector<8x8xf32> to vector<1x8x8xf32>
    %683 = vector.shape_cast %662 : vector<8x8xf32> to vector<1x8x8xf32>
    %684 = vector.shape_cast %665 : vector<8x8xf32> to vector<1x8x8xf32>
    %685 = vector.shape_cast %669 : vector<8x8xf32> to vector<1x8x8xf32>
    %686 = vector.shape_cast %672 : vector<8x8xf32> to vector<1x8x8xf32>
    %687 = vector.shape_cast %675 : vector<8x8xf32> to vector<1x8x8xf32>
    %688 = vector.shape_cast %678 : vector<8x8xf32> to vector<1x8x8xf32>
    %689 = tpu.concatenate %681, %682, %683, %684, %685, %686, %687, %688 in 0 : vector<1x8x8xf32>, vector<1x8x8xf32>, vector<1x8x8xf32>, vector<1x8x8xf32>, vector<1x8x8xf32>, vector<1x8x8xf32>, vector<1x8x8xf32>, vector<1x8x8xf32> -> vector<8x8x8xf32>
    %690 = vector.shape_cast %657 : vector<8x8xf32> to vector<1x8x8xf32>
    %691 = vector.shape_cast %660 : vector<8x8xf32> to vector<1x8x8xf32>
    %692 = vector.shape_cast %663 : vector<8x8xf32> to vector<1x8x8xf32>
    %693 = vector.shape_cast %666 : vector<8x8xf32> to vector<1x8x8xf32>
    %694 = vector.shape_cast %670 : vector<8x8xf32> to vector<1x8x8xf32>
    %695 = vector.shape_cast %673 : vector<8x8xf32> to vector<1x8x8xf32>
    %696 = vector.shape_cast %676 : vector<8x8xf32> to vector<1x8x8xf32>
    %697 = vector.shape_cast %679 : vector<8x8xf32> to vector<1x8x8xf32>
    %698 = tpu.concatenate %690, %691, %692, %693, %694, %695, %696, %697 in 0 : vector<1x8x8xf32>, vector<1x8x8xf32>, vector<1x8x8xf32>, vector<1x8x8xf32>, vector<1x8x8xf32>, vector<1x8x8xf32>, vector<1x8x8xf32>, vector<1x8x8xf32> -> vector<8x8x8xf32>
    %699 = vector.shape_cast %658 : vector<8x8xf32> to vector<1x8x8xf32>
    %700 = vector.shape_cast %661 : vector<8x8xf32> to vector<1x8x8xf32>
    %701 = vector.shape_cast %664 : vector<8x8xf32> to vector<1x8x8xf32>
    %702 = vector.shape_cast %667 : vector<8x8xf32> to vector<1x8x8xf32>
    %703 = vector.shape_cast %671 : vector<8x8xf32> to vector<1x8x8xf32>
    %704 = vector.shape_cast %674 : vector<8x8xf32> to vector<1x8x8xf32>
    %705 = vector.shape_cast %677 : vector<8x8xf32> to vector<1x8x8xf32>
    %706 = vector.shape_cast %680 : vector<8x8xf32> to vector<1x8x8xf32>
    %707 = tpu.concatenate %699, %700, %701, %702, %703, %704, %705, %706 in 0 : vector<1x8x8xf32>, vector<1x8x8xf32>, vector<1x8x8xf32>, vector<1x8x8xf32>, vector<1x8x8xf32>, vector<1x8x8xf32>, vector<1x8x8xf32>, vector<1x8x8xf32> -> vector<8x8x8xf32>
    "tpu.trace_start"() <{level = 10 : i32, message = "gqc,gkc->gqk"}> : () -> ()
    %cst_245 = arith.constant dense<0.000000e+00> : vector<8x8x8xf32>
    %708 = tpu.matmul %689, %698, %cst_245 {dimension_numbers = #tpu.dot_dimension_numbers<[2], [2], [1], [1], [0, 0, 0, 1, 1, 1], [0], [0]>} : vector<8x8x8xf32>, vector<8x8x8xf32>, vector<8x8x8xf32> -> vector<8x8x8xf32>
    "tpu.trace_stop"() : () -> ()
    %cst_246 = arith.constant 0.353553385 : f32
    %709 = vector.broadcast %cst_246 : f32 to vector<8x8x8xf32>
    %710 = arith.mulf %708, %709 : vector<8x8x8xf32>
    %711 = arith.addf %710, %477 : vector<8x8x8xf32>
    %cst_247 = arith.constant dense<0xFF800000> : vector<8x8xf32>
    %712 = vector.multi_reduction <maximumf>, %711, %cst_247 [2] : vector<8x8x8xf32> to vector<8x8xf32>
    %713 = vector.shape_cast %712 : vector<8x8xf32> to vector<8x8x1xf32>
    %714 = vector.broadcast %713 : vector<8x8x1xf32> to vector<8x8x8xf32>
    %715 = arith.subf %711, %714 : vector<8x8x8xf32>
    %716 = math.exp %715 : vector<8x8x8xf32>
    %cst_248 = arith.constant dense<0.000000e+00> : vector<8x8xf32>
    %717 = vector.multi_reduction <add>, %716, %cst_248 [2] : vector<8x8x8xf32> to vector<8x8xf32>
    %718 = vector.shape_cast %717 : vector<8x8xf32> to vector<8x8x1xf32>
    %719 = vector.broadcast %718 : vector<8x8x1xf32> to vector<8x8x8xf32>
    %720 = arith.divf %716, %719 : vector<8x8x8xf32>
    "tpu.trace_start"() <{level = 10 : i32, message = "gqk,gkc->gqc"}> : () -> ()
    %cst_249 = arith.constant dense<0.000000e+00> : vector<8x8x8xf32>
    %721 = tpu.matmul %720, %707, %cst_249 {dimension_numbers = #tpu.dot_dimension_numbers<[2], [1], [1], [2], [0, 0, 0, 1, 1, 2], [0], [0]>} : vector<8x8x8xf32>, vector<8x8x8xf32>, vector<8x8x8xf32> -> vector<8x8x8xf32>
    "tpu.trace_stop"() : () -> ()
    %722 = vector.extract_strided_slice %721 {offsets = [0, 0, 0], sizes = [1, 8, 8], strides = [1, 1, 1]} : vector<8x8x8xf32> to vector<1x8x8xf32>
    %723 = vector.shape_cast %722 : vector<1x8x8xf32> to vector<8x8xf32>
    %724 = vector.extract_strided_slice %721 {offsets = [1, 0, 0], sizes = [1, 8, 8], strides = [1, 1, 1]} : vector<8x8x8xf32> to vector<1x8x8xf32>
    %725 = vector.shape_cast %724 : vector<1x8x8xf32> to vector<8x8xf32>
    %726 = vector.extract_strided_slice %721 {offsets = [2, 0, 0], sizes = [1, 8, 8], strides = [1, 1, 1]} : vector<8x8x8xf32> to vector<1x8x8xf32>
    %727 = vector.shape_cast %726 : vector<1x8x8xf32> to vector<8x8xf32>
    %728 = vector.extract_strided_slice %721 {offsets = [3, 0, 0], sizes = [1, 8, 8], strides = [1, 1, 1]} : vector<8x8x8xf32> to vector<1x8x8xf32>
    %729 = vector.shape_cast %728 : vector<1x8x8xf32> to vector<8x8xf32>
    %730 = tpu.concatenate %723, %725, %727, %729 in 1 : vector<8x8xf32>, vector<8x8xf32>, vector<8x8xf32>, vector<8x8xf32> -> vector<8x32xf32>
    %731 = vector.extract_strided_slice %721 {offsets = [4, 0, 0], sizes = [1, 8, 8], strides = [1, 1, 1]} : vector<8x8x8xf32> to vector<1x8x8xf32>
    %732 = vector.shape_cast %731 : vector<1x8x8xf32> to vector<8x8xf32>
    %733 = vector.extract_strided_slice %721 {offsets = [5, 0, 0], sizes = [1, 8, 8], strides = [1, 1, 1]} : vector<8x8x8xf32> to vector<1x8x8xf32>
    %734 = vector.shape_cast %733 : vector<1x8x8xf32> to vector<8x8xf32>
    %735 = vector.extract_strided_slice %721 {offsets = [6, 0, 0], sizes = [1, 8, 8], strides = [1, 1, 1]} : vector<8x8x8xf32> to vector<1x8x8xf32>
    %736 = vector.shape_cast %735 : vector<1x8x8xf32> to vector<8x8xf32>
    %737 = vector.extract_strided_slice %721 {offsets = [7, 0, 0], sizes = [1, 8, 8], strides = [1, 1, 1]} : vector<8x8x8xf32> to vector<1x8x8xf32>
    %738 = vector.shape_cast %737 : vector<1x8x8xf32> to vector<8x8xf32>
    %739 = tpu.concatenate %732, %734, %736, %738 in 1 : vector<8x8xf32>, vector<8x8xf32>, vector<8x8xf32>, vector<8x8xf32> -> vector<8x32xf32>
    %740 = tpu.concatenate %730, %739 in 0 : vector<8x32xf32>, vector<8x32xf32> -> vector<16x32xf32>
    %c1_250 = arith.constant 1 : index
    %c0_251 = arith.constant 0 : index
    %c0_252 = arith.constant 0 : index
    %741 = vector.load %arg9[%c1_250, %c0_251, %c0_252] : memref<2x32x32xf32, #tpu.memory_space<vmem>>, vector<1x32x32xf32>
    %742 = vector.shape_cast %741 : vector<1x32x32xf32> to vector<32x32xf32>
    %cst_253 = arith.constant dense<0.000000e+00> : vector<16x32xf32>
    %743 = tpu.matmul %740, %742, %cst_253 {dimension_numbers = #tpu.dot_dimension_numbers<[1], [0], [0], [1], [0, 0, 1, 1], [], []>} : vector<16x32xf32>, vector<32x32xf32>, vector<16x32xf32> -> vector<16x32xf32>
    %c1_254 = arith.constant 1 : index
    %c0_255 = arith.constant 0 : index
    %c0_256 = arith.constant 0 : index
    %744 = vector.load %arg10[%c1_254, %c0_255, %c0_256] : memref<2x1x32xf32, #tpu.memory_space<vmem>>, vector<1x1x32xf32>
    %745 = vector.shape_cast %744 : vector<1x1x32xf32> to vector<1x32xf32>
    %746 = vector.broadcast %745 : vector<1x32xf32> to vector<16x32xf32>
    %747 = arith.addf %743, %746 : vector<16x32xf32>
    %748 = arith.addf %647, %747 : vector<16x32xf32>
    %cst_257 = arith.constant dense<0.000000e+00> : vector<16xf32>
    %749 = vector.multi_reduction <add>, %748, %cst_257 [1] : vector<16x32xf32> to vector<16xf32>
    %750 = vector.shape_cast %749 : vector<16xf32> to vector<16x1xf32>
    %cst_258 = arith.constant 3.200000e+01 : f32
    %751 = vector.broadcast %cst_258 : f32 to vector<16x1xf32>
    %752 = arith.divf %750, %751 : vector<16x1xf32>
    %753 = vector.broadcast %752 : vector<16x1xf32> to vector<16x32xf32>
    %754 = arith.subf %748, %753 : vector<16x32xf32>
    %755 = arith.mulf %754, %754 : vector<16x32xf32>
    %cst_259 = arith.constant dense<0.000000e+00> : vector<16xf32>
    %756 = vector.multi_reduction <add>, %755, %cst_259 [1] : vector<16x32xf32> to vector<16xf32>
    %757 = vector.shape_cast %756 : vector<16xf32> to vector<16x1xf32>
    %cst_260 = arith.constant 3.200000e+01 : f32
    %758 = vector.broadcast %cst_260 : f32 to vector<16x1xf32>
    %759 = arith.divf %757, %758 : vector<16x1xf32>
    %760 = vector.broadcast %752 : vector<16x1xf32> to vector<16x32xf32>
    %761 = arith.subf %748, %760 : vector<16x32xf32>
    %cst_261 = arith.constant 9.99999974E-6 : f32
    %762 = vector.broadcast %cst_261 : f32 to vector<16x1xf32>
    %763 = arith.addf %759, %762 : vector<16x1xf32>
    %764 = math.rsqrt %763 : vector<16x1xf32>
    %765 = vector.broadcast %764 : vector<16x1xf32> to vector<16x32xf32>
    %766 = arith.mulf %761, %765 : vector<16x32xf32>
    %c1_262 = arith.constant 1 : index
    %c0_263 = arith.constant 0 : index
    %c0_264 = arith.constant 0 : index
    %767 = vector.load %arg11[%c1_262, %c0_263, %c0_264] : memref<2x1x32xf32, #tpu.memory_space<vmem>>, vector<1x1x32xf32>
    %768 = vector.shape_cast %767 : vector<1x1x32xf32> to vector<1x32xf32>
    %769 = vector.broadcast %768 : vector<1x32xf32> to vector<16x32xf32>
    %770 = arith.mulf %766, %769 : vector<16x32xf32>
    %c1_265 = arith.constant 1 : index
    %c0_266 = arith.constant 0 : index
    %c0_267 = arith.constant 0 : index
    %771 = vector.load %arg12[%c1_265, %c0_266, %c0_267] : memref<2x1x32xf32, #tpu.memory_space<vmem>>, vector<1x1x32xf32>
    %772 = vector.shape_cast %771 : vector<1x1x32xf32> to vector<1x32xf32>
    %773 = vector.broadcast %772 : vector<1x32xf32> to vector<16x32xf32>
    %774 = arith.addf %770, %773 : vector<16x32xf32>
    %c1_268 = arith.constant 1 : index
    %c0_269 = arith.constant 0 : index
    %c0_270 = arith.constant 0 : index
    %775 = vector.load %arg13[%c1_268, %c0_269, %c0_270] : memref<2x32x128xf32, #tpu.memory_space<vmem>>, vector<1x32x128xf32>
    %776 = vector.shape_cast %775 : vector<1x32x128xf32> to vector<32x128xf32>
    %cst_271 = arith.constant dense<0.000000e+00> : vector<16x128xf32>
    %777 = tpu.matmul %774, %776, %cst_271 {dimension_numbers = #tpu.dot_dimension_numbers<[1], [0], [0], [1], [0, 0, 1, 1], [], []>} : vector<16x32xf32>, vector<32x128xf32>, vector<16x128xf32> -> vector<16x128xf32>
    %c1_272 = arith.constant 1 : index
    %c0_273 = arith.constant 0 : index
    %c0_274 = arith.constant 0 : index
    %778 = vector.load %arg14[%c1_272, %c0_273, %c0_274] : memref<2x1x128xf32, #tpu.memory_space<vmem>>, vector<1x1x128xf32>
    %779 = vector.shape_cast %778 : vector<1x1x128xf32> to vector<1x128xf32>
    %780 = vector.broadcast %779 : vector<1x128xf32> to vector<16x128xf32>
    %781 = arith.addf %777, %780 : vector<16x128xf32>
    %cst_275 = arith.constant 0.000000e+00 : f32
    %782 = vector.broadcast %cst_275 : f32 to vector<16x128xf32>
    %783 = arith.maximumf %781, %782 : vector<16x128xf32>
    %c1_276 = arith.constant 1 : index
    %c0_277 = arith.constant 0 : index
    %c0_278 = arith.constant 0 : index
    %784 = vector.load %arg15[%c1_276, %c0_277, %c0_278] : memref<2x128x32xf32, #tpu.memory_space<vmem>>, vector<1x128x32xf32>
    %785 = vector.shape_cast %784 : vector<1x128x32xf32> to vector<128x32xf32>
    %cst_279 = arith.constant dense<0.000000e+00> : vector<16x32xf32>
    %786 = tpu.matmul %783, %785, %cst_279 {dimension_numbers = #tpu.dot_dimension_numbers<[1], [0], [0], [1], [0, 0, 1, 1], [], []>} : vector<16x128xf32>, vector<128x32xf32>, vector<16x32xf32> -> vector<16x32xf32>
    %c1_280 = arith.constant 1 : index
    %c0_281 = arith.constant 0 : index
    %c0_282 = arith.constant 0 : index
    %787 = vector.load %arg16[%c1_280, %c0_281, %c0_282] : memref<2x1x32xf32, #tpu.memory_space<vmem>>, vector<1x1x32xf32>
    %788 = vector.shape_cast %787 : vector<1x1x32xf32> to vector<1x32xf32>
    %789 = vector.broadcast %788 : vector<1x32xf32> to vector<16x32xf32>
    %790 = arith.addf %786, %789 : vector<16x32xf32>
    %791 = arith.addf %774, %790 : vector<16x32xf32>
    %cst_283 = arith.constant dense<0.000000e+00> : vector<16xf32>
    %792 = vector.multi_reduction <add>, %791, %cst_283 [1] : vector<16x32xf32> to vector<16xf32>
    %793 = vector.shape_cast %792 : vector<16xf32> to vector<16x1xf32>
    %cst_284 = arith.constant 3.200000e+01 : f32
    %794 = vector.broadcast %cst_284 : f32 to vector<16x1xf32>
    %795 = arith.divf %793, %794 : vector<16x1xf32>
    %796 = vector.broadcast %795 : vector<16x1xf32> to vector<16x32xf32>
    %797 = arith.subf %791, %796 : vector<16x32xf32>
    %798 = arith.mulf %797, %797 : vector<16x32xf32>
    %cst_285 = arith.constant dense<0.000000e+00> : vector<16xf32>
    %799 = vector.multi_reduction <add>, %798, %cst_285 [1] : vector<16x32xf32> to vector<16xf32>
    %800 = vector.shape_cast %799 : vector<16xf32> to vector<16x1xf32>
    %cst_286 = arith.constant 3.200000e+01 : f32
    %801 = vector.broadcast %cst_286 : f32 to vector<16x1xf32>
    %802 = arith.divf %800, %801 : vector<16x1xf32>
    %803 = vector.broadcast %795 : vector<16x1xf32> to vector<16x32xf32>
    %804 = arith.subf %791, %803 : vector<16x32xf32>
    %cst_287 = arith.constant 9.99999974E-6 : f32
    %805 = vector.broadcast %cst_287 : f32 to vector<16x1xf32>
    %806 = arith.addf %802, %805 : vector<16x1xf32>
    %807 = math.rsqrt %806 : vector<16x1xf32>
    %808 = vector.broadcast %807 : vector<16x1xf32> to vector<16x32xf32>
    %809 = arith.mulf %804, %808 : vector<16x32xf32>
    %c1_288 = arith.constant 1 : index
    %c0_289 = arith.constant 0 : index
    %c0_290 = arith.constant 0 : index
    %810 = vector.load %arg17[%c1_288, %c0_289, %c0_290] : memref<2x1x32xf32, #tpu.memory_space<vmem>>, vector<1x1x32xf32>
    %811 = vector.shape_cast %810 : vector<1x1x32xf32> to vector<1x32xf32>
    %812 = vector.broadcast %811 : vector<1x32xf32> to vector<16x32xf32>
    %813 = arith.mulf %809, %812 : vector<16x32xf32>
    %c1_291 = arith.constant 1 : index
    %c0_292 = arith.constant 0 : index
    %c0_293 = arith.constant 0 : index
    %814 = vector.load %arg18[%c1_291, %c0_292, %c0_293] : memref<2x1x32xf32, #tpu.memory_space<vmem>>, vector<1x1x32xf32>
    %815 = vector.shape_cast %814 : vector<1x1x32xf32> to vector<1x32xf32>
    %816 = vector.broadcast %815 : vector<1x32xf32> to vector<16x32xf32>
    %817 = arith.addf %813, %816 : vector<16x32xf32>
    %818 = vector.extract_strided_slice %817 {offsets = [0, 0], sizes = [1, 32], strides = [1, 1]} : vector<16x32xf32> to vector<1x32xf32>
    %819 = vector.extract_strided_slice %817 {offsets = [8, 0], sizes = [1, 32], strides = [1, 1]} : vector<16x32xf32> to vector<1x32xf32>
    %820 = tpu.concatenate %818, %819 in 0 : vector<1x32xf32>, vector<1x32xf32> -> vector<2x32xf32>
    %c0_294 = arith.constant 0 : index
    %c0_295 = arith.constant 0 : index
    %821 = vector.load %arg19[%c0_294, %c0_295] : memref<32x128xf32, #tpu.memory_space<vmem>>, vector<32x128xf32>
    %cst_296 = arith.constant dense<0.000000e+00> : vector<2x128xf32>
    %822 = tpu.matmul %820, %821, %cst_296 {dimension_numbers = #tpu.dot_dimension_numbers<[1], [0], [0], [1], [0, 0, 1, 1], [], []>} : vector<2x32xf32>, vector<32x128xf32>, vector<2x128xf32> -> vector<2x128xf32>
    %c0_297 = arith.constant 0 : index
    %c0_298 = arith.constant 0 : index
    %823 = vector.load %arg20[%c0_297, %c0_298] : memref<1x128xf32, #tpu.memory_space<vmem>>, vector<1x128xf32>
    %824 = vector.broadcast %823 : vector<1x128xf32> to vector<2x128xf32>
    %825 = arith.addf %822, %824 : vector<2x128xf32>
    %826 = vector.shape_cast %825 : vector<2x128xf32> to vector<2x1x128xf32>
    %c0_299 = arith.constant 0 : index
    %c0_300 = arith.constant 0 : index
    %c0_301 = arith.constant 0 : index
    %827 = vector.load %arg21[%c0_299, %c0_300, %c0_301] : memref<2x1x128xf32, #tpu.memory_space<vmem>>, vector<2x1x128xf32>
    tpu.vector_store %arg21[%c0_299, %c0_300, %c0_301], %826 {strides = array<i32>} : memref<2x1x128xf32, #tpu.memory_space<vmem>>, vector<2x1x128xf32>,
    return
  }
  func.func @transform_0(%arg0: i32, %arg1: memref<2x8xi32, #tpu.memory_space<smem>>, %arg2: memref<4x6xf32, #tpu.memory_space<smem>>) -> (i32, i32, i32) {
    %c0_i32 = arith.constant 0 : i32
    %c0_i32_0 = arith.constant 0 : i32
    %c0_i32_1 = arith.constant 0 : i32
    return %arg0, %c0_i32, %c0_i32_0 : i32, i32, i32
  }
  func.func @transform_1(%arg0: i32, %arg1: memref<2x8xi32, #tpu.memory_space<smem>>, %arg2: memref<4x6xf32, #tpu.memory_space<smem>>) -> (i32, i32, i32) {
    %c0_i32 = arith.constant 0 : i32
    %c0_i32_0 = arith.constant 0 : i32
    %c0_i32_1 = arith.constant 0 : i32
    return %arg0, %c0_i32, %c0_i32_0 : i32, i32, i32
  }
  func.func @transform_2(%arg0: i32, %arg1: memref<2x8xi32, #tpu.memory_space<smem>>, %arg2: memref<4x6xf32, #tpu.memory_space<smem>>) -> (i32, i32) {
    %c0_i32 = arith.constant 0 : i32
    %c0_i32_0 = arith.constant 0 : i32
    %c0_i32_1 = arith.constant 0 : i32
    return %c0_i32, %c0_i32_0 : i32, i32
  }
  func.func @transform_3(%arg0: i32, %arg1: memref<2x8xi32, #tpu.memory_space<smem>>, %arg2: memref<4x6xf32, #tpu.memory_space<smem>>) -> (i32, i32) {
    %c0_i32 = arith.constant 0 : i32
    %c0_i32_0 = arith.constant 0 : i32
    %c0_i32_1 = arith.constant 0 : i32
    return %c0_i32, %c0_i32_0 : i32, i32
  }
  func.func @transform_4(%arg0: i32, %arg1: memref<2x8xi32, #tpu.memory_space<smem>>, %arg2: memref<4x6xf32, #tpu.memory_space<smem>>) -> (i32, i32, i32) {
    %c0_i32 = arith.constant 0 : i32
    %c0_i32_0 = arith.constant 0 : i32
    %c0_i32_1 = arith.constant 0 : i32
    %c0_i32_2 = arith.constant 0 : i32
    return %c0_i32, %c0_i32_0, %c0_i32_1 : i32, i32, i32
  }
  func.func @transform_5(%arg0: i32, %arg1: memref<2x8xi32, #tpu.memory_space<smem>>, %arg2: memref<4x6xf32, #tpu.memory_space<smem>>) -> (i32, i32, i32) {
    %c0_i32 = arith.constant 0 : i32
    %c0_i32_0 = arith.constant 0 : i32
    %c0_i32_1 = arith.constant 0 : i32
    %c0_i32_2 = arith.constant 0 : i32
    return %c0_i32, %c0_i32_0, %c0_i32_1 : i32, i32, i32
  }
  func.func @transform_6(%arg0: i32, %arg1: memref<2x8xi32, #tpu.memory_space<smem>>, %arg2: memref<4x6xf32, #tpu.memory_space<smem>>) -> (i32, i32, i32) {
    %c0_i32 = arith.constant 0 : i32
    %c0_i32_0 = arith.constant 0 : i32
    %c0_i32_1 = arith.constant 0 : i32
    %c0_i32_2 = arith.constant 0 : i32
    return %c0_i32, %c0_i32_0, %c0_i32_1 : i32, i32, i32
  }
  func.func @transform_7(%arg0: i32, %arg1: memref<2x8xi32, #tpu.memory_space<smem>>, %arg2: memref<4x6xf32, #tpu.memory_space<smem>>) -> (i32, i32, i32) {
    %c0_i32 = arith.constant 0 : i32
    %c0_i32_0 = arith.constant 0 : i32
    %c0_i32_1 = arith.constant 0 : i32
    %c0_i32_2 = arith.constant 0 : i32
    return %c0_i32, %c0_i32_0, %c0_i32_1 : i32, i32, i32
  }
  func.func @transform_8(%arg0: i32, %arg1: memref<2x8xi32, #tpu.memory_space<smem>>, %arg2: memref<4x6xf32, #tpu.memory_space<smem>>) -> (i32, i32, i32) {
    %c0_i32 = arith.constant 0 : i32
    %c0_i32_0 = arith.constant 0 : i32
    %c0_i32_1 = arith.constant 0 : i32
    %c0_i32_2 = arith.constant 0 : i32
    return %c0_i32, %c0_i32_0, %c0_i32_1 : i32, i32, i32
  }
  func.func @transform_9(%arg0: i32, %arg1: memref<2x8xi32, #tpu.memory_space<smem>>, %arg2: memref<4x6xf32, #tpu.memory_space<smem>>) -> (i32, i32, i32) {
    %c0_i32 = arith.constant 0 : i32
    %c0_i32_0 = arith.constant 0 : i32
    %c0_i32_1 = arith.constant 0 : i32
    %c0_i32_2 = arith.constant 0 : i32
    return %c0_i32, %c0_i32_0, %c0_i32_1 : i32, i32, i32
  }
  func.func @transform_10(%arg0: i32, %arg1: memref<2x8xi32, #tpu.memory_space<smem>>, %arg2: memref<4x6xf32, #tpu.memory_space<smem>>) -> (i32, i32, i32) {
    %c0_i32 = arith.constant 0 : i32
    %c0_i32_0 = arith.constant 0 : i32
    %c0_i32_1 = arith.constant 0 : i32
    %c0_i32_2 = arith.constant 0 : i32
    return %c0_i32, %c0_i32_0, %c0_i32_1 : i32, i32, i32
  }
  func.func @transform_11(%arg0: i32, %arg1: memref<2x8xi32, #tpu.memory_space<smem>>, %arg2: memref<4x6xf32, #tpu.memory_space<smem>>) -> (i32, i32, i32) {
    %c0_i32 = arith.constant 0 : i32
    %c0_i32_0 = arith.constant 0 : i32
    %c0_i32_1 = arith.constant 0 : i32
    %c0_i32_2 = arith.constant 0 : i32
    return %c0_i32, %c0_i32_0, %c0_i32_1 : i32, i32, i32
  }
  func.func @transform_12(%arg0: i32, %arg1: memref<2x8xi32, #tpu.memory_space<smem>>, %arg2: memref<4x6xf32, #tpu.memory_space<smem>>) -> (i32, i32, i32) {
    %c0_i32 = arith.constant 0 : i32
    %c0_i32_0 = arith.constant 0 : i32
    %c0_i32_1 = arith.constant 0 : i32
    %c0_i32_2 = arith.constant 0 : i32
    return %c0_i32, %c0_i32_0, %c0_i32_1 : i32, i32, i32
  }
  func.func @transform_13(%arg0: i32, %arg1: memref<2x8xi32, #tpu.memory_space<smem>>, %arg2: memref<4x6xf32, #tpu.memory_space<smem>>) -> (i32, i32, i32) {
    %c0_i32 = arith.constant 0 : i32
    %c0_i32_0 = arith.constant 0 : i32
    %c0_i32_1 = arith.constant 0 : i32
    %c0_i32_2 = arith.constant 0 : i32
    return %c0_i32, %c0_i32_0, %c0_i32_1 : i32, i32, i32
  }
  func.func @transform_14(%arg0: i32, %arg1: memref<2x8xi32, #tpu.memory_space<smem>>, %arg2: memref<4x6xf32, #tpu.memory_space<smem>>) -> (i32, i32, i32) {
    %c0_i32 = arith.constant 0 : i32
    %c0_i32_0 = arith.constant 0 : i32
    %c0_i32_1 = arith.constant 0 : i32
    %c0_i32_2 = arith.constant 0 : i32
    return %c0_i32, %c0_i32_0, %c0_i32_1 : i32, i32, i32
  }
  func.func @transform_15(%arg0: i32, %arg1: memref<2x8xi32, #tpu.memory_space<smem>>, %arg2: memref<4x6xf32, #tpu.memory_space<smem>>) -> (i32, i32, i32) {
    %c0_i32 = arith.constant 0 : i32
    %c0_i32_0 = arith.constant 0 : i32
    %c0_i32_1 = arith.constant 0 : i32
    %c0_i32_2 = arith.constant 0 : i32
    return %c0_i32, %c0_i32_0, %c0_i32_1 : i32, i32, i32
  }
  func.func @transform_16(%arg0: i32, %arg1: memref<2x8xi32, #tpu.memory_space<smem>>, %arg2: memref<4x6xf32, #tpu.memory_space<smem>>) -> (i32, i32) {
    %c0_i32 = arith.constant 0 : i32
    %c0_i32_0 = arith.constant 0 : i32
    %c0_i32_1 = arith.constant 0 : i32
    return %c0_i32, %c0_i32_0 : i32, i32
  }
  func.func @transform_17(%arg0: i32, %arg1: memref<2x8xi32, #tpu.memory_space<smem>>, %arg2: memref<4x6xf32, #tpu.memory_space<smem>>) -> (i32, i32) {
    %c0_i32 = arith.constant 0 : i32
    %c0_i32_0 = arith.constant 0 : i32
    %c0_i32_1 = arith.constant 0 : i32
    return %c0_i32, %c0_i32_0 : i32, i32
  }
  func.func @transform_18(%arg0: i32, %arg1: memref<2x8xi32, #tpu.memory_space<smem>>, %arg2: memref<4x6xf32, #tpu.memory_space<smem>>) -> (i32, i32, i32) {
    %c0_i32 = arith.constant 0 : i32
    %c0_i32_0 = arith.constant 0 : i32
    %c0_i32_1 = arith.constant 0 : i32
    return %arg0, %c0_i32, %c0_i32_0 : i32, i32, i32
  }
}

</mosaic_0001>

<bundles_post_ra>
// kernel: forward.1
= control target key start
LH: loop header
LB: loop body
LE: loop exit
PB: predicated region body
PF: predicated region fallthrough
CT: control target
= control target key end

     0   :  { %s6285_s0 = inlined_call_operand.vmem [shape: s32[2,8], index: 0, kind: input, shape index: {}]   ;;  %s6286_s2 = inlined_call_operand.vmem [shape: s32[2,1,8], index: 2, kind: input, shape index: {}]   ;;  %s6287_s3 = inlined_call_operand.vmem [shape: s32[2,8,8], index: 3, kind: input, shape index: {}]   ;;  %s6288_s4 = inlined_call_operand.vmem [shape: f32[50,32], index: 4, kind: input, shape index: {}]   ;;  %s6289_s5 = inlined_call_operand.vmem [shape: f32[8,32], index: 5, kind: input, shape index: {}]   ;;  %s6290_s6 = inlined_call_operand.vmem [shape: f32[2,32,96], index: 6, kind: input, shape index: {}]   ;;  %s6291_s7 = inlined_call_operand.vmem [shape: f32[2,1,96], index: 7, kind: input, shape index: {}]   ;;  %s6292_s8 = inlined_call_operand.vmem [shape: f32[2,32,32], index: 8, kind: input, shape index: {}]   ;;  %s6293_s9 = inlined_call_operand.vmem [shape: f32[2,1,32], index: 9, kind: input, shape index: {}]   ;;  %s6294_s10 = inlined_call_operand.vmem [shape: f32[2,1,32], index: 10, kind: input, shape index: {}]   ;;  %s6295_s11 = inlined_call_operand.vmem [shape: f32[2,1,32], index: 11, kind: input, shape index: {}]   ;;  %s6296_s12 = inlined_call_operand.vmem [shape: f32[2,32,128], index: 12, kind: input, shape index: {}]   ;;  %s6297_s13 = inlined_call_operand.vmem [shape: f32[2,1,128], index: 13, kind: input, shape index: {}]   ;;  %s6298_s14 = inlined_call_operand.vmem [shape: f32[2,128,32], index: 14, kind: input, shape index: {}]   ;;  %s6299_s15 = inlined_call_operand.vmem [shape: f32[2,1,32], index: 15, kind: input, shape index: {}]   ;;  %s6300_s16 = inlined_call_operand.vmem [shape: f32[2,1,32], index: 16, kind: input, shape index: {}]   ;;  %s6301_s17 = inlined_call_operand.vmem [shape: f32[2,1,32], index: 17, kind: input, shape index: {}]   ;;  %s6302_s18 = inlined_call_operand.vmem [shape: f32[32,128], index: 18, kind: input, shape index: {}]   ;;  %s6303_s19 = inlined_call_operand.vmem [shape: f32[1,128], index: 19, kind: input, shape index: {}]   ;;  %s6304_s20 = inlined_call_operand.hbm [shape: f32[2,1,128], index: 20, kind: output, shape index: {}]   ;;  %s6305_s1 = inlined_call_operand.vmem [shape: f32[4,6], index: 1, kind: input, shape index: {}]  }
   0x1   :  { %6317 = sst [smem:[#allocation9_spill]] %s6285_s0  ;;  %s29_s25 = sshll.u32 %s6305_s1, 4  ;;  %s30_s25 = int_to_ptr.vmem [resolvable:$true] %s29_s25 }
   0x2   :  { %6318 = sst [smem:[#allocation10_spill]] %s6286_s2  ;;  %s6328_s23 = sld [smem:[#allocation9_spill]] }
   0x3   :  { %6319 = sst [smem:[#allocation11_spill]] %s6287_s3 }
   0x4   :  { %6320 = sst [smem:[#allocation12_spill]] %s6288_s4 }
   0x5   :  { %6321 = sst [smem:[#allocation13_spill]] %s6289_s5 }
   0x6   :  { %6322 = sst [smem:[#allocation14_spill]] %s6299_s15 }
   0x7   :  { %6323 = sst [smem:[#allocation15_spill]] %s6300_s16 }
   0x8   :  { %6324 = sst [smem:[#allocation16_spill]] %s6301_s17  ;;  %s25_s15 = sshll.u32 %s6328_s23, 4  ;;  %s26_s15 = int_to_ptr.vmem [resolvable:$true] %s25_s15 }
   0x9   :  { %6325 = sst [smem:[#allocation17_spill]] %s6302_s18  ;;  %s5015_s4 = scalar_lea.vmem %s26_s15, 32 }
   0xa   :  { %6326 = sst [smem:[#allocation18_spill]] %s6303_s19  ;;  %p5016_p0 = scmp.ne.s32.totalorder %s26_s15, %s5015_s4 }
   0xb   :  { %6327 = sst [smem:[#allocation19_spill]] %s6304_s20  ;;  %p5020_p1 = scmp.lt.s32.totalorder %s26_s15, %s26_s15 }
   0xc   :  { %p5021_p2 = scmp.lt.s32.totalorder %s5015_s4, %s5015_s4 }
   0xe   :  { %p5022_p3 = por %p5021_p2, %p5020_p1 }
  0x10   :  { %p5023_p4 = pnand %p5022_p3, %p5016_p0 }
  0x12   :  { %5026 = shalt.err (!%p5023_p4)  }
  0x13   :  { %s5065_s26 = smov [#allocation3]   ;;  %s5027_s27 = scalar_lea.vmem %s30_s25, 64 }
  0x14   :  { %28 = dma.vmem_to_smem %s26_s15, 32, %s5065_s26, [#allocation2] }
  0x15   :  { %p5028_p5 = scmp.ne.s32.totalorder %s30_s25, %s5027_s27  ;;  %p5032_p6 = scmp.lt.s32.totalorder %s30_s25, %s30_s25 }
  0x16   :  { %p5033_p7 = scmp.lt.s32.totalorder %s5027_s27, %s5027_s27 }
  0x18   :  { %p5034_p8 = por %p5033_p7, %p5032_p6 }
  0x1a   :  { %p5035_p9 = pnand %p5034_p8, %p5028_p5 }
  0x1c   :  { %5038 = shalt.err (!%p5035_p9)  }
  0x1d   :  { %s5066_s28 = smov [#allocation4]  }
  0x1e   :  { %32 = dma.vmem_to_smem %s30_s25, 64, %s5066_s28, [#allocation2] }
  0x1f   :  { %5061 = dma.done.wait [#allocation2], 96 }
  0x20   :  { %5062 = vsyncadd [#allocation2], 4294967200 }
  0x21   :  { %34 = sfence }
  0x22   :  { %v371_v0 = vld [vmem:[%s6290_s6] sm:$0xff]  ;;  %v372_v1 = vld [vmem:[%s6290_s6 + $0x8] sm:$0xff]  ;;  %v373_v2 = vld [vmem:[%s6290_s6 + $0x10] sm:$0xff]  ;;  %s74_s21 = sld [smem:[#allocation3]]  ;;  %s4199_s23 = sld [smem:[#allocation3 + $0x1]]  ;;  %vm204_vm0 = vcmask 1040384  }
  0x23   :  { %v4801_v3 = vpack.c.bf16 %v372_v1, %v371_v0  ;;  %v374_v4 = vld [vmem:[%s6290_s6 + $0x18] sm:$0xff]  ;;  %s5204_s24 = sld [smem:[#allocation3 + $0x2]]  ;;  %s5206_s3 = sld [smem:[#allocation3 + $0x3]]  ;;  %vm206_vm1 = vcmask 1041408   ;;  %vm208_vm2 = vcmask 1042432   ;;  %vm210_vm3 = vcmask 1043456  }
  0x24   :  { %v4805_v5 = vpack.c.bf16 %v374_v4, %v373_v2  ;;  %s5208_s25 = sld [smem:[#allocation3 + $0x4]]  ;;  %s5213_s28 = sld [smem:[#allocation3 + $0x5]] }
  0x25   :  { %4802 = vmatprep.subr.bf16.mxu1 %v4801_v3  ;;  %s6329_s27 = sld [smem:[#allocation13_spill]]  ;;  %s5221_s15 = sld [smem:[#allocation3 + $0x6]] }
  0x26   :  { %4804 = vmatpush3.bf16.msra.mxu1 %v4801_v3  ;;  %s5223_s0 = sld [smem:[#allocation3 + $0x7]]  ;;  %s6330_s4 = sld [smem:[#allocation12_spill]] }
  0x27   :  { %4806 = vmatprep.subr.bf16.mxu1 %v4805_v5  ;;  %s5238_s29 = sld [smem:[#allocation3 + $0x80]]  ;;  %s5248_s19 = sld [smem:[#allocation3 + $0x81]] }
  0x2a   :  { %4808 = vmatpush3.bf16.msra.mxu1 %v4805_v5 }
  0x2b   :  { %v83_v6 = vld [vmem:[%s6329_s27 + $0x1] sm:$0x1]  ;;  %v77_v7 = vld [vmem:[%s6329_s27] sm:$0x1]  ;;  %v89_v8 = vld [vmem:[%s6329_s27 + $0x2] sm:$0x1] }
  0x2c   :  { %s75_s26 = scalar_lea.vmem %s6330_s4, %s74_s21  ;;  %v5231_v9 = vld [vmem:[%s6329_s27 + $0x3] sm:$0x1]  ;;  %v5236_v10 = vld [vmem:[%s6329_s27 + $0x4] sm:$0x1]  ;;  %s81_s2 = scalar_lea.vmem %s6330_s4, %s4199_s23  ;;  %v5246_v12 = vld [vmem:[%s6329_s27 + $0x5] sm:$0x1] }
  0x2d   :  { %v76_v11 = vld [vmem:[%s75_s26] sm:$0x1]  ;;  %s87_s5 = scalar_lea.vmem %s6330_s4, %s5204_s24  ;;  %v5257_v14 = vld [vmem:[%s6329_s27 + $0x6] sm:$0x1]  ;;  %v5262_v15 = vld [vmem:[%s6329_s27 + $0x7] sm:$0x1]  ;;  %s93_s21 = scalar_lea.vmem %s6330_s4, %s5206_s3 }
  0x2e   :  { %v82_v13 = vld [vmem:[%s81_s2] sm:$0x1]  ;;  %s5264_s26 = sld [smem:[#allocation3 + $0x82]]  ;;  %s99_s20 = scalar_lea.vmem %s6330_s4, %s5208_s25 }
  0x2f   :  { %v84_v16 = vadd.f32 %v83_v6, %v82_v13  ;;  %v88_v17 = vld [vmem:[%s87_s5] sm:$0x1] }
  0x30   :  { %35 = vsyncpa [#allocation6], 0  ;;  %v78_v18 = vadd.f32 %v77_v7, %v76_v11  ;;  %v90_v19 = vadd.f32 %v89_v8, %v88_v17  ;;  %v94_v20 = vld [vmem:[%s93_s21] sm:$0x1]  ;;  %s105_s27 = scalar_lea.vmem %s6330_s4, %s5213_s28  ;;  %s5278_s3 = sld [smem:[#allocation3 + $0x83]]  ;;  %vm212_vm4 = vcmask 1044480  }
  0x31   :  { %v100_v21 = vld [vmem:[%s99_s20] sm:$0x1]  ;;  %v96_v22 = vadd.f32 %v5231_v9, %v94_v20  ;;  %s111_s5 = scalar_lea.vmem %s6330_s4, %s5221_s15  ;;  %s117_s30 = scalar_lea.vmem %s6330_s4, %s5223_s0  ;;  %v163_v25 = vrot.slane %v84_v16, 7  ;;  %vm214_vm5 = vcmask 1045504   ;;  %vm216_vm6 = vcmask 1046528  }
  0x32   :  { %v102_v23 = vadd.f32 %v5236_v10, %v100_v21  ;;  %v106_v24 = vld [vmem:[%s105_s27] sm:$0x1]  ;;  %s124_s21 = scalar_lea.vmem %s6330_s4, %s5238_s29  ;;  %s5295_s22 = sld [smem:[#allocation3 + $0x84]]  ;;  %v166_v32 = vrot.slane %v90_v19, 6  ;;  %vm382_vm7 = vcmask 261120   ;;  %vm5070_vm8 = vmmov 0  }
  0x33   :  { %v108_v26 = vadd.f32 %v5246_v12, %v106_v24  ;;  %v112_v27 = vld [vmem:[%s111_s5] sm:$0x1]  ;;  %s129_s24 = scalar_lea.vmem %s6330_s4, %s5248_s19  ;;  %s5303_s20 = sld [smem:[#allocation3 + $0x85]]  ;;  %v169_v33 = vrot.slane %v96_v22, 5  ;;  %v205_v37 = vsel %vm204_vm0, %v78_v18, %v163_v25  ;;  %vm480_vm9 = vcmask 64512  }
  0x34   :  { %v118_v28 = vld [vmem:[%s117_s30] sm:$0x1]  ;;  %v114_v29 = vadd.f32 %v5257_v14, %v112_v27  ;;  %s134_s29 = scalar_lea.vmem %s6330_s4, %s5264_s26  ;;  %s5309_s27 = sld [smem:[#allocation3 + $0x86]]  ;;  %v172_v35 = vrot.slane %v102_v23, 4  ;;  %v207_v42 = vsel %vm206_vm1, %v205_v37, %v166_v32 }
  0x35   :  { %v120_v30 = vadd.f32 %v5262_v15, %v118_v28  ;;  %v125_v31 = vld [vmem:[%s124_s21] sm:$0x1]  ;;  %v175_v36 = vrot.slane %v108_v26, 3  ;;  %s5312_s19 = sld [smem:[#allocation3 + $0x87]]  ;;  %v209_v45 = vsel %vm208_vm2, %v207_v42, %v169_v33  ;;  %s5068_s16 = smov 104  }
  0x36   :  { %v130_v34 = vld [vmem:[%s129_s24] sm:$0x1]  ;;  %v126_v38 = vadd.f32 %v125_v31, %v77_v7  ;;  %v178_v41 = vrot.slane %v114_v29, 2  ;;  %s139_s26 = scalar_lea.vmem %s6330_s4, %s5278_s3  ;;  %v211_v47 = vsel %vm210_vm3, %v209_v45, %v172_v35  ;;  %s5069_s17 = smov 120  }
  0x37   :  { %v131_v39 = vadd.f32 %v130_v34, %v83_v6  ;;  %v135_v40 = vld [vmem:[%s134_s29] sm:$0x1]  ;;  %v181_v44 = vrot.slane %v120_v30, 1  ;;  %v213_v50 = vsel %vm212_vm4, %v211_v47, %v175_v36  ;;  %s5071_s29 = smov 112   ;;  %s6331_s1 = sld [smem:[#allocation11_spill]] }
  0x38   :  { %v136_v43 = vadd.f32 %v135_v40, %v89_v8  ;;  %v140_v46 = vld [vmem:[%s139_s26] sm:$0x1]  ;;  %s144_s23 = scalar_lea.vmem %s6330_s4, %s5295_s22  ;;  %v215_v53 = vsel %vm214_vm5, %v213_v50, %v178_v41  ;;  %s5464_s26 = sld [smem:[#allocation4]] }
  0x39   :  { %v184_v48 = vrot.slane %v131_v39, 7  ;;  %v141_v49 = vadd.f32 %v140_v46, %v5231_v9  ;;  %v145_v52 = vld [vmem:[%s144_s23] sm:$0x1]  ;;  %s149_s28 = scalar_lea.vmem %s6330_s4, %s5303_s20  ;;  %v5339_v57 = vsel %vm216_vm6, %v215_v53, %v181_v44  ;;  %s5466_s5 = sld [smem:[#allocation4 + $0x1]] }
  0x3a   :  { %v187_v51 = vrot.slane %v136_v43, 6  ;;  %v146_v55 = vadd.f32 %v145_v52, %v5236_v10  ;;  %v150_v56 = vld [vmem:[%s149_s28] sm:$0x1]  ;;  %s154_s22 = scalar_lea.vmem %s6330_s4, %s5309_s27  ;;  %4502 = vmatprep.mubr.msk.f32.mxu1 %vm382_vm7, %v5339_v57  ;;  %s6315_s27 = smov 96  }
  0x3b   :  { %v218_v54 = vsel %vm204_vm0, %v126_v38, %v184_v48  ;;  %v190_v58 = vrot.slane %v141_v49, 5  ;;  %v151_v60 = vadd.f32 %v150_v56, %v5246_v12  ;;  %v155_v61 = vld [vmem:[%s154_s22] sm:$0x1]  ;;  %s159_s24 = scalar_lea.vmem %s6330_s4, %s5312_s19  ;;  %v5067_v12 = vmov 0.0   ;;  %s5470_s18 = sld [smem:[#allocation4 + $0x2]] }
  0x3c   :  { %v219_v59 = vsel %vm206_vm1, %v218_v54, %v187_v51  ;;  %v156_v62 = vadd.f32 %v155_v61, %v5257_v14  ;;  %v160_v63 = vld [vmem:[%s159_s24] sm:$0x1]  ;;  %v193_v0 = vrot.slane %v146_v55, 4  ;;  %4505 = vmatprep.subr.mxu1 %v5067_v12  ;;  %4525 = vmatprep.subr.mxu0 %v5067_v12  ;;  %s5474_s23 = sld [smem:[#allocation4 + $0x3]]  ;;  %s6332_s28 = sld [smem:[#allocation10_spill]]  ;;  %v284_v38 = vlaneseq }
  0x3d   :  { %v220_v1 = vsel %vm208_vm2, %v219_v59, %v190_v58  ;;  %v161_v2 = vadd.f32 %v160_v63, %v5262_v15  ;;  %v196_v3 = vrot.slane %v151_v60, 3  ;;  %v4237_v10 = vld [vmem:[%s6291_s7] ss:$0 sm:$0xff]  ;;  %4527 = vmatprep.mubr.msk.f32.mxu0 %vm5070_vm8, %v5067_v12  ;;  %s5485_s2 = sld [smem:[#allocation4 + $0x4]]  ;;  %s5493_s21 = sld [smem:[#allocation4 + $0x5]]  ;;  %v250_v60 = vld [vmem:[%s6331_s1 + $0x8] sm:$0xff] }
  0x3e   :  { %v199_v4 = vrot.slane %v156_v62, 2  ;;  %v221_v5 = vsel %vm210_vm3, %v220_v1, %v193_v0  ;;  %v249_v30 = vld [vmem:[%s6331_s1] sm:$0xff]  ;;  %v266_v33 = vstv %s5464_s26  ;;  %v5501_v44 = vshrl.u32 %v284_v38, 7  ;;  %s5532_s22 = sld [smem:[#allocation4 + $0x80]]  ;;  %s5537_s24 = sld [smem:[#allocation4 + $0x81]] }
  0x3f   :  { %v202_v6 = vrot.slane %v161_v2, 1  ;;  %v222_v7 = vsel %vm212_vm4, %v221_v5, %v196_v3  ;;  %vm251_vm10 = vcmp.gt.s32.totalorder %v249_v30, 0  ;;  %v269_v36 = vstv %s5466_s5  ;;  %s5539_s4 = sld [smem:[#allocation4 + $0x100]]  ;;  %s5541_s20 = sld [smem:[#allocation4 + $0x82]] }
  0x40   :  { %v223_v8 = vsel %vm214_vm5, %v222_v7, %v199_v4  ;;  %v252_v31 = vsel %vm251_vm10, %v249_v30, 0  ;;  %v286_v48 = vsub.s32 0, %v5501_v44  ;;  %vm253_vm3 = vcmp.gt.s32.totalorder %v250_v60, 0  ;;  %s5543_s19 = sld [smem:[#allocation4 + $0x101]]  ;;  %s5546_s25 = sld [smem:[#allocation4 + $0x180]] }
  0x41   :  { %v5356_v9 = vsel %vm216_vm6, %v223_v8, %v202_v6  ;;  %vm255_vm11 = vcmp.lt.s32.totalorder %v252_v31, 5  ;;  %v272_v40 = vstv %s5470_s18  ;;  %v254_v62 = vsel %vm253_vm3, %v250_v60, 0  ;;  %s5548_s3 = sld [smem:[#allocation4 + $0x83]]  ;;  %s5550_s1 = sld [smem:[#allocation4 + $0x102]] }
  0x42   :  { %4503 = vmatmul.mubr.msk.f32.vlgmr.msra.gmra.mrb[0].mxu1 %vm382_vm7, %v5356_v9  ;;  %v5468_v32 = vsel %vm255_vm11, %v252_v31, 5  ;;  %v259_v34 = vld [vmem:[%s6332_s28] sm:$0x1]  ;;  %v275_v43 = vstv %s5474_s23  ;;  %s5555_s30 = sld [smem:[#allocation4 + $0x181]]  ;;  %vm257_vm4 = vcmp.lt.s32.totalorder %v254_v62, 5  ;;  %s5557_s15 = sld [smem:[#allocation4 + $0x84]] }
  0x43   :  { %4507 = vmatprep.mubr.msk.f32.mxu1 %vm5070_vm8, %v5067_v12  ;;  %vm265_vm12 = vcmp.eq.s32.totalorder %v5468_v32, 0  ;;  %vm268_vm13 = vcmp.eq.s32.totalorder %v5468_v32, 1  ;;  %v261_v37 = vcvt.s32.f32 %v259_v34  ;;  %vm271_vm14 = vcmp.eq.s32.totalorder %v5468_v32, 2  ;;  %s5565_s0 = sld [smem:[#allocation4 + $0x182]]  ;;  %s5621_s26 = sld [smem:[#allocation4 + $0x185]] }
  0x44   :  { %v267_v35 = vsel %vm265_vm12, %v266_v33, 0.0  ;;  %vm274_vm15 = vcmp.eq.s32.totalorder %v5468_v32, 3  ;;  %vm277_vm1 = vcmp.eq.s32.totalorder %v5468_v32, 4  ;;  %v278_v46 = vstv %s5485_s2  ;;  %s5074_s5 = smov 8   ;;  %s6336_s18 = smov 96  }
  0x45   :  { %v270_v39 = vsel %vm268_vm13, %v269_v36, %v267_v35  ;;  %v263_v41 = vsub.f32 1.0, %v261_v37  ;;  %vm280_vm2 = vcmp.eq.s32.totalorder %v5468_v32, 5  ;;  %v281_v50 = vstv %s5493_s21 }
  0x46   :  { %v273_v42 = vsel %vm271_vm14, %v272_v40, %v270_v39  ;;  %v290_v61 = vstv %s5532_s22  ;;  %v292_v0 = vstv %s5537_s24  ;;  %v303_v1 = vstv %s5539_s4  ;;  %s5560_s22 = sld [smem:[#allocation4 + $0x103]]  ;;  %s5569_s24 = sld [smem:[#allocation4 + $0x85]] }
  0x47   :  { %v276_v45 = vsel %vm274_vm15, %v275_v43, %v273_v42  ;;  %v264_v47 = vmul.f32 -1e+09, %v263_v41  ;;  %v291_v63 = vsel %vm265_vm12, %v290_v61, 0.0  ;;  %v294_v3 = vstv %s5541_s20  ;;  %s5574_s4 = sld [smem:[#allocation4 + $0x104]]  ;;  %s5580_s20 = sld [smem:[#allocation4 + $0x183]] }
  0x48   :  { %v279_v49 = vsel %vm277_vm1, %v278_v46, %v276_v45  ;;  %v293_v2 = vsel %vm268_vm13, %v292_v0, %v291_v63  ;;  %v5567_v4 = vsel %vm257_vm4, %v254_v62, 5  ;;  %v304_v5 = vsel %vm265_vm12, %v303_v1, 0.0 }
  0x49   :  { %v5518_v51 = vrot.slane %v264_v47, %v286_v48  ;;  %v282_v52 = vsel %vm280_vm2, %v281_v50, %v279_v49  ;;  %v305_v6 = vstv %s5543_s19  ;;  %v316_v7 = vstv %s5546_s25  ;;  %s6335_s19 = sld [smem:[#allocation16_spill]] }
  0x4a   :  { %v295_v8 = vsel %vm271_vm14, %v294_v3, %v293_v2  ;;  %vm331_vm5 = vcmp.eq.s32.totalorder %v5567_v4, 0  ;;  %vm333_vm6 = vcmp.eq.s32.totalorder %v5567_v4, 1  ;;  %v320_v31 = vstv %s5565_s0  ;;  %s5076_s0 = smov 24  }
  0x4b   :  { %v5525_v53 = vadd.f32 %v5518_v51, %v282_v52  ;;  %vm335_vm10 = vcmp.eq.s32.totalorder %v5567_v4, 2  ;;  %v350_v41 = vsel %vm331_vm5, %v290_v61, 0.0  ;;  %v357_v42 = vsel %vm331_vm5, %v303_v1, 0.0 }
  0x4c   :  { %v300_v37 = vstv %s5569_s24  ;;  %vm337_vm11 = vcmp.eq.s32.totalorder %v5567_v4, 3  ;;  %v364_v61 = vsel %vm331_vm5, %v316_v7, 0.0 }
  0x4d   :  { %v311_v39 = vstv %s5574_s4  ;;  %v322_v45 = vstv %s5580_s20  ;;  %s6334_s4 = sld [smem:[#allocation15_spill]] }
 0x115   :  { %v4504_v11 = vpop.f32.mrb[0].mxu1 }
 0x116   :  { %v455_v13 = vpop.f32.mrb[1].mxu1  ;;  %v5375_v15 = vadd.f32 %v4504_v11, %v4237_v10  ;;  %v306_v11 = vsel %vm268_vm13, %v305_v6, %v304_v5 }
 0x117   :  { %v5365_v14 = vadd.f32 %v4237_v10, %v455_v13  ;;  %v296_v10 = vstv %s5548_s3  ;;  %v307_v13 = vstv %s5550_s1  ;;  %s5595_s3 = sld [smem:[#allocation4 + $0x105]] }
 0x119   :  { %469 = vrot.lane.b32.xlu1 %v5365_v14, %s5068_s16  ;;  %465 = vrot.lane.b32.xlu0 %v5365_v14, %s5069_s17 }
 0x11d   :  { %472 = vrot.lane.b32.xlu1 %v5375_v15, %s5069_s17  ;;  %467 = vrot.lane.b32.xlu0 %v5365_v14, %s5071_s29 }
 0x121   :  { %476 = vrot.lane.b32.xlu1 %v5375_v15, %s5068_s16  ;;  %474 = vrot.lane.b32.xlu0 %v5375_v15, %s5071_s29 }
 0x125   :  { %478 = vrot.lane.b32.xlu0 %v5365_v14, %s6315_s27 }
 0x18b   :  { %v5387_v16 = vpop.permute.xlu1 %469  ;;  %v5389_v17 = vpop.permute.xlu0 %465 }
 0x18c   :  { %555 = vrot.lane.b32.xlu1 %v5389_v17, %s6315_s27 }
 0x18f   :  { %v5393_v18 = vpop.permute.xlu0 %467  ;;  %v5399_v19 = vpop.permute.xlu1 %472 }
 0x190   :  { %707 = vrot.lane.b32.xlu1 %v5387_v16, %s6315_s27  ;;  %631 = vrot.lane.b32.xlu0 %v5393_v18, %s6315_s27 }
 0x193   :  { %v5401_v20 = vpop.permute.xlu0 %474  ;;  %v5407_v21 = vpop.permute.xlu1 %476 }
 0x194   :  { %859 = vrot.lane.b32.xlu1 %v5399_v19, %s6315_s27  ;;  %783 = vrot.lane.b32.xlu0 %v5375_v15, %s6315_s27 }
 0x197   :  { %v479_v22 = vpop.permute.xlu0 %478 }
 0x198   :  { %1011 = vrot.lane.b32.xlu1 %v5407_v21, %s6315_s27  ;;  %935 = vrot.lane.b32.xlu0 %v5401_v20, %s6315_s27  ;;  %s5597_s27 = sld [smem:[#allocation4 + $0x184]] }
 0x199   :  { %4506 = vmatpush3.xpose.msk.msra.mxu1 %vm480_vm9, %v479_v22  ;;  %v317_v22 = vsel %vm265_vm12, %v316_v7, 0.0  ;;  %vm339_vm12 = vcmp.eq.s32.totalorder %v5567_v4, 4 }
 0x19a   :  { %4510 = vmatprep.subr.mxu1 %v5067_v12 }
 0x19c   :  { %4508 = vmatmul.mubr.msk.f32.vlgmr.msra.gmra.mrb[2].mxu1 %vm480_vm9, %v5365_v14 }
 0x19d   :  { %4512 = vmatprep.mubr.msk.f32.mxu1 %vm5070_vm8, %v5067_v12 }
 0x1fe   :  { %v556_v23 = vpop.permute.xlu1 %555 }
 0x1ff   :  { %4511 = vmatpush3.xpose.msk.msra.mxu1 %vm480_vm9, %v556_v23  ;;  %v318_v23 = vstv %s5555_s30 }
 0x200   :  { %4515 = vmatprep.subr.mxu1 %v5067_v12  ;;  %v319_v30 = vsel %vm268_vm13, %v318_v23, %v317_v22  ;;  %v365_v7 = vsel %vm333_vm6, %v318_v23, %v364_v61  ;;  %v326_v22 = vstv %s5621_s26  ;;  %vm341_vm13 = vcmp.eq.s32.totalorder %v5567_v4, 5 }
 0x202   :  { %v708_v24 = vpop.permute.xlu1 %707  ;;  %4513 = vmatmul.mubr.msk.f32.vlgmr.msra.gmra.mrb[4].mxu1 %vm480_vm9, %v5389_v17  ;;  %v632_v25 = vpop.permute.xlu0 %631 }
 0x203   :  { %4516 = vmatpush3.xpose.msk.msra.mxu1 %vm480_vm9, %v632_v25  ;;  %4517 = vmatprep.mubr.msk.f32.mxu1 %vm5070_vm8, %v5067_v12  ;;  %v297_v25 = vsel %vm274_vm15, %v296_v10, %v295_v8 }
 0x204   :  { %4520 = vmatprep.subr.mxu1 %v5067_v12 }
 0x206   :  { %4518 = vmatmul.mubr.msk.f32.vlgmr.msra.gmra.mrb[6].mxu1 %vm480_vm9, %v5393_v18  ;;  %v784_v26 = vpop.permute.xlu0 %783  ;;  %v860_v27 = vpop.permute.xlu1 %859 }
 0x207   :  { %4521 = vmatpush3.xpose.msk.msra.mxu1 %vm480_vm9, %v708_v24  ;;  %4526 = vmatpush3.xpose.msk.msra.mxu0 %vm480_vm9, %v784_v26  ;;  %v260_v24 = vld [vmem:[%s6332_s28 + $0x1] sm:$0x1]  ;;  %v298_v26 = vstv %s5557_s15 }
 0x208   :  { %4522 = vmatprep.mubr.msk.f32.mxu1 %vm5070_vm8, %v5067_v12  ;;  %4530 = vmatprep.subr.mxu1 %v5067_v12  ;;  %v262_v34 = vcvt.s32.f32 %v260_v24  ;;  %v299_v35 = vsel %vm277_vm1, %v298_v26, %v297_v25 }
 0x209   :  { %4535 = vmatprep.subr.mxu0 %v5067_v12  ;;  %v301_v52 = vsel %vm280_vm2, %v300_v37, %v299_v35 }
 0x20a   :  { %4523 = vmatmul.mubr.msk.f32.vlgmr.msra.gmra.mrb[8].mxu1 %vm480_vm9, %v5387_v16  ;;  %4528 = vmatmul.mubr.msk.f32.vlgmr.msra.gmra.mrb[0].mxu0 %vm480_vm9, %v5375_v15  ;;  %v936_v28 = vpop.permute.xlu0 %935  ;;  %v1012_v29 = vpop.permute.xlu1 %1011  ;;  %v329_v47 = vsub.f32 1.0, %v262_v34  ;;  %v5655_v63 = vadd.f32 %v301_v52, %v5518_v51 }
 0x20b   :  { %4531 = vmatpush3.xpose.msk.msra.mxu1 %vm480_vm9, %v860_v27  ;;  %4536 = vmatpush3.xpose.msk.msra.mxu0 %vm480_vm9, %v936_v28  ;;  %v332_v27 = vsel %vm331_vm5, %v266_v33, 0.0  ;;  %v308_v28 = vsel %vm271_vm14, %v307_v13, %v306_v11 }
 0x20c   :  { %4532 = vmatprep.mubr.msk.f32.mxu1 %vm5070_vm8, %v5067_v12  ;;  %4537 = vmatprep.mubr.msk.f32.mxu0 %vm5070_vm8, %v5067_v12  ;;  %v334_v33 = vsel %vm333_vm6, %v269_v36, %v332_v27  ;;  %v321_v36 = vsel %vm271_vm14, %v320_v31, %v319_v30  ;;  %vm1812_vm14 = vcmask 130048  }
 0x20d   :  { %4540 = vmatprep.subr.mxu1 %v5067_v12  ;;  %4545 = vmatprep.subr.mxu0 %v5067_v12  ;;  %v336_v49 = vsel %vm335_vm10, %v272_v40, %v334_v33  ;;  %v323_v60 = vsel %vm274_vm15, %v322_v45, %v321_v36  ;;  %v324_v40 = vstv %s5597_s27  ;;  %s5073_s27 = smov 64  }
 0x20e   :  { %4533 = vmatmul.mubr.msk.f32.vlgmr.msra.gmra.mrb[10].mxu1 %vm480_vm9, %v5399_v19  ;;  %4538 = vmatmul.mubr.msk.f32.vlgmr.msra.gmra.mrb[2].mxu0 %vm480_vm9, %v5401_v20  ;;  %v338_v62 = vsel %vm337_vm11, %v275_v43, %v336_v49  ;;  %v325_v43 = vsel %vm277_vm1, %v324_v40, %v323_v60 }
 0x20f   :  { %4541 = vmatpush3.xpose.msk.msra.mxu1 %vm480_vm9, %v1012_v29  ;;  %4542 = vmatprep.mubr.msk.f32.mxu1 %vm5070_vm8, %v5067_v12  ;;  %v309_v29 = vstv %s5560_s22  ;;  %v327_v30 = vsel %vm280_vm2, %v326_v22, %v325_v43  ;;  %s5075_s22 = smov 16  }
 0x210   :  { %4550 = vmatprep.subr.mxu1 %v5067_v12  ;;  %4547 = vmatprep.mubr.msk.f32.mxu0 %vm5070_vm8, %v5067_v12  ;;  %v310_v38 = vsel %vm274_vm15, %v309_v29, %v308_v28  ;;  %vm1814_vm15 = vcmask 195584  }
 0x212   :  { %4543 = vmatmul.mubr.msk.f32.vlgmr.msra.gmra.mrb[12].mxu1 %vm480_vm9, %v5407_v21 }
 0x213   :  { %4552 = vmatprep.mubr.msk.f32.mxu1 %vm5070_vm8, %v5067_v12 }
 0x26f   :  { %v551_v54 = vpop.f32.mrb[2].mxu1 }
 0x270   :  { %v1087_v55 = vmul.f32 0.35355338, %v551_v54  ;;  %v4509_v56 = vpop.f32.mrb[3].mxu1  ;;  %v312_v54 = vsel %vm277_vm1, %v311_v39, %v310_v38 }
 0x271   :  { %v358_v56 = vsel %vm333_vm6, %v305_v6, %v357_v42 }
 0x272   :  { %v5528_v58 = vadd.f32 %v1087_v55, %v5525_v53  ;;  %v351_v55 = vsel %vm333_vm6, %v292_v0, %v350_v41  ;;  %v330_v0 = vmul.f32 -1e+09, %v329_v47  ;;  %v359_v2 = vsel %vm335_vm10, %v307_v13, %v358_v56 }
 0x273   :  { %v352_v1 = vsel %vm335_vm10, %v294_v3, %v351_v55  ;;  %v340_v3 = vsel %vm339_vm12, %v278_v46, %v338_v62  ;;  %v360_v24 = vsel %vm337_vm11, %v309_v29, %v359_v2  ;;  %v366_v46 = vsel %vm335_vm10, %v320_v31, %v365_v7 }
 0x274   :  { %v1103_v59 = vsel %vm480_vm9, %v5528_v58, -inf  ;;  %v353_v13 = vsel %vm337_vm11, %v296_v10, %v352_v1  ;;  %v347_v27 = vrot.slane %v330_v0, %v286_v48  ;;  %v342_v10 = vsel %vm341_vm13, %v281_v50, %v340_v3 }
 0x275   :  { %1104 = vmax.xlane.f32.xlu0 %v1103_v59  ;;  %v313_v59 = vstv %s5595_s3  ;;  %v354_v33 = vsel %vm339_vm12, %v298_v26, %v353_v13  ;;  %v361_v48 = vsel %vm339_vm12, %v311_v39, %v360_v24  ;;  %v367_v32 = vsel %vm337_vm11, %v322_v45, %v366_v46  ;;  %s6333_s3 = sld [smem:[#allocation14_spill]] }
 0x276   :  { %v314_v6 = vsel %vm280_vm2, %v313_v59, %v312_v54  ;;  %v5705_v50 = vadd.f32 %v327_v30, %v5518_v51  ;;  %v5707_v38 = vadd.f32 %v347_v27, %v342_v10  ;;  %v355_v26 = vsel %vm341_vm13, %v300_v37, %v354_v33 }
 0x277   :  { %v5681_v23 = vadd.f32 %v314_v6, %v5518_v51  ;;  %v362_v39 = vsel %vm341_vm13, %v313_v59, %v361_v48  ;;  %v368_v52 = vsel %vm339_vm12, %v324_v40, %v367_v32  ;;  %v5719_v56 = vadd.f32 %v355_v26, %v347_v27 }
 0x278   :  { %v5721_v37 = vadd.f32 %v362_v39, %v347_v27  ;;  %v369_v61 = vsel %vm341_vm13, %v326_v22, %v368_v52 }
 0x279   :  { %v5729_v7 = vadd.f32 %v369_v61, %v347_v27 }
 0x2d5   :  { %v627_v5 = vpop.f32.mrb[4].mxu1 }
 0x2d6   :  { %v1088_v8 = vmul.f32 0.35355338, %v627_v5  ;;  %v4514_v11 = vpop.f32.mrb[5].mxu1 }
 0x2d8   :  { %v5678_v25 = vadd.f32 %v1088_v8, %v5655_v63 }
 0x2d9   :  { %v703_v28 = vpop.f32.mrb[6].mxu1 }
 0x2da   :  { %v1089_v29 = vmul.f32 0.35355338, %v703_v28  ;;  %v4519_v34 = vpop.f32.mrb[7].mxu1  ;;  %v1106_v35 = vsel %vm480_vm9, %v5678_v25, -inf }
 0x2db   :  { %1107 = vmax.xlane.f32.xlu1 %v1106_v35 }
 0x2dc   :  { %v5702_v31 = vadd.f32 %v1089_v29, %v5681_v23 }
 0x2dd   :  { %v779_v41 = vpop.f32.mrb[8].mxu1  ;;  %v855_v42 = vpop.f32.mrb[0].mxu0 }
 0x2de   :  { %v1090_v36 = vmul.f32 0.35355338, %v779_v41  ;;  %v1091_v47 = vmul.f32 0.35355338, %v855_v42  ;;  %v4524_v49 = vpop.f32.mrb[9].mxu1  ;;  %v4529_v45 = vpop.f32.mrb[1].mxu0 }
 0x2df   :  { %v1109_v51 = vsel %vm480_vm9, %v5702_v31, -inf }
 0x2e0   :  { %1110 = vmax.xlane.f32.xlu0 %v1109_v51  ;;  %v1098_v54 = vadd.f32 %v1090_v36, %v5705_v50  ;;  %v1099_v55 = vadd.f32 %v1091_v47, %v5707_v38 }
 0x2e1   :  { %v931_v59 = vpop.f32.mrb[10].mxu1  ;;  %v1007_v60 = vpop.f32.mrb[2].mxu0 }
 0x2e2   :  { %v1092_v62 = vmul.f32 0.35355338, %v931_v59  ;;  %v1093_v0 = vmul.f32 0.35355338, %v1007_v60  ;;  %v4534_v40 = vpop.f32.mrb[11].mxu1  ;;  %v4539_v1 = vpop.f32.mrb[3].mxu0 }
 0x2e3   :  { %v1112_v2 = vsel %vm480_vm9, %v1098_v54, -inf  ;;  %v1115_v5 = vsel %vm480_vm9, %v1099_v55, -inf }
 0x2e4   :  { %1113 = vmax.xlane.f32.xlu0 %v1112_v2  ;;  %1116 = vmax.xlane.f32.xlu1 %v1115_v5  ;;  %v1100_v6 = vadd.f32 %v1092_v62, %v5719_v56  ;;  %v1101_v43 = vadd.f32 %v1093_v0, %v5721_v37 }
 0x2e5   :  { %v1083_v8 = vpop.f32.mrb[12].mxu1 }
 0x2e6   :  { %v1094_v11 = vmul.f32 0.35355338, %v1083_v8  ;;  %v4544_v4 = vpop.f32.mrb[13].mxu1  ;;  %v1118_v22 = vsel %vm480_vm9, %v1100_v6, -inf  ;;  %v1121_v3 = vsel %vm480_vm9, %v1101_v43, -inf }
 0x2e8   :  { %1119 = vmax.xlane.f32.xlu0 %v1118_v22  ;;  %1122 = vmax.xlane.f32.xlu1 %v1121_v3  ;;  %v1102_v13 = vadd.f32 %v1094_v11, %v5729_v7 }
 0x2ea   :  { %v1124_v24 = vsel %vm480_vm9, %v1102_v13, -inf }
 0x2ec   :  { %1125 = vmax.xlane.f32.xlu0 %v1124_v24 }
 0x2f9   :  { %1191 = vrot.lane.b32.xlu1 %v5365_v14, %s5073_s27 }
 0x2fd   :  { %1343 = vrot.lane.b32.xlu1 %v5393_v18, %s5073_s27 }
 0x301   :  { %1419 = vrot.lane.b32.xlu1 %v5387_v16, %s5073_s27 }
 0x302   :  { %1267 = vrot.lane.b32.xlu0 %v5389_v17, %s5073_s27  ;;  %v1105_v46 = vpop.xlane.xlu0 %1104 }
 0x303   :  { %v1127_v30 = vsub.f32 %v5528_v58, %v1105_v46 }
 0x305   :  { %1571 = vrot.lane.b32.xlu1 %v5399_v19, %s5073_s27  ;;  %v1135_v10 = vmul.f32 1.442695, %v1127_v30 }
 0x306   :  { %1495 = vrot.lane.b32.xlu0 %v5375_v15, %s5073_s27 }
 0x368   :  { %v1108_v27 = vpop.xlane.xlu1 %1107 }
 0x369   :  { %v1128_v28 = vsub.f32 %v5678_v25, %v1108_v27 }
 0x36b   :  { %v1137_v14 = vmul.f32 1.442695, %v1128_v28 }
 0x36d   :  { %4935 = vpow2.f32 %v1137_v14  ;;  %v1111_v18 = vpop.xlane.xlu0 %1110 }
 0x36e   :  { %4937 = vpow2.f32 %v1135_v10  ;;  %v1129_v25 = vsub.f32 %v5702_v31, %v1111_v18 }
 0x370   :  { %v1139_v49 = vmul.f32 1.442695, %v1129_v25 }
 0x371   :  { %v1117_v16 = vpop.xlane.xlu1 %1116  ;;  %v1114_v29 = vpop.xlane.xlu0 %1113 }
 0x372   :  { %v1131_v34 = vsub.f32 %v1099_v55, %v1117_v16  ;;  %v1130_v17 = vsub.f32 %v1098_v54, %v1114_v29 }
 0x374   :  { %v1143_v35 = vmul.f32 1.442695, %v1131_v34  ;;  %v1141_v33 = vmul.f32 1.442695, %v1130_v17 }
 0x375   :  { %v1123_v19 = vpop.xlane.xlu1 %1122  ;;  %v1120_v48 = vpop.xlane.xlu0 %1119 }
 0x376   :  { %4939 = vpow2.f32 %v1143_v35  ;;  %v1133_v15 = vsub.f32 %v1101_v43, %v1123_v19  ;;  %v1132_v32 = vsub.f32 %v1100_v6, %v1120_v48 }
 0x377   :  { %v4936_v41 = vpop.eup %4935  ;;  %4941 = vpow2.f32 %v1141_v33 }
 0x378   :  { %v1147_v58 = vmul.f32 1.442695, %v1133_v15  ;;  %v1145_v42 = vmul.f32 1.442695, %v1132_v32  ;;  %v1154_v26 = vsel %vm480_vm9, %v4936_v41, 0.0  ;;  %v4938_v51 = vpop.eup %4937 }
 0x379   :  { %v1192_v39 = vpop.permute.xlu1 %1191  ;;  %v1126_v36 = vpop.xlane.xlu0 %1125  ;;  %1155 = vadd.xlane.f32.xlu0 %v1154_v26  ;;  %v1151_v61 = vsel %vm480_vm9, %v4938_v51, 0.0 }
 0x37a   :  { %v1134_v47 = vsub.f32 %v1102_v13, %v1126_v36  ;;  %4546 = vmatpush3.msra.mxu0 %v1192_v39  ;;  %4943 = vpow2.f32 %v1145_v42  ;;  %v1831_v39 = vld [vmem:[%s6292_s8] sm:$0xff]  ;;  %v1832_v36 = vld [vmem:[%s6292_s8 + $0x8] sm:$0xff] }
 0x37b   :  { %4555 = vmatprep.subr.mxu0 %v5067_v12  ;;  %4945 = vpow2.f32 %v1147_v58 }
 0x37c   :  { %v1149_v45 = vmul.f32 1.442695, %v1134_v47 }
 0x37d   :  { %v1268_v52 = vpop.permute.xlu0 %1267  ;;  %v1344_v43 = vpop.permute.xlu1 %1343 }
 0x37e   :  { %4947 = vpow2.f32 %v1149_v45  ;;  %4551 = vmatpush3.msra.mxu1 %v1268_v52 }
 0x37f   :  { %4560 = vmatprep.subr.mxu1 %v5067_v12  ;;  %4949 = vpow2.f32 %v1139_v49  ;;  %v4809_v49 = vpack.c.bf16 %v1832_v36, %v1831_v39  ;;  %v1972_v39 = vld [vmem:[%s6296_s12 + $0x10] sm:$0xff]  ;;  %v1973_v36 = vld [vmem:[%s6296_s12 + $0x18] sm:$0xff] }
 0x380   :  { %v5753_v31 = vpop.eup %4939 }
 0x381   :  { %v4942_v54 = vpop.eup %4941  ;;  %v1163_v55 = vsel %vm480_vm9, %v5753_v31, 0.0  ;;  %v1496_v8 = vpop.permute.xlu0 %1495 }
 0x382   :  { %1164 = vadd.xlane.f32.xlu1 %v1163_v55  ;;  %v1160_v59 = vsel %vm480_vm9, %v4942_v54, 0.0  ;;  %v1420_v11 = vpop.permute.xlu1 %1419  ;;  %v1834_v55 = vld [vmem:[%s6292_s8 + $0x18] sm:$0xff] }
 0x383   :  { %1161 = vadd.xlane.f32.xlu0 %v1160_v59 }
 0x384   :  { %v4944_v60 = vpop.eup %4943 }
 0x385   :  { %v5759_v62 = vpop.eup %4945  ;;  %v1166_v0 = vsel %vm480_vm9, %v4944_v60, 0.0 }
 0x386   :  { %1152 = vadd.xlane.f32.xlu1 %v1151_v61  ;;  %v1169_v1 = vsel %vm480_vm9, %v5759_v62, 0.0  ;;  %v1572_v22 = vpop.permute.xlu1 %1571 }
 0x387   :  { %1167 = vadd.xlane.f32.xlu0 %v1166_v0 }
 0x388   :  { %v4948_v40 = vpop.eup %4947 }
 0x389   :  { %v1172_v2 = vsel %vm480_vm9, %v4948_v40, 0.0  ;;  %v4950_v5 = vpop.eup %4949 }
 0x38a   :  { %1170 = vadd.xlane.f32.xlu1 %v1169_v1  ;;  %v1157_v6 = vsel %vm480_vm9, %v4950_v5, 0.0 }
 0x38b   :  { %1173 = vadd.xlane.f32.xlu0 %v1172_v2 }
 0x38e   :  { %1158 = vadd.xlane.f32.xlu1 %v1157_v6 }
 0x39f   :  { %1723 = vrot.lane.b32.xlu1 %v5407_v21, %s5073_s27 }
 0x3a1   :  { %1647 = vrot.lane.b32.xlu0 %v5401_v20, %s5073_s27 }
 0x406   :  { %v1156_v4 = vpop.xlane.xlu0 %1155 }
 0x407   :  { %4951 = vrcp.f32 %v1156_v4 }
 0x40f   :  { %v1165_v3 = vpop.xlane.xlu1 %1164 }
 0x410   :  { %v1162_v13 = vpop.xlane.xlu0 %1161 }
 0x411   :  { %v4952_v24 = vpop.eup %4951  ;;  %4953 = vrcp.f32 %v1162_v13 }
 0x412   :  { %v1178_v27 = vmul.f32 %v4952_v24, %v4936_v41 }
 0x413   :  { %v1153_v46 = vpop.xlane.xlu1 %1152 }
 0x414   :  { %4955 = vrcp.f32 %v1153_v46  ;;  %v1168_v28 = vpop.xlane.xlu0 %1167  ;;  %4553 = vmatmul.mubr.msk.f32.vlgmr.msra.gmra.mrb[14].mxu1 %vm480_vm9, %v1178_v27 }
 0x415   :  { %4957 = vrcp.f32 %v1168_v28  ;;  %4561 = vmatpush3.msra.mxu1 %v1420_v11  ;;  %4562 = vmatprep.mubr.msk.f32.mxu1 %vm5070_vm8, %v5067_v12 }
 0x416   :  { %4570 = vmatprep.subr.mxu1 %v5067_v12 }
 0x417   :  { %v1171_v20 = vpop.xlane.xlu1 %1170 }
 0x418   :  { %v1174_v21 = vpop.xlane.xlu0 %1173 }
 0x419   :  { %4959 = vrcp.f32 %v1174_v21  ;;  %v4264_v21 = vld [vmem:[%s6293_s9] ss:$0 sm:$0xff] }
 0x41b   :  { %v4954_v14 = vpop.eup %4953  ;;  %v1159_v30 = vpop.xlane.xlu1 %1158 }
 0x41c   :  { %v1182_v18 = vmul.f32 %v4954_v14, %v4942_v54  ;;  %4961 = vrcp.f32 %v1159_v30  ;;  %v1648_v25 = vpop.permute.xlu0 %1647  ;;  %v1833_v54 = vld [vmem:[%s6292_s8 + $0x10] sm:$0xff] }
 0x41d   :  { %4963 = vrcp.f32 %v1165_v3 }
 0x41e   :  { %v4956_v10 = vpop.eup %4955  ;;  %4563 = vmatmul.mubr.msk.f32.vlgmr.msra.gmra.mrb[16].mxu1 %vm480_vm9, %v1182_v18  ;;  %4965 = vrcp.f32 %v1171_v20 }
 0x41f   :  { %v4958_v16 = vpop.eup %4957  ;;  %v1176_v29 = vmul.f32 %v4956_v10, %v4938_v51  ;;  %4571 = vmatpush3.msra.mxu1 %v1572_v22  ;;  %4572 = vmatprep.mubr.msk.f32.mxu1 %vm5070_vm8, %v5067_v12  ;;  %v1724_v17 = vpop.permute.xlu1 %1723 }
 0x420   :  { %v1186_v34 = vmul.f32 %v4958_v16, %v4944_v60  ;;  %4580 = vmatprep.subr.mxu1 %v5067_v12  ;;  %v4813_v60 = vpack.c.bf16 %v1834_v55, %v1833_v54  ;;  %v2068_v55 = vld [vmem:[%s6298_s14 + $0x20] sm:$0xff] }
 0x421   :  { %4548 = vmatmul.mubr.msk.f32.vlgmr.msra.gmra.mrb[4].mxu0 %vm480_vm9, %v1176_v29 }
 0x422   :  { %4556 = vmatpush3.msra.mxu0 %v1344_v43  ;;  %4573 = vmatmul.mubr.msk.f32.vlgmr.msra.gmra.mrb[18].mxu1 %vm480_vm9, %v1186_v34 }
 0x423   :  { %v4960_v35 = vpop.eup %4959  ;;  %4581 = vmatpush3.msra.mxu1 %v1724_v17  ;;  %4582 = vmatprep.mubr.msk.f32.mxu1 %vm5070_vm8, %v5067_v12 }
 0x424   :  { %v1190_v33 = vmul.f32 %v4960_v35, %v4948_v40  ;;  %4557 = vmatprep.mubr.msk.f32.mxu0 %vm5070_vm8, %v5067_v12  ;;  %4565 = vmatprep.subr.mxu0 %v5067_v12 }
 0x426   :  { %v4962_v19 = vpop.eup %4961  ;;  %4583 = vmatmul.mubr.msk.f32.vlgmr.msra.gmra.mrb[20].mxu1 %vm480_vm9, %v1190_v33 }
 0x427   :  { %v1180_v48 = vmul.f32 %v4962_v19, %v4950_v5  ;;  %v4964_v15 = vpop.eup %4963 }
 0x428   :  { %v1184_v32 = vmul.f32 %v4964_v15, %v5753_v31  ;;  %v4966_v41 = vpop.eup %4965 }
 0x429   :  { %4558 = vmatmul.mubr.msk.f32.vlgmr.msra.gmra.mrb[6].mxu0 %vm480_vm9, %v1180_v48  ;;  %v1188_v58 = vmul.f32 %v4966_v41, %v5759_v62 }
 0x42a   :  { %4566 = vmatpush3.msra.mxu0 %v1496_v8  ;;  %4567 = vmatprep.mubr.msk.f32.mxu0 %vm5070_vm8, %v5067_v12 }
 0x42b   :  { %4575 = vmatprep.subr.mxu0 %v5067_v12 }
 0x42d   :  { %4568 = vmatmul.mubr.msk.f32.vlgmr.msra.gmra.mrb[8].mxu0 %vm480_vm9, %v1184_v32 }
 0x42e   :  { %4576 = vmatpush3.msra.mxu0 %v1648_v25  ;;  %4577 = vmatprep.mubr.msk.f32.mxu0 %vm5070_vm8, %v5067_v12 }
 0x42f   :  { %4810 = vmatprep.subr.bf16.mxu0 %v4809_v49 }
 0x431   :  { %4578 = vmatmul.mubr.msk.f32.vlgmr.msra.gmra.mrb[10].mxu0 %vm480_vm9, %v1188_v58  ;;  %v1970_v58 = vld [vmem:[%s6296_s12] sm:$0xff] }
 0x432   :  { %4812 = vmatpush3.bf16.msra.mxu0 %v4809_v49  ;;  %v2064_v49 = vld [vmem:[%s6298_s14] sm:$0xff] }
 0x433   :  { %4814 = vmatprep.subr.bf16.mxu0 %v4813_v60 }
 0x436   :  { %4816 = vmatpush3.bf16.msra.mxu0 %v4813_v60 }
 0x4e7   :  { %v1339_v42 = vpop.f32.mrb[14].mxu1 }
 0x4e8   :  { %1800 = vrot.lane.b32.xlu0 %v1339_v42, %s5074_s5  ;;  %v4554_v26 = vpop.f32.mrb[15].mxu1  ;;  %v1971_v42 = vld [vmem:[%s6296_s12 + $0x8] sm:$0xff] }
 0x4e9   :  { %v4817_v26 = vpack.c.bf16 %v1971_v42, %v1970_v58 }
 0x4eb   :  { %4818 = vmatprep.subr.bf16.mxu1 %v4817_v26 }
 0x4ec   :  { %4820 = vmatpush3.bf16.msra.mxu1 %v4817_v26 }
 0x4f1   :  { %v1491_v47 = vpop.f32.mrb[16].mxu1 }
 0x4f2   :  { %v4564_v45 = vpop.f32.mrb[17].mxu1 }
 0x4f3   :  { %v2065_v45 = vld [vmem:[%s6298_s14 + $0x8] sm:$0xff] }
 0x4f4   :  { %v1263_v52 = vpop.f32.mrb[4].mxu0 }
 0x4f5   :  { %v1643_v51 = vpop.f32.mrb[18].mxu1  ;;  %v4549_v31 = vpop.f32.mrb[5].mxu0 }
 0x4f6   :  { %1817 = vrot.lane.b32.xlu0 %v1643_v51, %s5074_s5  ;;  %v4574_v59 = vpop.f32.mrb[19].mxu1  ;;  %v4825_v51 = vpack.c.bf16 %v2065_v45, %v2064_v49  ;;  %v2067_v31 = vld [vmem:[%s6298_s14 + $0x18] sm:$0xff] }
 0x4f7   :  { %v2069_v59 = vld [vmem:[%s6298_s14 + $0x28] sm:$0xff] }
 0x4f8   :  { %4826 = vmatprep.subr.bf16.mxu0 %v4825_v51  ;;  %v4833_v60 = vpack.c.bf16 %v2069_v59, %v2068_v55 }
 0x4f9   :  { %v1795_v61 = vpop.f32.mrb[20].mxu1 }
 0x4fa   :  { %v4584_v62 = vpop.f32.mrb[21].mxu1 }
 0x4fb   :  { %v2071_v62 = vld [vmem:[%s6298_s14 + $0x38] sm:$0xff] }
 0x4fc   :  { %v1415_v0 = vpop.f32.mrb[6].mxu0 }
 0x4fd   :  { %1804 = vrot.lane.b32.xlu1 %v1415_v0, %s5075_s22  ;;  %v4559_v40 = vpop.f32.mrb[7].mxu0 }
 0x4fe   :  { %v2072_v40 = vld [vmem:[%s6298_s14 + $0x40] sm:$0xff] }
 0x500   :  { %v1567_v1 = vpop.f32.mrb[8].mxu0 }
 0x501   :  { %v4569_v2 = vpop.f32.mrb[9].mxu0  ;;  %1808 = vrot.lane.b32.xlu1 %v1491_v47, %s5076_s0  ;;  %v4821_v47 = vpack.c.bf16 %v1973_v36, %v1972_v39 }
 0x503   :  { %4822 = vmatprep.subr.bf16.mxu1 %v4821_v47 }
 0x504   :  { %v1719_v5 = vpop.f32.mrb[10].mxu0  ;;  %4824 = vmatpush3.bf16.msra.mxu1 %v4821_v47 }
 0x505   :  { %1825 = vrot.lane.b32.xlu1 %v1795_v61, %s5076_s0  ;;  %1821 = vrot.lane.b32.xlu0 %v1719_v5, %s5075_s22  ;;  %v4579_v6 = vpop.f32.mrb[11].mxu0  ;;  %v2070_v61 = vld [vmem:[%s6298_s14 + $0x30] sm:$0xff] }
 0x506   :  { %v4837_v0 = vpack.c.bf16 %v2071_v62, %v2070_v61  ;;  %v2074_v5 = vld [vmem:[%s6298_s14 + $0x50] sm:$0xff]  ;;  %v2075_v6 = vld [vmem:[%s6298_s14 + $0x58] sm:$0xff] }
 0x55a   :  { %v1801_v43 = vpop.permute.xlu0 %1800 }
 0x55b   :  { %v1811_v11 = vsel %vm480_vm9, %v1263_v52, %v1801_v43  ;;  %v2066_v52 = vld [vmem:[%s6298_s14 + $0x10] sm:$0xff]  ;;  %v4845_v43 = vpack.c.bf16 %v2075_v6, %v2074_v5  ;;  %v4278_v6 = vld [vmem:[%s6290_s6 + $0x38] sm:$0xff] }
 0x55c   :  { %v4829_v54 = vpack.c.bf16 %v2067_v31, %v2066_v52  ;;  %v4277_v5 = vld [vmem:[%s6290_s6 + $0x30] sm:$0xff] }
 0x568   :  { %v1818_v4 = vpop.permute.xlu0 %1817 }
 0x569   :  { %v1828_v24 = vsel %vm480_vm9, %v1567_v1, %v1818_v4  ;;  %v2073_v1 = vld [vmem:[%s6298_s14 + $0x48] sm:$0xff] }
 0x56a   :  { %v4841_v2 = vpack.c.bf16 %v2073_v1, %v2072_v40  ;;  %v4275_v40 = vld [vmem:[%s6290_s6 + $0x20] sm:$0xff]  ;;  %v4276_v1 = vld [vmem:[%s6290_s6 + $0x28] sm:$0xff] }
 0x56f   :  { %v1805_v8 = vpop.permute.xlu1 %1804 }
 0x570   :  { %v1813_v22 = vsel %vm1812_vm14, %v1811_v11, %v1805_v8  ;;  %v2076_v8 = vld [vmem:[%s6298_s14 + $0x60] sm:$0xff]  ;;  %v2077_v11 = vld [vmem:[%s6298_s14 + $0x68] sm:$0xff] }
 0x571   :  { %v4849_v4 = vpack.c.bf16 %v2077_v11, %v2076_v8 }
 0x573   :  { %v1809_v3 = vpop.permute.xlu1 %1808 }
 0x574   :  { %v1815_v13 = vsel %vm1814_vm15, %v1813_v22, %v1809_v3 }
 0x575   :  { %4593 = vmatprep.mubr.msk.f32.mxu0 %vm382_vm7, %v1815_v13 }
 0x577   :  { %v1826_v27 = vpop.permute.xlu1 %1825  ;;  %v1822_v46 = vpop.permute.xlu0 %1821 }
 0x578   :  { %v1829_v28 = vsel %vm1812_vm14, %v1828_v24, %v1822_v46 }
 0x579   :  { %v1830_v20 = vsel %vm1814_vm15, %v1829_v28, %v1826_v27 }
 0x57a   :  { %4594 = vmatmul.mubr.msk.f32.vlgmr.msra.gmra.mrb[12].mxu0 %vm382_vm7, %v1830_v20  ;;  %v4267_v20 = vld [vmem:[%s6294_s10] ss:$0 sm:$0xff] }
 0x57b   :  { %4828 = vmatpush3.bf16.msra.mxu0 %v4825_v51 }
 0x57c   :  { %4830 = vmatprep.subr.bf16.mxu0 %v4829_v54 }
 0x57f   :  { %4832 = vmatpush3.bf16.msra.mxu0 %v4829_v54 }
 0x580   :  { %4834 = vmatprep.subr.bf16.mxu0 %v4833_v60 }
 0x583   :  { %4836 = vmatpush3.bf16.msra.mxu0 %v4833_v60 }
 0x584   :  { %4838 = vmatprep.subr.bf16.mxu0 %v4837_v0 }
 0x587   :  { %4840 = vmatpush3.bf16.msra.mxu0 %v4837_v0 }
 0x588   :  { %4842 = vmatprep.subr.bf16.mxu0 %v4841_v2 }
 0x58b   :  { %4844 = vmatpush3.bf16.msra.mxu0 %v4841_v2  ;;  %v4857_v2 = vpack.c.bf16 %v4276_v1, %v4275_v40 }
 0x58c   :  { %4846 = vmatprep.subr.bf16.mxu0 %v4845_v43 }
 0x58d   :  { %4858 = vmatprep.subr.bf16.mxu1 %v4857_v2 }
 0x58f   :  { %4848 = vmatpush3.bf16.msra.mxu0 %v4845_v43  ;;  %v4861_v43 = vpack.c.bf16 %v4278_v6, %v4277_v5 }
 0x590   :  { %4850 = vmatprep.subr.bf16.mxu0 %v4849_v4 }
 0x593   :  { %4852 = vmatpush3.bf16.msra.mxu0 %v4849_v4 }
 0x64d   :  { %v4595_v14 = vpop.f32.mrb[12].mxu0 }
 0x64e   :  { %v1920_v30 = vadd.f32 %v4595_v14, %v4264_v21  ;;  %v1914_v18 = vpop.f32.mrb[13].mxu0  ;;  %v4268_v14 = vld [vmem:[%s6295_s11] ss:$0 sm:$0xff] }
 0x64f   :  { %v1915_v10 = vadd.f32 %v4264_v21, %v1914_v18 }
 0x650   :  { %v1924_v16 = vadd.f32 %v1920_v30, %v5356_v9 }
 0x651   :  { %v1923_v29 = vadd.f32 %v1915_v10, %v5339_v57 }
 0x652   :  { %v1928_v34 = vsel %vm382_vm7, %v1924_v16, 0.0 }
 0x653   :  { %1929 = vadd.xlane.f32.xlu1 %v1928_v34  ;;  %v1925_v17 = vsel %vm382_vm7, %v1923_v29, 0.0 }
 0x654   :  { %1926 = vadd.xlane.f32.xlu0 %v1925_v17  ;;  %v2078_v17 = vld [vmem:[%s6298_s14 + $0x70] sm:$0xff] }
 0x6e0   :  { %v1930_v35 = vpop.xlane.xlu1 %1929 }
 0x6e1   :  { %v1933_v33 = vmul.f32 0.03125, %v1930_v35  ;;  %v1927_v19 = vpop.xlane.xlu0 %1926  ;;  %v2079_v35 = vld [vmem:[%s6298_s14 + $0x78] sm:$0xff] }
 0x6e2   :  { %v1932_v48 = vmul.f32 0.03125, %v1927_v19  ;;  %v4269_v19 = vld [vmem:[%s6297_s13] ss:$0 sm:$0xff] }
 0x6e3   :  { %v5829_v15 = vsub.f32 %v1924_v16, %v1933_v33  ;;  %v4853_v33 = vpack.c.bf16 %v2079_v35, %v2078_v17 }
 0x6e4   :  { %v1934_v32 = vsub.f32 %v1923_v29, %v1932_v48 }
 0x6e5   :  { %v1937_v9 = vmul.f32 %v5829_v15, %v5829_v15  ;;  %4854 = vmatprep.subr.bf16.mxu0 %v4853_v33 }
 0x6e6   :  { %v1936_v41 = vmul.f32 %v1934_v32, %v1934_v32  ;;  %4856 = vmatpush3.bf16.msra.mxu0 %v4853_v33 }
 0x6e7   :  { %v1941_v57 = vsel %vm382_vm7, %v1937_v9, 0.0  ;;  %4683 = vmatprep.subr.mxu0 %v5067_v12 }
 0x6e8   :  { %v1938_v25 = vsel %vm382_vm7, %v1936_v41, 0.0 }
 0x6e9   :  { %1939 = vadd.xlane.f32.xlu0 %v1938_v25 }
 0x6ed   :  { %1942 = vadd.xlane.f32.xlu0 %v1941_v57  ;;  %v4272_v57 = vld [vmem:[%s6333_s3] ss:$0 sm:$0xff] }
 0x776   :  { %v1940_v22 = vpop.xlane.xlu0 %1939 }
 0x777   :  { %v1944_v3 = vmul.f32 0.03125, %v1940_v22 }
 0x779   :  { %v1946_v13 = vadd.f32 1e-05, %v1944_v3 }
 0x77a   :  { %v1943_v24 = vpop.xlane.xlu0 %1942 }
 0x77b   :  { %4967 = vrsqrt.f32 %v1946_v13  ;;  %v1945_v27 = vmul.f32 0.03125, %v1943_v24 }
 0x77d   :  { %v1947_v46 = vadd.f32 1e-05, %v1945_v27  ;;  %v4273_v27 = vld [vmem:[%s6334_s4] ss:$0 sm:$0xff] }
 0x77f   :  { %4969 = vrsqrt.f32 %v1947_v46 }
 0x785   :  { %v4968_v28 = vpop.eup %4967 }
 0x786   :  { %v1950_v21 = vmul.f32 %v4968_v28, %v1934_v32 }
 0x788   :  { %v1959_v30 = vmul.f32 %v4267_v20, %v1950_v21 }
 0x789   :  { %v4970_v18 = vpop.eup %4969 }
 0x78a   :  { %v1951_v10 = vmul.f32 %v4970_v18, %v5829_v15  ;;  %v1968_v16 = vadd.f32 %v4268_v14, %v1959_v30 }
 0x78c   :  { %v1960_v29 = vmul.f32 %v4267_v20, %v1951_v10  ;;  %4604 = vmatprep.mubr.msk.f32.mxu1 %vm382_vm7, %v1968_v16 }
 0x78e   :  { %v1969_v34 = vadd.f32 %v4268_v14, %v1960_v29  ;;  %v4274_v14 = vld [vmem:[%s6335_s19] ss:$0 sm:$0xff] }
 0x790   :  { %4605 = vmatmul.mubr.msk.f32.vlgmr.msra.gmra.mrb[22].mxu1 %vm382_vm7, %v1969_v34 }
 0x791   :  { %4860 = vmatpush3.bf16.msra.mxu1 %v4857_v2 }
 0x792   :  { %4862 = vmatprep.subr.bf16.mxu1 %v4861_v43 }
 0x795   :  { %4864 = vmatpush3.bf16.msra.mxu1 %v4861_v43 }
 0x796   :  { %4653 = vmatprep.subr.mxu1 %v5067_v12 }
 0x863   :  { %v4606_v48 = vpop.f32.mrb[22].mxu1 }
 0x864   :  { %v2059_v15 = vadd.f32 %v4606_v48, %v4269_v19  ;;  %v2053_v32 = vpop.f32.mrb[23].mxu1 }
 0x865   :  { %v2054_v41 = vadd.f32 %v4269_v19, %v2053_v32 }
 0x866   :  { %v2063_v9 = vmax.f32 %v2059_v15, 0.0 }
 0x867   :  { %v2062_v25 = vmax.f32 %v2054_v41, 0.0 }
 0x869   :  { %4639 = vmatprep.mubr.f32.mxu0 %v2062_v25 }
 0x86a   :  { %4640 = vmatmul.mubr.f32.vlgmr.msra.gmra.mrb[14].mxu0 %v2063_v9 }
 0x86b   :  { %4685 = vmatprep.mubr.msk.f32.mxu0 %vm5070_vm8, %v5067_v12 }
 0x93d   :  { %v4641_v58 = vpop.f32.mrb[14].mxu0 }
 0x93e   :  { %v2159_v42 = vadd.f32 %v4641_v58, %v4272_v57  ;;  %v2153_v26 = vpop.f32.mrb[15].mxu0 }
 0x93f   :  { %v2154_v39 = vadd.f32 %v4272_v57, %v2153_v26 }
 0x940   :  { %v2163_v36 = vadd.f32 %v2159_v42, %v1969_v34 }
 0x941   :  { %v2162_v47 = vadd.f32 %v2154_v39, %v1968_v16  ;;  %v4280_v16 = vld [vmem:[%s6291_s7 + $0x1] ss:$0 sm:$0xff] }
 0x942   :  { %v2167_v49 = vsel %vm382_vm7, %v2163_v36, 0.0 }
 0x943   :  { %2168 = vadd.xlane.f32.xlu0 %v2167_v49  ;;  %v2164_v45 = vsel %vm382_vm7, %v2162_v47, 0.0 }
 0x944   :  { %2165 = vadd.xlane.f32.xlu1 %v2164_v45 }
 0x9d0   :  { %v2169_v52 = vpop.xlane.xlu0 %2168 }
 0x9d1   :  { %v2171_v51 = vmul.f32 0.03125, %v2169_v52  ;;  %v2166_v31 = vpop.xlane.xlu1 %2165 }
 0x9d2   :  { %v2170_v54 = vmul.f32 0.03125, %v2166_v31 }
 0x9d3   :  { %v2173_v55 = vsub.f32 %v2163_v36, %v2171_v51 }
 0x9d4   :  { %v2172_v59 = vsub.f32 %v2162_v47, %v2170_v54 }
 0x9d5   :  { %v2175_v60 = vmul.f32 %v2173_v55, %v2173_v55 }
 0x9d6   :  { %v2174_v61 = vmul.f32 %v2172_v59, %v2172_v59 }
 0x9d7   :  { %v2179_v62 = vsel %vm382_vm7, %v2175_v60, 0.0 }
 0x9d8   :  { %2180 = vadd.xlane.f32.xlu0 %v2179_v62  ;;  %v2176_v0 = vsel %vm382_vm7, %v2174_v61, 0.0 }
 0x9d9   :  { %2177 = vadd.xlane.f32.xlu1 %v2176_v0 }
 0xa65   :  { %v2181_v8 = vpop.xlane.xlu0 %2180 }
 0xa66   :  { %v2183_v11 = vmul.f32 0.03125, %v2181_v8  ;;  %v2178_v4 = vpop.xlane.xlu1 %2177 }
 0xa67   :  { %v2182_v22 = vmul.f32 0.03125, %v2178_v4 }
 0xa68   :  { %v2185_v3 = vadd.f32 1e-05, %v2183_v11 }
 0xa69   :  { %v2184_v13 = vadd.f32 1e-05, %v2182_v22 }
 0xa6a   :  { %4971 = vrsqrt.f32 %v2185_v3 }
 0xa6b   :  { %4973 = vrsqrt.f32 %v2184_v13 }
 0xa74   :  { %v4972_v24 = vpop.eup %4971 }
 0xa75   :  { %v4974_v46 = vpop.eup %4973  ;;  %v2189_v28 = vmul.f32 %v4972_v24, %v2173_v55 }
 0xa76   :  { %v2188_v20 = vmul.f32 %v4974_v46, %v2172_v59 }
 0xa77   :  { %v2198_v21 = vmul.f32 %v4273_v27, %v2189_v28 }
 0xa78   :  { %v2197_v30 = vmul.f32 %v4273_v27, %v2188_v20 }
 0xa79   :  { %v5938_v10 = vadd.f32 %v4274_v14, %v2198_v21 }
 0xa7a   :  { %v5936_v18 = vadd.f32 %v4274_v14, %v2197_v30 }
 0xa7c   :  { %4650 = vmatprep.mubr.msk.f32.mxu1 %vm382_vm7, %v5936_v18 }
 0xa7d   :  { %4651 = vmatmul.mubr.msk.f32.vlgmr.msra.gmra.mrb[24].mxu1 %vm382_vm7, %v5938_v10 }
 0xa7e   :  { %4655 = vmatprep.mubr.msk.f32.mxu1 %vm5070_vm8, %v5067_v12 }
 0xb50   :  { %v4652_v29 = vpop.f32.mrb[24].mxu1 }
 0xb51   :  { %v2293_v34 = vpop.f32.mrb[25].mxu1  ;;  %v5955_v35 = vadd.f32 %v4652_v29, %v4280_v16 }
 0xb52   :  { %v5949_v17 = vadd.f32 %v4280_v16, %v2293_v34 }
 0xb54   :  { %2305 = vrot.lane.b32.xlu0 %v5949_v17, %s5071_s29  ;;  %2303 = vrot.lane.b32.xlu1 %v5949_v17, %s5069_s17 }
 0xb58   :  { %2312 = vrot.lane.b32.xlu0 %v5955_v35, %s5071_s29  ;;  %2307 = vrot.lane.b32.xlu1 %v5949_v17, %s5068_s16 }
 0xb5c   :  { %2316 = vrot.lane.b32.xlu0 %v5949_v17, %s6336_s18  ;;  %2310 = vrot.lane.b32.xlu1 %v5955_v35, %s5069_s17 }
 0xb60   :  { %2314 = vrot.lane.b32.xlu1 %v5955_v35, %s5068_s16 }
 0xbc6   :  { %v5967_v33 = vpop.permute.xlu0 %2305  ;;  %v5969_v19 = vpop.permute.xlu1 %2303 }
 0xbc7   :  { %2468 = vrot.lane.b32.xlu0 %v5967_v33, %s6336_s18  ;;  %2392 = vrot.lane.b32.xlu1 %v5969_v19, %s6336_s18 }
 0xbca   :  { %v5975_v48 = vpop.permute.xlu0 %2312  ;;  %v5977_v15 = vpop.permute.xlu1 %2307 }
 0xbcb   :  { %2620 = vrot.lane.b32.xlu0 %v5955_v35, %s6336_s18  ;;  %2544 = vrot.lane.b32.xlu1 %v5977_v15, %s6336_s18 }
 0xbce   :  { %v2317_v32 = vpop.permute.xlu0 %2316  ;;  %v5983_v41 = vpop.permute.xlu1 %2310 }
 0xbcf   :  { %2772 = vrot.lane.b32.xlu0 %v5975_v48, %s6336_s18  ;;  %4654 = vmatpush3.xpose.msk.msra.mxu1 %vm480_vm9, %v2317_v32 }
 0xbd0   :  { %2696 = vrot.lane.b32.xlu1 %v5983_v41, %s6336_s18  ;;  %4658 = vmatprep.subr.mxu1 %v5067_v12 }
 0xbd2   :  { %4656 = vmatmul.mubr.msk.f32.vlgmr.msra.gmra.mrb[26].mxu1 %vm480_vm9, %v5949_v17  ;;  %v5993_v25 = vpop.permute.xlu1 %2314 }
 0xbd3   :  { %4660 = vmatprep.mubr.msk.f32.mxu1 %vm5070_vm8, %v5067_v12 }
 0xbd4   :  { %2848 = vrot.lane.b32.xlu1 %v5993_v25, %s6336_s18  ;;  %s6338_s18 = sld [smem:[#allocation18_spill]] }
 0xc39   :  { %v2469_v9 = vpop.permute.xlu0 %2468  ;;  %v2393_v57 = vpop.permute.xlu1 %2392 }
 0xc3a   :  { %4659 = vmatpush3.xpose.msk.msra.mxu1 %vm480_vm9, %v2393_v57 }
 0xc3b   :  { %4663 = vmatprep.subr.mxu1 %v5067_v12 }
 0xc3d   :  { %v2621_v58 = vpop.permute.xlu0 %2620  ;;  %4661 = vmatmul.mubr.msk.f32.vlgmr.msra.gmra.mrb[28].mxu1 %vm480_vm9, %v5969_v19  ;;  %v2545_v42 = vpop.permute.xlu1 %2544 }
 0xc3e   :  { %4664 = vmatpush3.xpose.msk.msra.mxu1 %vm480_vm9, %v2469_v9  ;;  %4665 = vmatprep.mubr.msk.f32.mxu1 %vm5070_vm8, %v5067_v12 }
 0xc3f   :  { %4668 = vmatprep.subr.mxu1 %v5067_v12 }
 0xc41   :  { %v2773_v26 = vpop.permute.xlu0 %2772  ;;  %4666 = vmatmul.mubr.msk.f32.vlgmr.msra.gmra.mrb[30].mxu1 %vm480_vm9, %v5967_v33 }
 0xc42   :  { %4669 = vmatpush3.xpose.msk.msra.mxu1 %vm480_vm9, %v2545_v42  ;;  %4684 = vmatpush3.xpose.msk.msra.mxu0 %vm480_vm9, %v2773_v26  ;;  %v2697_v39 = vpop.permute.xlu1 %2696 }
 0xc43   :  { %4670 = vmatprep.mubr.msk.f32.mxu1 %vm5070_vm8, %v5067_v12  ;;  %4673 = vmatprep.subr.mxu1 %v5067_v12 }
 0xc44   :  { %4693 = vmatprep.subr.mxu0 %v5067_v12 }
 0xc45   :  { %4671 = vmatmul.mubr.msk.f32.vlgmr.msra.gmra.mrb[32].mxu1 %vm480_vm9, %v5977_v15  ;;  %4686 = vmatmul.mubr.msk.f32.vlgmr.msra.gmra.mrb[16].mxu0 %vm480_vm9, %v5975_v48 }
 0xc46   :  { %4674 = vmatpush3.xpose.msk.msra.mxu1 %vm480_vm9, %v2621_v58  ;;  %4675 = vmatprep.mubr.msk.f32.mxu1 %vm5070_vm8, %v5067_v12  ;;  %v2849_v36 = vpop.permute.xlu1 %2848 }
 0xc47   :  { %4678 = vmatprep.subr.mxu1 %v5067_v12  ;;  %4695 = vmatprep.mubr.msk.f32.mxu0 %vm5070_vm8, %v5067_v12 }
 0xc49   :  { %4676 = vmatmul.mubr.msk.f32.vlgmr.msra.gmra.mrb[34].mxu1 %vm480_vm9, %v5955_v35 }
 0xc4a   :  { %4679 = vmatpush3.xpose.msk.msra.mxu1 %vm480_vm9, %v2697_v39  ;;  %4680 = vmatprep.mubr.msk.f32.mxu1 %vm5070_vm8, %v5067_v12 }
 0xc4b   :  { %4688 = vmatprep.subr.mxu1 %v5067_v12 }
 0xc4d   :  { %4681 = vmatmul.mubr.msk.f32.vlgmr.msra.gmra.mrb[36].mxu1 %vm480_vm9, %v5983_v41 }
 0xc4e   :  { %4689 = vmatpush3.xpose.msk.msra.mxu1 %vm480_vm9, %v2849_v36  ;;  %4690 = vmatprep.mubr.msk.f32.mxu1 %vm5070_vm8, %v5067_v12 }
 0xc4f   :  { %4698 = vmatprep.subr.mxu1 %v5067_v12 }
 0xc51   :  { %4691 = vmatmul.mubr.msk.f32.vlgmr.msra.gmra.mrb[38].mxu1 %vm480_vm9, %v5993_v25 }
 0xc52   :  { %4700 = vmatprep.mubr.msk.f32.mxu1 %vm5070_vm8, %v5067_v12 }
 0xca5   :  { %v2388_v47 = vpop.f32.mrb[26].mxu1 }
 0xca6   :  { %v2924_v49 = vmul.f32 0.35355338, %v2388_v47  ;;  %v4657_v45 = vpop.f32.mrb[27].mxu1 }
 0xca8   :  { %v2932_v52 = vadd.f32 %v2924_v49, %v5525_v53 }
 0xcaa   :  { %v2940_v51 = vsel %vm480_vm9, %v2932_v52, -inf }
 0xcab   :  { %2941 = vmax.xlane.f32.xlu0 %v2940_v51 }
 0xd10   :  { %v2464_v31 = vpop.f32.mrb[28].mxu1 }
 0xd11   :  { %v2925_v54 = vmul.f32 0.35355338, %v2464_v31  ;;  %v4662_v55 = vpop.f32.mrb[29].mxu1 }
 0xd13   :  { %v2933_v59 = vadd.f32 %v2925_v54, %v5655_v63 }
 0xd14   :  { %v2540_v60 = vpop.f32.mrb[30].mxu1 }
 0xd15   :  { %v2926_v61 = vmul.f32 0.35355338, %v2540_v60  ;;  %v4667_v62 = vpop.f32.mrb[31].mxu1  ;;  %v2943_v0 = vsel %vm480_vm9, %v2933_v59, -inf }
 0xd16   :  { %2944 = vmax.xlane.f32.xlu1 %v2943_v0 }
 0xd17   :  { %v6046_v40 = vadd.f32 %v2926_v61, %v5681_v23 }
 0xd18   :  { %v2616_v1 = vpop.f32.mrb[32].mxu1  ;;  %v2844_v2 = vpop.f32.mrb[16].mxu0 }
 0xd19   :  { %v2927_v53 = vmul.f32 0.35355338, %v2616_v1  ;;  %v4672_v5 = vpop.f32.mrb[33].mxu1  ;;  %v4687_v6 = vpop.f32.mrb[17].mxu0  ;;  %v2946_v43 = vsel %vm480_vm9, %v6046_v40, -inf }
 0xd1a   :  { %2947 = vmax.xlane.f32.xlu0 %v2946_v43  ;;  %v2930_v11 = vmul.f32 0.35355338, %v2844_v2 }
 0xd1b   :  { %v2935_v63 = vadd.f32 %v2927_v53, %v5705_v50 }
 0xd1c   :  { %v2692_v8 = vpop.f32.mrb[34].mxu1  ;;  %v2938_v28 = vadd.f32 %v2930_v11, %v5721_v37 }
 0xd1d   :  { %v2928_v4 = vmul.f32 0.35355338, %v2692_v8  ;;  %v4677_v22 = vpop.f32.mrb[35].mxu1  ;;  %v2949_v3 = vsel %vm480_vm9, %v2935_v63, -inf }
 0xd1e   :  { %2950 = vmax.xlane.f32.xlu0 %v2949_v3  ;;  %v2958_v30 = vsel %vm480_vm9, %v2938_v28, -inf }
 0xd1f   :  { %v6053_v23 = vadd.f32 %v2928_v4, %v5707_v38 }
 0xd20   :  { %v2768_v13 = vpop.f32.mrb[36].mxu1 }
 0xd21   :  { %v2929_v24 = vmul.f32 0.35355338, %v2768_v13  ;;  %v4682_v27 = vpop.f32.mrb[37].mxu1  ;;  %v2952_v46 = vsel %vm480_vm9, %v6053_v23, -inf }
 0xd22   :  { %2953 = vmax.xlane.f32.xlu1 %v2952_v46 }
 0xd23   :  { %v2937_v50 = vadd.f32 %v2929_v24, %v5719_v56 }
 0xd24   :  { %v2920_v20 = vpop.f32.mrb[38].mxu1 }
 0xd25   :  { %v2931_v21 = vmul.f32 0.35355338, %v2920_v20  ;;  %v4692_v14 = vpop.f32.mrb[39].mxu1  ;;  %v2955_v16 = vsel %vm480_vm9, %v2937_v50, -inf }
 0xd26   :  { %2959 = vmax.xlane.f32.xlu1 %v2958_v30  ;;  %2956 = vmax.xlane.f32.xlu0 %v2955_v16 }
 0xd27   :  { %v2939_v38 = vadd.f32 %v2931_v21, %v5729_v7 }
 0xd29   :  { %v2961_v29 = vsel %vm480_vm9, %v2939_v38, -inf }
 0xd2a   :  { %2962 = vmax.xlane.f32.xlu0 %v2961_v29 }
 0xd37   :  { %3028 = vrot.lane.b32.xlu1 %v5949_v17, %s5073_s27 }
 0xd38   :  { %v2942_v56 = vpop.xlane.xlu0 %2941 }
 0xd39   :  { %v2964_v37 = vsub.f32 %v2932_v52, %v2942_v56 }
 0xd3b   :  { %3180 = vrot.lane.b32.xlu1 %v5967_v33, %s5073_s27  ;;  %v2972_v7 = vmul.f32 1.442695, %v2964_v37 }
 0xd3d   :  { %4975 = vpow2.f32 %v2972_v7 }
 0xd3f   :  { %3256 = vrot.lane.b32.xlu1 %v5977_v15, %s5073_s27 }
 0xd40   :  { %3104 = vrot.lane.b32.xlu0 %v5969_v19, %s5073_s27 }
 0xd43   :  { %3408 = vrot.lane.b32.xlu1 %v5983_v41, %s5073_s27 }
 0xd44   :  { %3332 = vrot.lane.b32.xlu0 %v5955_v35, %s5073_s27 }
 0xd47   :  { %v6075_v34 = vpop.eup %4975 }
 0xd48   :  { %v2988_v17 = vsel %vm480_vm9, %v6075_v34, 0.0 }
 0xd67   :  { %2989 = vadd.xlane.f32.xlu1 %v2988_v17 }
 0xda3   :  { %v2945_v33 = vpop.xlane.xlu1 %2944 }
 0xda4   :  { %v2965_v15 = vsub.f32 %v2933_v59, %v2945_v33 }
 0xda6   :  { %v2974_v32 = vmul.f32 1.442695, %v2965_v15 }
 0xda7   :  { %v2948_v19 = vpop.xlane.xlu0 %2947 }
 0xda8   :  { %4977 = vpow2.f32 %v2974_v32  ;;  %v2966_v42 = vsub.f32 %v6046_v40, %v2948_v19 }
 0xdaa   :  { %v2976_v51 = vmul.f32 1.442695, %v2966_v42 }
 0xdab   :  { %v2951_v9 = vpop.xlane.xlu0 %2950 }
 0xdac   :  { %v2967_v41 = vsub.f32 %v2935_v63, %v2951_v9 }
 0xdae   :  { %v2978_v57 = vmul.f32 1.442695, %v2967_v41 }
 0xdaf   :  { %v2954_v58 = vpop.xlane.xlu1 %2953 }
 0xdb0   :  { %4979 = vpow2.f32 %v2978_v57  ;;  %v2968_v31 = vsub.f32 %v6053_v23, %v2954_v58 }
 0xdb2   :  { %v6079_v35 = vpop.eup %4977  ;;  %v2980_v62 = vmul.f32 1.442695, %v2968_v31 }
 0xdb3   :  { %v2957_v26 = vpop.xlane.xlu0 %2956  ;;  %v2960_v39 = vpop.xlane.xlu1 %2959  ;;  %v2991_v36 = vsel %vm480_vm9, %v6079_v35, 0.0 }
 0xdb4   :  { %v2969_v47 = vsub.f32 %v2937_v50, %v2957_v26  ;;  %v2970_v49 = vsub.f32 %v2938_v28, %v2960_v39  ;;  %2992 = vadd.xlane.f32.xlu0 %v2991_v36  ;;  %v4307_v36 = vld [vmem:[%s6292_s8 + $0x20] sm:$0xff] }
 0xdb6   :  { %v2982_v45 = vmul.f32 1.442695, %v2969_v47  ;;  %v2984_v52 = vmul.f32 1.442695, %v2970_v49  ;;  %v4308_v47 = vld [vmem:[%s6292_s8 + $0x28] sm:$0xff] }
 0xdb7   :  { %v2963_v54 = vpop.xlane.xlu0 %2962  ;;  %v3029_v55 = vpop.permute.xlu1 %3028 }
 0xdb8   :  { %4981 = vpow2.f32 %v2982_v45  ;;  %v2971_v59 = vsub.f32 %v2939_v38, %v2963_v54  ;;  %4694 = vmatpush3.msra.mxu0 %v3029_v55  ;;  %v4865_v45 = vpack.c.bf16 %v4308_v47, %v4307_v36  ;;  %v4333_v47 = vld [vmem:[%s6298_s14 + $0xb0] sm:$0xff] }
 0xdb9   :  { %4983 = vpow2.f32 %v2984_v52  ;;  %4703 = vmatprep.subr.mxu0 %v5067_v12  ;;  %v4309_v52 = vld [vmem:[%s6292_s8 + $0x30] sm:$0xff] }
 0xdba   :  { %v2986_v60 = vmul.f32 1.442695, %v2971_v59  ;;  %v4980_v61 = vpop.eup %4979  ;;  %4985 = vpow2.f32 %v2976_v51  ;;  %v4310_v51 = vld [vmem:[%s6292_s8 + $0x38] sm:$0xff] }
 0xdbb   :  { %v3105_v0 = vpop.permute.xlu0 %3104  ;;  %v2997_v40 = vsel %vm480_vm9, %v4980_v61, 0.0  ;;  %v3181_v22 = vpop.permute.xlu1 %3180  ;;  %v4869_v31 = vpack.c.bf16 %v4310_v51, %v4309_v52  ;;  %v4335_v52 = vld [vmem:[%s6298_s14 + $0xc0] sm:$0xff]  ;;  %v4336_v51 = vld [vmem:[%s6298_s14 + $0xc8] sm:$0xff] }
 0xdbc   :  { %4987 = vpow2.f32 %v2986_v60  ;;  %4699 = vmatpush3.msra.mxu1 %v3105_v0  ;;  %2998 = vadd.xlane.f32.xlu0 %v2997_v40 }
 0xdbd   :  { %4708 = vmatprep.subr.mxu1 %v5067_v12  ;;  %4989 = vpow2.f32 %v2980_v62 }
 0xdbf   :  { %v3257_v3 = vpop.permute.xlu1 %3256 }
 0xdc2   :  { %v4982_v1 = vpop.eup %4981 }
 0xdc3   :  { %v6088_v2 = vpop.eup %4983  ;;  %v3003_v53 = vsel %vm480_vm9, %v4982_v1, 0.0  ;;  %v3409_v23 = vpop.permute.xlu1 %3408 }
 0xdc4   :  { %3004 = vadd.xlane.f32.xlu0 %v3003_v53  ;;  %v3006_v5 = vsel %vm480_vm9, %v6088_v2, 0.0  ;;  %v4986_v6 = vpop.eup %4985 }
 0xdc5   :  { %3007 = vadd.xlane.f32.xlu1 %v3006_v5  ;;  %v2994_v8 = vsel %vm480_vm9, %v4986_v6, 0.0 }
 0xdc6   :  { %v4988_v43 = vpop.eup %4987 }
 0xdc7   :  { %v3009_v63 = vsel %vm480_vm9, %v4988_v43, 0.0  ;;  %v4990_v11 = vpop.eup %4989 }
 0xdc8   :  { %3010 = vadd.xlane.f32.xlu0 %v3009_v63  ;;  %v3000_v4 = vsel %vm480_vm9, %v4990_v11, 0.0 }
 0xdc9   :  { %2995 = vadd.xlane.f32.xlu1 %v2994_v8 }
 0xdcd   :  { %3001 = vadd.xlane.f32.xlu1 %v3000_v4 }
 0xdde   :  { %3560 = vrot.lane.b32.xlu1 %v5993_v25, %s5073_s27  ;;  %3484 = vrot.lane.b32.xlu0 %v5975_v48, %s5073_s27  ;;  %v3333_v25 = vpop.permute.xlu0 %3332 }
 0xdf4   :  { %v2990_v13 = vpop.xlane.xlu1 %2989 }
 0xdf5   :  { %4991 = vrcp.f32 %v2990_v13 }
 0xdff   :  { %v4992_v24 = vpop.eup %4991 }
 0xe00   :  { %v3013_v27 = vmul.f32 %v4992_v24, %v6075_v34  ;;  %v4312_v24 = vld [vmem:[%s6293_s9 + $0x1] ss:$0 sm:$0xff] }
 0xe02   :  { %4696 = vmatmul.mubr.msk.f32.vlgmr.msra.gmra.mrb[18].mxu0 %vm480_vm9, %v3013_v27 }
 0xe03   :  { %4704 = vmatpush3.msra.mxu0 %v3181_v22  ;;  %4705 = vmatprep.mubr.msk.f32.mxu0 %vm5070_vm8, %v5067_v12 }
 0xe04   :  { %4713 = vmatprep.subr.mxu0 %v5067_v12 }
 0xe41   :  { %v2993_v46 = vpop.xlane.xlu0 %2992 }
 0xe42   :  { %4993 = vrcp.f32 %v2993_v46 }
 0xe49   :  { %v2999_v48 = vpop.xlane.xlu0 %2998 }
 0xe4a   :  { %4995 = vrcp.f32 %v2999_v48 }
 0xe4c   :  { %v4994_v28 = vpop.eup %4993 }
 0xe4d   :  { %v3015_v50 = vmul.f32 %v4994_v28, %v6079_v35 }
 0xe4f   :  { %4701 = vmatmul.mubr.msk.f32.vlgmr.msra.gmra.mrb[40].mxu1 %vm480_vm9, %v3015_v50 }
 0xe50   :  { %4709 = vmatpush3.msra.mxu1 %v3257_v3  ;;  %4710 = vmatprep.mubr.msk.f32.mxu1 %vm5070_vm8, %v5067_v12 }
 0xe51   :  { %v3005_v20 = vpop.xlane.xlu0 %3004  ;;  %4718 = vmatprep.subr.mxu1 %v5067_v12 }
 0xe52   :  { %4997 = vrcp.f32 %v3005_v20  ;;  %v3008_v21 = vpop.xlane.xlu1 %3007 }
 0xe54   :  { %v4996_v14 = vpop.eup %4995 }
 0xe55   :  { %v3011_v30 = vpop.xlane.xlu0 %3010  ;;  %v3019_v16 = vmul.f32 %v4996_v14, %v4980_v61 }
 0xe56   :  { %4999 = vrcp.f32 %v3011_v30  ;;  %v2996_v38 = vpop.xlane.xlu1 %2995 }
 0xe57   :  { %5001 = vrcp.f32 %v2996_v38  ;;  %4711 = vmatmul.mubr.msk.f32.vlgmr.msra.gmra.mrb[42].mxu1 %vm480_vm9, %v3019_v16 }
 0xe58   :  { %4719 = vmatpush3.msra.mxu1 %v3409_v23  ;;  %4720 = vmatprep.mubr.msk.f32.mxu1 %vm5070_vm8, %v5067_v12 }
 0xe59   :  { %4728 = vmatprep.subr.mxu1 %v5067_v12  ;;  %v3485_v41 = vpop.permute.xlu0 %3484 }
 0xe5a   :  { %v3002_v29 = vpop.xlane.xlu1 %3001 }
 0xe5b   :  { %5003 = vrcp.f32 %v3002_v29 }
 0xe5c   :  { %v4998_v56 = vpop.eup %4997  ;;  %5005 = vrcp.f32 %v3008_v21 }
 0xe5d   :  { %v3023_v37 = vmul.f32 %v4998_v56, %v4982_v1 }
 0xe5e   :  { %v3561_v7 = vpop.permute.xlu1 %3560 }
 0xe5f   :  { %4721 = vmatmul.mubr.msk.f32.vlgmr.msra.gmra.mrb[44].mxu1 %vm480_vm9, %v3023_v37 }
 0xe60   :  { %v5000_v34 = vpop.eup %4999  ;;  %4729 = vmatpush3.msra.mxu1 %v3561_v7  ;;  %4730 = vmatprep.mubr.msk.f32.mxu1 %vm5070_vm8, %v5067_v12 }
 0xe61   :  { %v5002_v17 = vpop.eup %5001  ;;  %v3027_v33 = vmul.f32 %v5000_v34, %v4988_v43  ;;  %v4319_v34 = vld [vmem:[%s6296_s12 + $0x20] sm:$0xff] }
 0xe62   :  { %v3017_v15 = vmul.f32 %v5002_v17, %v4986_v6  ;;  %v4320_v17 = vld [vmem:[%s6296_s12 + $0x28] sm:$0xff] }
 0xe63   :  { %4731 = vmatmul.mubr.msk.f32.vlgmr.msra.gmra.mrb[46].mxu1 %vm480_vm9, %v3027_v33  ;;  %v4873_v33 = vpack.c.bf16 %v4320_v17, %v4319_v34 }
 0xe64   :  { %4706 = vmatmul.mubr.msk.f32.vlgmr.msra.gmra.mrb[20].mxu0 %vm480_vm9, %v3017_v15  ;;  %v4321_v15 = vld [vmem:[%s6296_s12 + $0x30] sm:$0xff] }
 0xe65   :  { %v5004_v32 = vpop.eup %5003  ;;  %4714 = vmatpush3.msra.mxu0 %v3333_v25  ;;  %4715 = vmatprep.mubr.msk.f32.mxu0 %vm5070_vm8, %v5067_v12 }
 0xe66   :  { %v3021_v19 = vmul.f32 %v5004_v32, %v4990_v11  ;;  %4723 = vmatprep.subr.mxu0 %v5067_v12  ;;  %v5006_v9 = vpop.eup %5005  ;;  %4874 = vmatprep.subr.bf16.mxu1 %v4873_v33  ;;  %v4322_v32 = vld [vmem:[%s6296_s12 + $0x38] sm:$0xff] }
 0xe67   :  { %v3025_v57 = vmul.f32 %v5006_v9, %v6088_v2  ;;  %4876 = vmatpush3.bf16.msra.mxu1 %v4873_v33  ;;  %v4327_v9 = vld [vmem:[%s6298_s14 + $0x80] sm:$0xff] }
 0xe68   :  { %4716 = vmatmul.mubr.msk.f32.vlgmr.msra.gmra.mrb[22].mxu0 %vm480_vm9, %v3021_v19  ;;  %v4877_v19 = vpack.c.bf16 %v4322_v32, %v4321_v15 }
 0xe69   :  { %4724 = vmatpush3.msra.mxu0 %v3485_v41  ;;  %4725 = vmatprep.mubr.msk.f32.mxu0 %vm5070_vm8, %v5067_v12  ;;  %v4328_v41 = vld [vmem:[%s6298_s14 + $0x88] sm:$0xff] }
 0xe6a   :  { %4866 = vmatprep.subr.bf16.mxu0 %v4865_v45  ;;  %4878 = vmatprep.subr.bf16.mxu1 %v4877_v19 }
 0xe6b   :  { %4880 = vmatpush3.bf16.msra.mxu1 %v4877_v19 }
 0xe6c   :  { %4726 = vmatmul.mubr.msk.f32.vlgmr.msra.gmra.mrb[24].mxu0 %vm480_vm9, %v3025_v57  ;;  %v4329_v57 = vld [vmem:[%s6298_s14 + $0x90] sm:$0xff] }
 0xe6d   :  { %4868 = vmatpush3.bf16.msra.mxu0 %v4865_v45 }
 0xe6e   :  { %4870 = vmatprep.subr.bf16.mxu0 %v4869_v31 }
 0xe71   :  { %4872 = vmatpush3.bf16.msra.mxu0 %v4869_v31  ;;  %v4897_v31 = vpack.c.bf16 %v4336_v51, %v4335_v52 }
 0xed5   :  { %v3100_v58 = vpop.f32.mrb[18].mxu0 }
 0xed6   :  { %v4697_v35 = vpop.f32.mrb[19].mxu0 }
 0xed7   :  { %v4330_v35 = vld [vmem:[%s6298_s14 + $0x98] sm:$0xff] }
 0xf22   :  { %v3176_v42 = vpop.f32.mrb[40].mxu1 }
 0xf23   :  { %3637 = vrot.lane.b32.xlu0 %v3176_v42, %s5074_s5  ;;  %v4702_v26 = vpop.f32.mrb[41].mxu1  ;;  %v4885_v42 = vpack.c.bf16 %v4330_v35, %v4329_v57 }
 0xf24   :  { %v4331_v26 = vld [vmem:[%s6298_s14 + $0xa0] sm:$0xff] }
 0xf2a   :  { %v3328_v39 = vpop.f32.mrb[42].mxu1 }
 0xf2b   :  { %v4712_v49 = vpop.f32.mrb[43].mxu1 }
 0xf2c   :  { %v4334_v49 = vld [vmem:[%s6298_s14 + $0xb8] sm:$0xff] }
 0xf2d   :  { %v4893_v45 = vpack.c.bf16 %v4334_v49, %v4333_v47 }
 0xf32   :  { %v3480_v54 = vpop.f32.mrb[44].mxu1 }
 0xf33   :  { %3652 = vrot.lane.b32.xlu0 %v3480_v54, %s5074_s5  ;;  %v4722_v55 = vpop.f32.mrb[45].mxu1  ;;  %v4337_v54 = vld [vmem:[%s6298_s14 + $0xd0] sm:$0xff] }
 0xf34   :  { %v4338_v55 = vld [vmem:[%s6298_s14 + $0xd8] sm:$0xff] }
 0xf36   :  { %v3632_v59 = vpop.f32.mrb[46].mxu1 }
 0xf37   :  { %v3252_v60 = vpop.f32.mrb[20].mxu0  ;;  %v4732_v61 = vpop.f32.mrb[47].mxu1 }
 0xf38   :  { %3641 = vrot.lane.b32.xlu1 %v3252_v60, %s5075_s22  ;;  %v4707_v62 = vpop.f32.mrb[21].mxu0  ;;  %v4339_v60 = vld [vmem:[%s6298_s14 + $0xe0] sm:$0xff]  ;;  %v4340_v61 = vld [vmem:[%s6298_s14 + $0xe8] sm:$0xff] }
 0xf39   :  { %v4905_v62 = vpack.c.bf16 %v4340_v61, %v4339_v60 }
 0xf3b   :  { %v3404_v0 = vpop.f32.mrb[22].mxu0 }
 0xf3c   :  { %3645 = vrot.lane.b32.xlu1 %v3328_v39, %s5076_s0  ;;  %v4717_v40 = vpop.f32.mrb[23].mxu0  ;;  %v4332_v39 = vld [vmem:[%s6298_s14 + $0xa8] sm:$0xff] }
 0xf3d   :  { %v4889_v36 = vpack.c.bf16 %v4332_v39, %v4331_v26 }
 0xf3f   :  { %v3556_v1 = vpop.f32.mrb[24].mxu0 }
 0xf40   :  { %3656 = vrot.lane.b32.xlu0 %v3556_v1, %s5075_s22  ;;  %v4727_v2 = vpop.f32.mrb[25].mxu0  ;;  %3660 = vrot.lane.b32.xlu1 %v3632_v59, %s5076_s0  ;;  %v4901_v59 = vpack.c.bf16 %v4338_v55, %v4337_v54 }
 0xf95   :  { %v3638_v53 = vpop.permute.xlu0 %3637 }
 0xf96   :  { %v3648_v6 = vsel %vm480_vm9, %v3100_v58, %v3638_v53  ;;  %v4881_v58 = vpack.c.bf16 %v4328_v41, %v4327_v9 }
 0xf98   :  { %4882 = vmatprep.subr.bf16.mxu0 %v4881_v58 }
 0xfa5   :  { %v3653_v43 = vpop.permute.xlu0 %3652 }
 0xfa6   :  { %v3663_v4 = vsel %vm480_vm9, %v3404_v0, %v3653_v43  ;;  %v4316_v43 = vld [vmem:[%s6294_s10 + $0x1] ss:$0 sm:$0xff] }
 0xfaa   :  { %v3642_v5 = vpop.permute.xlu1 %3641 }
 0xfab   :  { %v3649_v63 = vsel %vm1812_vm14, %v3648_v6, %v3642_v5 }
 0xfae   :  { %v3646_v8 = vpop.permute.xlu1 %3645 }
 0xfaf   :  { %v3650_v11 = vsel %vm1814_vm15, %v3649_v63, %v3646_v8  ;;  %v4318_v8 = vld [vmem:[%s6295_s11 + $0x1] ss:$0 sm:$0xff] }
 0xfb0   :  { %4741 = vmatprep.mubr.msk.f32.mxu0 %vm382_vm7, %v3650_v11 }
 0xfb2   :  { %v3657_v22 = vpop.permute.xlu0 %3656  ;;  %v3661_v3 = vpop.permute.xlu1 %3660 }
 0xfb3   :  { %v3664_v23 = vsel %vm1812_vm14, %v3663_v4, %v3657_v22 }
 0xfb4   :  { %v3665_v13 = vsel %vm1814_vm15, %v3664_v23, %v3661_v3 }
 0xfb5   :  { %4742 = vmatmul.mubr.msk.f32.vlgmr.msra.gmra.mrb[26].mxu0 %vm382_vm7, %v3665_v13 }
 0xfb6   :  { %4884 = vmatpush3.bf16.msra.mxu0 %v4881_v58 }
 0xfb7   :  { %4886 = vmatprep.subr.bf16.mxu0 %v4885_v42 }
 0xfba   :  { %4888 = vmatpush3.bf16.msra.mxu0 %v4885_v42 }
 0xfbb   :  { %4890 = vmatprep.subr.bf16.mxu0 %v4889_v36 }
 0xfbe   :  { %4892 = vmatpush3.bf16.msra.mxu0 %v4889_v36  ;;  %v5077_v36 = vmov 0.0|0.0  }
 0xfbf   :  { %4894 = vmatprep.subr.bf16.mxu0 %v4893_v45  ;;  %4913 = vmatprep.subr.bf16.mxu1 %v5077_v36 }
 0xfc2   :  { %4896 = vmatpush3.bf16.msra.mxu0 %v4893_v45 }
 0xfc3   :  { %4898 = vmatprep.subr.bf16.mxu0 %v4897_v31 }
 0xfc6   :  { %4900 = vmatpush3.bf16.msra.mxu0 %v4897_v31 }
 0xfc7   :  { %4902 = vmatprep.subr.bf16.mxu0 %v4901_v59 }
 0xfca   :  { %4904 = vmatpush3.bf16.msra.mxu0 %v4901_v59  ;;  %v4346_v59 = vld [vmem:[%s6334_s4 + $0x1] ss:$0 sm:$0xff] }
 0xfcb   :  { %4906 = vmatprep.subr.bf16.mxu0 %v4905_v62 }
 0xfce   :  { %4908 = vmatpush3.bf16.msra.mxu0 %v4905_v62 }
0x1088   :  { %v4743_v27 = vpop.f32.mrb[26].mxu0 }
0x1089   :  { %v3757_v25 = vadd.f32 %v4743_v27, %v4312_v24  ;;  %v3751_v46 = vpop.f32.mrb[27].mxu0  ;;  %v4342_v27 = vld [vmem:[%s6298_s14 + $0xf8] sm:$0xff] }
0x108a   :  { %v3752_v48 = vadd.f32 %v4312_v24, %v3751_v46  ;;  %v4341_v24 = vld [vmem:[%s6298_s14 + $0xf0] sm:$0xff]  ;;  %v4324_v46 = vld [vmem:[%s6297_s13 + $0x1] ss:$0 sm:$0xff] }
0x108b   :  { %v3761_v28 = vadd.f32 %v3757_v25, %v5938_v10  ;;  %v4909_v25 = vpack.c.bf16 %v4342_v27, %v4341_v24 }
0x108c   :  { %v3760_v50 = vadd.f32 %v3752_v48, %v5936_v18 }
0x108d   :  { %v3765_v20 = vsel %vm382_vm7, %v3761_v28, 0.0  ;;  %4910 = vmatprep.subr.bf16.mxu0 %v4909_v25 }
0x108e   :  { %3766 = vadd.xlane.f32.xlu1 %v3765_v20  ;;  %v3762_v21 = vsel %vm382_vm7, %v3760_v50, 0.0  ;;  %4912 = vmatpush3.bf16.msra.mxu0 %v4909_v25 }
0x108f   :  { %3763 = vadd.xlane.f32.xlu0 %v3762_v21 }
0x111b   :  { %v3767_v14 = vpop.xlane.xlu1 %3766 }
0x111c   :  { %v3769_v30 = vmul.f32 0.03125, %v3767_v14  ;;  %v3764_v16 = vpop.xlane.xlu0 %3763  ;;  %v4344_v14 = vld [vmem:[%s6333_s3 + $0x1] ss:$0 sm:$0xff]  ;;  %s6337_s3 = sld [smem:[#allocation17_spill]] }
0x111d   :  { %v3768_v38 = vmul.f32 0.03125, %v3764_v16 }
0x111e   :  { %v6160_v29 = vsub.f32 %v3761_v28, %v3769_v30 }
0x111f   :  { %v3770_v56 = vsub.f32 %v3760_v50, %v3768_v38 }
0x1120   :  { %v3773_v10 = vmul.f32 %v6160_v29, %v6160_v29 }
0x1121   :  { %v3772_v37 = vmul.f32 %v3770_v56, %v3770_v56 }
0x1122   :  { %v3777_v18 = vsel %vm382_vm7, %v3773_v10, 0.0  ;;  %v4056_v58 = vld [vmem:[%s6337_s3] sm:$0xff]  ;;  %v4057_v35 = vld [vmem:[%s6337_s3 + $0x8] sm:$0xff]  ;;  %v4058_v26 = vld [vmem:[%s6337_s3 + $0x10] sm:$0xff] }
0x1123   :  { %v3774_v7 = vsel %vm382_vm7, %v3772_v37, 0.0  ;;  %v4914_v42 = vpack.c.bf16 %v4057_v35, %v4056_v58  ;;  %v4059_v39 = vld [vmem:[%s6337_s3 + $0x18] sm:$0xff] }
0x1124   :  { %3775 = vadd.xlane.f32.xlu0 %v3774_v7  ;;  %v4917_v47 = vpack.c.bf16 %v4059_v39, %v4058_v26 }
0x1128   :  { %3778 = vadd.xlane.f32.xlu0 %v3777_v18 }
0x11b1   :  { %v3776_v0 = vpop.xlane.xlu0 %3775 }
0x11b2   :  { %v3780_v40 = vmul.f32 0.03125, %v3776_v0  ;;  %v4348_v0 = vld [vmem:[%s6335_s19 + $0x1] ss:$0 sm:$0xff]  ;;  %s5079_s19 = smov [#allocation5]  }
0x11b3   :  { %s4172_s7 = sshll.u32 %s5079_s19, 4  ;;  %s4173_s7 = int_to_ptr.vmem [resolvable:$true] %s4172_s7 }
0x11b4   :  { %v3782_v1 = vadd.f32 1e-05, %v3780_v40  ;;  %s5039_s16 = scalar_lea.vmem %s4173_s7, 32  ;;  %p5044_p11 = scmp.lt.s32.totalorder %s4173_s7, %s4173_s7 }
0x11b5   :  { %v3779_v2 = vpop.xlane.xlu0 %3778  ;;  %p5040_p10 = scmp.ne.s32.totalorder %s4173_s7, %s5039_s16  ;;  %p5045_p12 = scmp.lt.s32.totalorder %s5039_s16, %s5039_s16 }
0x11b6   :  { %5007 = vrsqrt.f32 %v3782_v1  ;;  %v3781_v53 = vmul.f32 0.03125, %v3779_v2 }
0x11b7   :  { %p5046_p13 = por %p5045_p12, %p5044_p11 }
0x11b8   :  { %v3783_v5 = vadd.f32 1e-05, %v3781_v53 }
0x11b9   :  { %p5047_p0 = pnand %p5046_p13, %p5040_p10 }
0x11ba   :  { %5009 = vrsqrt.f32 %v3783_v5 }
0x11c0   :  { %v5008_v6 = vpop.eup %5007 }
0x11c1   :  { %v3786_v63 = vmul.f32 %v5008_v6, %v3770_v56 }
0x11c3   :  { %v3796_v11 = vmul.f32 %v4316_v43, %v3786_v63 }
0x11c4   :  { %v5010_v4 = vpop.eup %5009 }
0x11c5   :  { %v3787_v22 = vmul.f32 %v5010_v4, %v6160_v29  ;;  %v3806_v3 = vadd.f32 %v4318_v8, %v3796_v11  ;;  %v4349_v11 = vld [vmem:[%s6338_s18] ss:$0 sm:$0xff] }
0x11c7   :  { %v3797_v23 = vmul.f32 %v4316_v43, %v3787_v22  ;;  %4752 = vmatprep.mubr.msk.f32.mxu1 %vm382_vm7, %v3806_v3  ;;  %v5078_v43 = vmov 1966171168  }
0x11c8   :  { %v4142_v63 = vunpack.c.l.s4 %v5078_v43 }
0x11c9   :  { %v3807_v13 = vadd.f32 %v4318_v8, %v3797_v23 }
0x11ca   :  { %v4143_v8 = vunpack.c.0.s8 %v4142_v63 }
0x11cb   :  { %4753 = vmatmul.mubr.msk.f32.vlgmr.msra.gmra.mrb[48].mxu1 %vm382_vm7, %v3807_v13 }
0x11cc   :  { %4798 = vmatprep.mubr.msk.f32.mxu1 %vm5070_vm8, %v5067_v12  ;;  %4915 = vmatpush3.bf16.msra.mxu1 %v4914_v42  ;;  %v4146_v4 = vsub.s32 %v4143_v8, %v5501_v44 }
0x11cd   :  { %4916 = vmatprep.subr.bf16.mxu1 %v5077_v36 }
0x11d0   :  { %4918 = vmatpush3.bf16.msra.mxu1 %v4917_v47 }
0x129e   :  { %v4754_v48 = vpop.f32.mrb[48].mxu1 }
0x129f   :  { %v3899_v28 = vadd.f32 %v4754_v48, %v4324_v46  ;;  %v3893_v50 = vpop.f32.mrb[49].mxu1 }
0x12a0   :  { %v3894_v20 = vadd.f32 %v4324_v46, %v3893_v50 }
0x12a1   :  { %v3903_v21 = vmax.f32 %v3899_v28, 0.0 }
0x12a2   :  { %v3902_v12 = vmax.f32 %v3894_v20, 0.0 }
0x12a4   :  { %4787 = vmatprep.mubr.f32.mxu0 %v3902_v12 }
0x12a5   :  { %4788 = vmatmul.mubr.f32.vlgmr.msra.gmra.mrb[28].mxu0 %v3903_v21 }
0x1378   :  { %v4789_v30 = vpop.f32.mrb[28].mxu0 }
0x1379   :  { %v4001_v16 = vadd.f32 %v4789_v30, %v4344_v14  ;;  %v3995_v38 = vpop.f32.mrb[29].mxu0 }
0x137a   :  { %v3996_v29 = vadd.f32 %v4344_v14, %v3995_v38 }
0x137b   :  { %v4005_v56 = vadd.f32 %v4001_v16, %v3807_v13 }
0x137c   :  { %v4004_v37 = vadd.f32 %v3996_v29, %v3806_v3 }
0x137d   :  { %v4009_v7 = vsel %vm382_vm7, %v4005_v56, 0.0 }
0x137e   :  { %4010 = vadd.xlane.f32.xlu1 %v4009_v7  ;;  %v4006_v10 = vsel %vm382_vm7, %v4004_v37, 0.0 }
0x137f   :  { %4007 = vadd.xlane.f32.xlu0 %v4006_v10 }
0x140b   :  { %v4011_v18 = vpop.xlane.xlu1 %4010 }
0x140c   :  { %v4013_v34 = vmul.f32 0.03125, %v4011_v18  ;;  %v4008_v17 = vpop.xlane.xlu0 %4007 }
0x140d   :  { %v4012_v33 = vmul.f32 0.03125, %v4008_v17 }
0x140e   :  { %v4015_v15 = vsub.f32 %v4005_v56, %v4013_v34 }
0x140f   :  { %v4014_v32 = vsub.f32 %v4004_v37, %v4012_v33 }
0x1410   :  { %v4017_v19 = vmul.f32 %v4015_v15, %v4015_v15 }
0x1411   :  { %v4016_v9 = vmul.f32 %v4014_v32, %v4014_v32 }
0x1412   :  { %v4021_v41 = vsel %vm382_vm7, %v4017_v19, 0.0 }
0x1413   :  { %4022 = vadd.xlane.f32.xlu1 %v4021_v41  ;;  %v4018_v57 = vsel %vm382_vm7, %v4016_v9, 0.0 }
0x1414   :  { %4019 = vadd.xlane.f32.xlu0 %v4018_v57 }
0x14a0   :  { %v4023_v49 = vpop.xlane.xlu1 %4022 }
0x14a1   :  { %v4025_v45 = vmul.f32 0.03125, %v4023_v49  ;;  %v4020_v52 = vpop.xlane.xlu0 %4019 }
0x14a2   :  { %v4024_v51 = vmul.f32 0.03125, %v4020_v52 }
0x14a3   :  { %v4027_v31 = vadd.f32 1e-05, %v4025_v45 }
0x14a4   :  { %v4026_v54 = vadd.f32 1e-05, %v4024_v51 }
0x14a5   :  { %5011 = vrsqrt.f32 %v4027_v31 }
0x14a6   :  { %5013 = vrsqrt.f32 %v4026_v54 }
0x14af   :  { %v5012_v55 = vpop.eup %5011 }
0x14b0   :  { %v5014_v60 = vpop.eup %5013  ;;  %v4031_v61 = vmul.f32 %v5012_v55, %v4015_v15 }
0x14b1   :  { %v4030_v62 = vmul.f32 %v5014_v60, %v4014_v32 }
0x14b2   :  { %v4041_v40 = vmul.f32 %v4346_v59, %v4031_v61 }
0x14b3   :  { %v4040_v1 = vmul.f32 %v4346_v59, %v4030_v62 }
0x14b4   :  { %v4051_v2 = vadd.f32 %v4348_v0, %v4041_v40 }
0x14b5   :  { %v4050_v53 = vadd.f32 %v4348_v0, %v4040_v1 }
0x14b6   :  { %v4053_v5 = vrot.slane %v4051_v2, 7 }
0x14b8   :  { %v4055_v6 = vsel %vm204_vm0, %v4050_v53, %v4053_v5 }
0x14b9   :  { %4799 = vmatmul.mubr.msk.f32.vlgmr.msra.gmra.mrb[50].mxu1 %vm382_vm7, %v4055_v6 }
0x158c   :  { %v4136_v22 = vpop.f32.mrb[50].mxu1 }
0x158d   :  { %v4137_v3 = vadd.f32 %v4349_v11, %v4136_v22  ;;  %v4800_v23 = vpop.f32.mrb[51].mxu1 }
0x158f   :  { %v4147_v13 = vrot.slane %v4137_v3, %v4146_v4 }
0x1591   :  { %v4148_v24 = vcombine.high %v4147_v13, %v4147_v13  ;;  %4351 = vst.sshfl [vmem:[#allocation5] sm:$0x1 pattern:$0x73625140] %v4147_v13 }
0x1593   :  { %4352 = vst.sshfl [vmem:[#allocation5 + $0x1] sm:$0x1 pattern:$0x73625140] %v4148_v24 }
0x1594   :  { %5050 = shalt.err (!%p5047_p0)
}
0x1595   :  { %s6339_s12 = sld [smem:[#allocation19_spill]] }
0x159b   :  { %s5051_s10 = scalar_lea.hbm %s6339_s12, 32 }
0x159c   :  { %p5052_p1 = scmp.ne.s32.totalorder %s6339_s12, %s5051_s10  ;;  %p5055_p2 = scmp.lt.u32.totalorder %s5051_s10, %s6339_s12 }
0x159e   :  { %p5057_p3 = pnand %p5055_p2, %p5052_p1 }
0x15a0   :  { %5060 = shalt.err (!%p5057_p3)
}
0x15a1   :  { %s5080_s2 = smov 1  }
0x15a2   :  { %4178 = dma.vmem_to_hbm [thread:$0]  %s4173_s7, 32, %s6339_s12, [#allocation6], %s5075_s22, %s5075_s22, %s5080_s2  }
0x15a3   :  { %5063 = dma.done.wait [#allocation6], 32  }
0x15a4   :  { %5064 = vsyncadd [#allocation6], 4294967264 }
0x15a5   :  { %4182 = vsyncpa [#allocation6], 1 }

</bundles_post_ra>
